<compile_context>
chip_gen: v5e
topology: v5e:2x2
jax: 0.10.0
libtpu: 0.0.40
codegen_flags: <defaults>
</compile_context>

<pallas_src>
import functools

import jax
import jax.numpy as jnp
from jax.experimental import pallas as pl
from jax.experimental.pallas import tpu as pltpu

EPS = 1e-5
LANES = 128


def down_kernel(x_ref, w1_ref, g1_ref, be1_ref, w2_ref, g2_ref, be2_ref,
                o_ref, pad1_ref, pad2_ref, *, lane_dense_out):
    N, Hh, _, Wh, two_cin = x_ref.shape
    Cin = two_cin // 2
    Cmid = w1_ref.shape[2]
    Cout = w2_ref.shape[2]
    M = N * Hh * Wh

    # ---- MaxPool2d(2) on the (N, Hh, 2, Wh, 2*Cin) window view, in bf16 ----
    # (max-pooling commutes with bf16 rounding, so this is bit-identical to
    #  pooling in f32 followed by a bf16 cast).
    x = x_ref[...]
    xh = jnp.maximum(x[:, :, 0], x[:, :, 1])              # H-direction max
    pooled = jnp.maximum(xh[..., :Cin], xh[..., Cin:])    # W-direction max
    # pooled: (N, Hh, Wh, Cin) bf16

    def store_padded(pad_ref, value_f32):
        # Zero halo (whole scratch, written exactly once at grid=()) plus a
        # single interior slab store - no concat-assembled halo.
        pad_ref[...] = jnp.zeros(pad_ref.shape, pad_ref.dtype)
        pad_ref[:, 1:Hh + 1, 1:Wh + 1, :] = value_f32

    def conv_bn_relu(pad_ref, w_ref, g_ref, be_ref, cin, cout):
        # Narrow-channel conv: nine K=cin matmuls (one per (dy, dx) tap),
        # statically unrolled, f32 accumulation.  No lane-packing concat:
        # each tap is a shifted window of the padded scratch whose reshape
        # only merges major dims.
        # TODO(synk): switch to a single K=9*cin im2col matmul when cin >= 64
        # (MXU-bound regime); at cin=4..8 the layer is layout-bound.
        acc = jnp.zeros((M, cout), jnp.float32)
        for dy in range(3):
            for dx in range(3):
                tap = pad_ref[:, dy:dy + Hh, dx:dx + Wh, :]     # (N,Hh,Wh,cin)
                tap = tap.reshape(M, cin).astype(jnp.bfloat16)  # MXU operand
                acc = acc + jnp.dot(tap, w_ref[dy * 3 + dx],
                                    preferred_element_type=jnp.float32)
        # Conv bias omitted: training-mode BN subtracts the batch mean, which
        # cancels a per-channel bias exactly.
        # Single-pass BN statistics (sum / sum-of-squares), f32.
        s = jnp.sum(acc, axis=0, keepdims=True)                 # (1, cout)
        ss = jnp.sum(acc * acc, axis=0, keepdims=True)          # (1, cout)
        mean = s * (1.0 / M)
        var = ss * (1.0 / M) - mean * mean
        scale = g_ref[...] * jax.lax.rsqrt(var + EPS)           # (1, cout)
        shift = be_ref[...] - mean * scale
        return jnp.maximum(acc * scale + shift, 0.0)            # ReLU, (M, cout)

    # conv1: pooled -> pad1 -> conv/BN/ReLU
    store_padded(pad1_ref, pooled.astype(jnp.float32))
    h1 = conv_bn_relu(pad1_ref, w1_ref, g1_ref, be1_ref, Cin, Cmid)

    # conv2: conv1's activation goes straight into pad2's interior
    store_padded(pad2_ref, h1.reshape(N, Hh, Wh, Cmid))
    h2 = conv_bn_relu(pad2_ref, w2_ref, g2_ref, be2_ref, Cmid, Cout)

    if lane_dense_out:
        # Cout < 128: a (M, Cout) store would be all masked vst.msk partial
        # stores.  Emit (Cout, M) instead (M % 128 == 0 -> unmasked, dense
        # lanes).  Pad channels to 128 lanes first so the transpose is a
        # native full-tile relayout, then keep the first Cout rows.
        zpad = jnp.zeros((M, LANES - Cout), jnp.float32)
        h2t = jnp.concatenate([h2, zpad], axis=-1).T            # (128, M)
        o_ref[...] = h2t[:Cout, :]
    else:
        o_ref[...] = h2                                         # already dense


def down_forward_nhwc(x_nhwc, w1, g1, be1, w2, g2, be2):
    """NHWC entry point (keeps UNet activations NHWC end-to-end).

    x_nhwc: (N, H, W, Cin).  Returns (N, H//2, W//2, Cout) float32.
    Conv biases are omitted on purpose: training-mode BatchNorm cancels them.
    """
    N, H, W, Cin = x_nhwc.shape
    Hh, Wh = H // 2, W // 2
    Cmid, Cout = w1.shape[-1], w2.shape[-1]
    M = N * Hh * Wh

    # bf16 activation path (halves the dominant input HBM DMA).  Crop odd
    # H/W first (MaxPool2d floor semantics).
    x = x_nhwc[:, :2 * Hh, :2 * Wh, :].astype(jnp.bfloat16)
    # 2x2-window view for in-kernel pooling.  TODO(synk): this reshape is
    # still one wrapper-side relayout of the (now bf16) input; fold it into
    # the kernel with stride-2 `pl.ds` loads from plain NHWC once validated.
    x5 = x.reshape(N, Hh, 2, Wh, 2 * Cin)

    # HWIO conv weights as (9, cin, cout) bf16 tap slabs.
    w9_1 = w1.reshape(9, Cin, Cmid).astype(jnp.bfloat16)
    w9_2 = w2.reshape(9, Cmid, Cout).astype(jnp.bfloat16)
    vec = lambda v: v.reshape(1, -1).astype(jnp.float32)        # (C,) -> (1, C)

    lane_dense_out = (Cout < LANES) and (M % LANES == 0)
    out_shape = (Cout, M) if lane_dense_out else (M, Cout)

    flops = 2 * M * (9 * Cin) * Cmid + 2 * M * (9 * Cmid) * Cout
    bytes_accessed = (x5.size * 2 + (w9_1.size + w9_2.size) * 2
                      + 2 * (Cmid + Cout) * 4 + M * Cout * 4)

    out = pl.pallas_call(
        functools.partial(down_kernel, lane_dense_out=lane_dense_out),
        out_shape=jax.ShapeDtypeStruct(out_shape, jnp.float32),
        in_specs=[pl.BlockSpec(memory_space=pltpu.MemorySpace.VMEM)] * 7,
        out_specs=pl.BlockSpec(memory_space=pltpu.MemorySpace.VMEM),
        scratch_shapes=[
            # f32 on purpose (see NOTE at top of file): keeps the +1-offset
            # interior store a plain masked 32-bit store.
            pltpu.VMEM((N, Hh + 2, Wh + 2, Cin), jnp.float32),   # padded pool
            pltpu.VMEM((N, Hh + 2, Wh + 2, Cmid), jnp.float32),  # padded conv1
        ],
        compiler_params=pltpu.CompilerParams(
            vmem_limit_bytes=32 * 1024 * 1024),
        cost_estimate=pl.CostEstimate(flops=flops, transcendentals=0,
                                      bytes_accessed=bytes_accessed),
    )(x5, w9_1, vec(g1), vec(be1), w9_2, vec(g2), vec(be2))

    if lane_dense_out:
        out = out.T                      # (M, Cout): wrapper-side layout plumbing
    return out.reshape(N, Hh, Wh, Cout)


@jax.jit
def down_forward(x_nchw, w1, b1, g1, be1, w2, b2, g2, be2):
    """NCHW wrapper for PyTorch API parity.

    b1/b2 are accepted but unused: training-mode BatchNorm subtracts the batch
    mean, which cancels a per-channel conv bias exactly (eval-mode BN with
    running stats would need them added back).
    """
    del b1, b2
    x = jnp.transpose(x_nchw, (0, 2, 3, 1)).astype(jnp.float32)   # NHWC
    out = down_forward_nhwc(x, w1, g1, be1, w2, g2, be2)
    return jnp.transpose(out, (0, 3, 1, 2))                        # back to NCHW


def down_reference(x_nchw, w1, b1, g1, be1, w2, b2, g2, be2):
    """Pure-JAX f32 reference (NCHW in/out) matching the PyTorch forward."""
    x = jnp.transpose(x_nchw, (0, 2, 3, 1)).astype(jnp.float32)
    pooled = jax.lax.reduce_window(x, -jnp.inf, jax.lax.max,
                                   (1, 2, 2, 1), (1, 2, 2, 1), 'VALID')

    def block(h, w, b, g, be):
        y = jax.lax.conv_general_dilated(
            h, w, (1, 1), 'SAME',
            dimension_numbers=('NHWC', 'HWIO', 'NHWC'),
            precision=jax.lax.Precision.HIGHEST) + b.reshape(1, 1, 1, -1)
        m = jnp.mean(y, axis=(0, 1, 2), keepdims=True)
        v = jnp.mean((y - m) ** 2, axis=(0, 1, 2), keepdims=True)
        y = (y - m) * jax.lax.rsqrt(v + EPS) * g.reshape(1, 1, 1, -1) \
            + be.reshape(1, 1, 1, -1)
        return jnp.maximum(y, 0.0)

    h = block(pooled, w1, b1, g1, be1)
    h = block(h, w2, b2, g2, be2)
    return jnp.transpose(h, (0, 3, 1, 2))


if __name__ == "__main__":
    # Down(in_channels=4, out_channels=8) on a (2, 4, 16, 16) input.
    N, Cin, H, W = 2, 4, 16, 16
    Cmid = Cout = 8

    key = jax.random.PRNGKey(0)
    kx, k1, k2, kb1, kb2, kg1, kg2, kbe1, kbe2 = jax.random.split(key, 9)

    x = jax.random.normal(kx, (N, Cin, H, W), dtype=jnp.float32)

    # Deterministic synthetic parameters (HWIO conv weights).
    w1 = jax.random.normal(k1, (3, 3, Cin, Cmid), dtype=jnp.float32) * 0.2
    b1 = jax.random.normal(kb1, (Cmid,), dtype=jnp.float32) * 0.1
    g1 = 1.0 + 0.1 * jax.random.normal(kg1, (Cmid,), dtype=jnp.float32)
    be1 = 0.1 * jax.random.normal(kbe1, (Cmid,), dtype=jnp.float32)

    w2 = jax.random.normal(k2, (3, 3, Cmid, Cout), dtype=jnp.float32) * 0.2
    b2 = jax.random.normal(kb2, (Cout,), dtype=jnp.float32) * 0.1
    g2 = 1.0 + 0.1 * jax.random.normal(kg2, (Cout,), dtype=jnp.float32)
    be2 = 0.1 * jax.random.normal(kbe2, (Cout,), dtype=jnp.float32)

    out = down_forward(x, w1, b1, g1, be1, w2, b2, g2, be2)
    out = jax.block_until_ready(out)
    assert out.shape == (N, Cout, H // 2, W // 2), out.shape

    ref = jax.block_until_ready(
        down_reference(x, w1, b1, g1, be1, w2, b2, g2, be2))
    # Tolerance sized for the bf16 activation/weight path (f32 accumulation,
    # BN and ReLU); genuine layout or indexing bugs produce O(1) errors.
    err = float(jnp.max(jnp.abs(out - ref)))
    assert jnp.allclose(out, ref, atol=5e-2, rtol=5e-2), err

    print("KERNEL_OK")
</pallas_src>

<mosaic_0001>
module attributes {stable_mosaic.version = 11 : i64} {
  func.func @down_kernel(%arg0: memref<2x8x2x8x8xbf16, #tpu.memory_space<vmem>>, %arg1: memref<9x4x8xbf16, #tpu.memory_space<vmem>>, %arg2: memref<1x8xf32, #tpu.memory_space<vmem>>, %arg3: memref<1x8xf32, #tpu.memory_space<vmem>>, %arg4: memref<9x8x8xbf16, #tpu.memory_space<vmem>>, %arg5: memref<1x8xf32, #tpu.memory_space<vmem>>, %arg6: memref<1x8xf32, #tpu.memory_space<vmem>>, %arg7: memref<8x128xf32, #tpu.memory_space<vmem>>, %arg8: memref<2x10x10x4xf32, #tpu.memory_space<vmem>>, %arg9: memref<2x10x10x8xf32, #tpu.memory_space<vmem>>) attributes {dimension_semantics = [], scalar_prefetch = 0 : i64, scratch_operands = 2 : i64, tpu.core_type = #tpu.core_type<tc>} {
    %c0 = arith.constant 0 : index
    %c0_0 = arith.constant 0 : index
    %c0_1 = arith.constant 0 : index
    %c0_2 = arith.constant 0 : index
    %c0_3 = arith.constant 0 : index
    %0 = vector.load %arg0[%c0, %c0_0, %c0_1, %c0_2, %c0_3] : memref<2x8x2x8x8xbf16, #tpu.memory_space<vmem>>, vector<2x8x2x8x8xbf16>
    %1 = vector.extract_strided_slice %0 {offsets = [0, 0, 0, 0, 0], sizes = [2, 8, 1, 8, 8], strides = [1, 1, 1, 1, 1]} : vector<2x8x2x8x8xbf16> to vector<2x8x1x8x8xbf16>
    %2 = vector.shape_cast %1 : vector<2x8x1x8x8xbf16> to vector<2x8x8x8xbf16>
    %3 = vector.extract_strided_slice %0 {offsets = [0, 0, 1, 0, 0], sizes = [2, 8, 1, 8, 8], strides = [1, 1, 1, 1, 1]} : vector<2x8x2x8x8xbf16> to vector<2x8x1x8x8xbf16>
    %4 = vector.shape_cast %3 : vector<2x8x1x8x8xbf16> to vector<2x8x8x8xbf16>
    %5 = arith.maximumf %2, %4 : vector<2x8x8x8xbf16>
    %6 = vector.extract_strided_slice %5 {offsets = [0, 0, 0, 0], sizes = [2, 8, 8, 4], strides = [1, 1, 1, 1]} : vector<2x8x8x8xbf16> to vector<2x8x8x4xbf16>
    %7 = vector.extract_strided_slice %5 {offsets = [0, 0, 0, 4], sizes = [2, 8, 8, 4], strides = [1, 1, 1, 1]} : vector<2x8x8x8xbf16> to vector<2x8x8x4xbf16>
    %8 = arith.maximumf %6, %7 : vector<2x8x8x4xbf16>
    %9 = arith.extf %8 : vector<2x8x8x4xbf16> to vector<2x8x8x4xf32>
    %cst = arith.constant 0.000000e+00 : f32
    %10 = vector.broadcast %cst : f32 to vector<2x10x10x4xf32>
    %c0_4 = arith.constant 0 : index
    %c0_5 = arith.constant 0 : index
    %c0_6 = arith.constant 0 : index
    %c0_7 = arith.constant 0 : index
    %11 = vector.load %arg8[%c0_4, %c0_5, %c0_6, %c0_7] : memref<2x10x10x4xf32, #tpu.memory_space<vmem>>, vector<2x10x10x4xf32>
    tpu.vector_store %arg8[%c0_4, %c0_5, %c0_6, %c0_7], %10 {strides = array<i32>} : memref<2x10x10x4xf32, #tpu.memory_space<vmem>>, vector<2x10x10x4xf32>,
    %c0_8 = arith.constant 0 : index
    %c1 = arith.constant 1 : index
    %c1_9 = arith.constant 1 : index
    %c0_10 = arith.constant 0 : index
    %12 = vector.load %arg8[%c0_8, %c1, %c1_9, %c0_10] : memref<2x10x10x4xf32, #tpu.memory_space<vmem>>, vector<2x8x8x4xf32>
    tpu.vector_store %arg8[%c0_8, %c1, %c1_9, %c0_10], %9 {strides = array<i32>} : memref<2x10x10x4xf32, #tpu.memory_space<vmem>>, vector<2x8x8x4xf32>,
    %cst_11 = arith.constant 0.000000e+00 : f32
    %13 = vector.broadcast %cst_11 : f32 to vector<128x8xf32>
    %c0_12 = arith.constant 0 : index
    %c0_13 = arith.constant 0 : index
    %c0_14 = arith.constant 0 : index
    %c0_15 = arith.constant 0 : index
    %14 = vector.load %arg8[%c0_12, %c0_13, %c0_14, %c0_15] : memref<2x10x10x4xf32, #tpu.memory_space<vmem>>, vector<2x8x8x4xf32>
    %15 = vector.shape_cast %14 : vector<2x8x8x4xf32> to vector<128x4xf32>
    %16 = arith.truncf %15 : vector<128x4xf32> to vector<128x4xbf16>
    %c0_16 = arith.constant 0 : index
    %c0_17 = arith.constant 0 : index
    %c0_18 = arith.constant 0 : index
    %17 = vector.load %arg1[%c0_16, %c0_17, %c0_18] : memref<9x4x8xbf16, #tpu.memory_space<vmem>>, vector<1x4x8xbf16>
    %18 = vector.shape_cast %17 : vector<1x4x8xbf16> to vector<4x8xbf16>
    %cst_19 = arith.constant dense<0.000000e+00> : vector<128x8xf32>
    %19 = tpu.matmul %16, %18, %cst_19 {dimension_numbers = #tpu.dot_dimension_numbers<[1], [0], [0], [1], [0, 0, 1, 1], [], []>} : vector<128x4xbf16>, vector<4x8xbf16>, vector<128x8xf32> -> vector<128x8xf32>
    %20 = arith.addf %13, %19 : vector<128x8xf32>
    %c0_20 = arith.constant 0 : index
    %c0_21 = arith.constant 0 : index
    %c1_22 = arith.constant 1 : index
    %c0_23 = arith.constant 0 : index
    %21 = vector.load %arg8[%c0_20, %c0_21, %c1_22, %c0_23] : memref<2x10x10x4xf32, #tpu.memory_space<vmem>>, vector<2x8x8x4xf32>
    %22 = vector.shape_cast %21 : vector<2x8x8x4xf32> to vector<128x4xf32>
    %23 = arith.truncf %22 : vector<128x4xf32> to vector<128x4xbf16>
    %c1_24 = arith.constant 1 : index
    %c0_25 = arith.constant 0 : index
    %c0_26 = arith.constant 0 : index
    %24 = vector.load %arg1[%c1_24, %c0_25, %c0_26] : memref<9x4x8xbf16, #tpu.memory_space<vmem>>, vector<1x4x8xbf16>
    %25 = vector.shape_cast %24 : vector<1x4x8xbf16> to vector<4x8xbf16>
    %cst_27 = arith.constant dense<0.000000e+00> : vector<128x8xf32>
    %26 = tpu.matmul %23, %25, %cst_27 {dimension_numbers = #tpu.dot_dimension_numbers<[1], [0], [0], [1], [0, 0, 1, 1], [], []>} : vector<128x4xbf16>, vector<4x8xbf16>, vector<128x8xf32> -> vector<128x8xf32>
    %27 = arith.addf %20, %26 : vector<128x8xf32>
    %c0_28 = arith.constant 0 : index
    %c0_29 = arith.constant 0 : index
    %c2 = arith.constant 2 : index
    %c0_30 = arith.constant 0 : index
    %28 = vector.load %arg8[%c0_28, %c0_29, %c2, %c0_30] : memref<2x10x10x4xf32, #tpu.memory_space<vmem>>, vector<2x8x8x4xf32>
    %29 = vector.shape_cast %28 : vector<2x8x8x4xf32> to vector<128x4xf32>
    %30 = arith.truncf %29 : vector<128x4xf32> to vector<128x4xbf16>
    %c2_31 = arith.constant 2 : index
    %c0_32 = arith.constant 0 : index
    %c0_33 = arith.constant 0 : index
    %31 = vector.load %arg1[%c2_31, %c0_32, %c0_33] : memref<9x4x8xbf16, #tpu.memory_space<vmem>>, vector<1x4x8xbf16>
    %32 = vector.shape_cast %31 : vector<1x4x8xbf16> to vector<4x8xbf16>
    %cst_34 = arith.constant dense<0.000000e+00> : vector<128x8xf32>
    %33 = tpu.matmul %30, %32, %cst_34 {dimension_numbers = #tpu.dot_dimension_numbers<[1], [0], [0], [1], [0, 0, 1, 1], [], []>} : vector<128x4xbf16>, vector<4x8xbf16>, vector<128x8xf32> -> vector<128x8xf32>
    %34 = arith.addf %27, %33 : vector<128x8xf32>
    %c0_35 = arith.constant 0 : index
    %c1_36 = arith.constant 1 : index
    %c0_37 = arith.constant 0 : index
    %c0_38 = arith.constant 0 : index
    %35 = vector.load %arg8[%c0_35, %c1_36, %c0_37, %c0_38] : memref<2x10x10x4xf32, #tpu.memory_space<vmem>>, vector<2x8x8x4xf32>
    %36 = vector.shape_cast %35 : vector<2x8x8x4xf32> to vector<128x4xf32>
    %37 = arith.truncf %36 : vector<128x4xf32> to vector<128x4xbf16>
    %c3 = arith.constant 3 : index
    %c0_39 = arith.constant 0 : index
    %c0_40 = arith.constant 0 : index
    %38 = vector.load %arg1[%c3, %c0_39, %c0_40] : memref<9x4x8xbf16, #tpu.memory_space<vmem>>, vector<1x4x8xbf16>
    %39 = vector.shape_cast %38 : vector<1x4x8xbf16> to vector<4x8xbf16>
    %cst_41 = arith.constant dense<0.000000e+00> : vector<128x8xf32>
    %40 = tpu.matmul %37, %39, %cst_41 {dimension_numbers = #tpu.dot_dimension_numbers<[1], [0], [0], [1], [0, 0, 1, 1], [], []>} : vector<128x4xbf16>, vector<4x8xbf16>, vector<128x8xf32> -> vector<128x8xf32>
    %41 = arith.addf %34, %40 : vector<128x8xf32>
    %c0_42 = arith.constant 0 : index
    %c1_43 = arith.constant 1 : index
    %c1_44 = arith.constant 1 : index
    %c0_45 = arith.constant 0 : index
    %42 = vector.load %arg8[%c0_42, %c1_43, %c1_44, %c0_45] : memref<2x10x10x4xf32, #tpu.memory_space<vmem>>, vector<2x8x8x4xf32>
    %43 = vector.shape_cast %42 : vector<2x8x8x4xf32> to vector<128x4xf32>
    %44 = arith.truncf %43 : vector<128x4xf32> to vector<128x4xbf16>
    %c4 = arith.constant 4 : index
    %c0_46 = arith.constant 0 : index
    %c0_47 = arith.constant 0 : index
    %45 = vector.load %arg1[%c4, %c0_46, %c0_47] : memref<9x4x8xbf16, #tpu.memory_space<vmem>>, vector<1x4x8xbf16>
    %46 = vector.shape_cast %45 : vector<1x4x8xbf16> to vector<4x8xbf16>
    %cst_48 = arith.constant dense<0.000000e+00> : vector<128x8xf32>
    %47 = tpu.matmul %44, %46, %cst_48 {dimension_numbers = #tpu.dot_dimension_numbers<[1], [0], [0], [1], [0, 0, 1, 1], [], []>} : vector<128x4xbf16>, vector<4x8xbf16>, vector<128x8xf32> -> vector<128x8xf32>
    %48 = arith.addf %41, %47 : vector<128x8xf32>
    %c0_49 = arith.constant 0 : index
    %c1_50 = arith.constant 1 : index
    %c2_51 = arith.constant 2 : index
    %c0_52 = arith.constant 0 : index
    %49 = vector.load %arg8[%c0_49, %c1_50, %c2_51, %c0_52] : memref<2x10x10x4xf32, #tpu.memory_space<vmem>>, vector<2x8x8x4xf32>
    %50 = vector.shape_cast %49 : vector<2x8x8x4xf32> to vector<128x4xf32>
    %51 = arith.truncf %50 : vector<128x4xf32> to vector<128x4xbf16>
    %c5 = arith.constant 5 : index
    %c0_53 = arith.constant 0 : index
    %c0_54 = arith.constant 0 : index
    %52 = vector.load %arg1[%c5, %c0_53, %c0_54] : memref<9x4x8xbf16, #tpu.memory_space<vmem>>, vector<1x4x8xbf16>
    %53 = vector.shape_cast %52 : vector<1x4x8xbf16> to vector<4x8xbf16>
    %cst_55 = arith.constant dense<0.000000e+00> : vector<128x8xf32>
    %54 = tpu.matmul %51, %53, %cst_55 {dimension_numbers = #tpu.dot_dimension_numbers<[1], [0], [0], [1], [0, 0, 1, 1], [], []>} : vector<128x4xbf16>, vector<4x8xbf16>, vector<128x8xf32> -> vector<128x8xf32>
    %55 = arith.addf %48, %54 : vector<128x8xf32>
    %c0_56 = arith.constant 0 : index
    %c2_57 = arith.constant 2 : index
    %c0_58 = arith.constant 0 : index
    %c0_59 = arith.constant 0 : index
    %56 = vector.load %arg8[%c0_56, %c2_57, %c0_58, %c0_59] : memref<2x10x10x4xf32, #tpu.memory_space<vmem>>, vector<2x8x8x4xf32>
    %57 = vector.shape_cast %56 : vector<2x8x8x4xf32> to vector<128x4xf32>
    %58 = arith.truncf %57 : vector<128x4xf32> to vector<128x4xbf16>
    %c6 = arith.constant 6 : index
    %c0_60 = arith.constant 0 : index
    %c0_61 = arith.constant 0 : index
    %59 = vector.load %arg1[%c6, %c0_60, %c0_61] : memref<9x4x8xbf16, #tpu.memory_space<vmem>>, vector<1x4x8xbf16>
    %60 = vector.shape_cast %59 : vector<1x4x8xbf16> to vector<4x8xbf16>
    %cst_62 = arith.constant dense<0.000000e+00> : vector<128x8xf32>
    %61 = tpu.matmul %58, %60, %cst_62 {dimension_numbers = #tpu.dot_dimension_numbers<[1], [0], [0], [1], [0, 0, 1, 1], [], []>} : vector<128x4xbf16>, vector<4x8xbf16>, vector<128x8xf32> -> vector<128x8xf32>
    %62 = arith.addf %55, %61 : vector<128x8xf32>
    %c0_63 = arith.constant 0 : index
    %c2_64 = arith.constant 2 : index
    %c1_65 = arith.constant 1 : index
    %c0_66 = arith.constant 0 : index
    %63 = vector.load %arg8[%c0_63, %c2_64, %c1_65, %c0_66] : memref<2x10x10x4xf32, #tpu.memory_space<vmem>>, vector<2x8x8x4xf32>
    %64 = vector.shape_cast %63 : vector<2x8x8x4xf32> to vector<128x4xf32>
    %65 = arith.truncf %64 : vector<128x4xf32> to vector<128x4xbf16>
    %c7 = arith.constant 7 : index
    %c0_67 = arith.constant 0 : index
    %c0_68 = arith.constant 0 : index
    %66 = vector.load %arg1[%c7, %c0_67, %c0_68] : memref<9x4x8xbf16, #tpu.memory_space<vmem>>, vector<1x4x8xbf16>
    %67 = vector.shape_cast %66 : vector<1x4x8xbf16> to vector<4x8xbf16>
    %cst_69 = arith.constant dense<0.000000e+00> : vector<128x8xf32>
    %68 = tpu.matmul %65, %67, %cst_69 {dimension_numbers = #tpu.dot_dimension_numbers<[1], [0], [0], [1], [0, 0, 1, 1], [], []>} : vector<128x4xbf16>, vector<4x8xbf16>, vector<128x8xf32> -> vector<128x8xf32>
    %69 = arith.addf %62, %68 : vector<128x8xf32>
    %c0_70 = arith.constant 0 : index
    %c2_71 = arith.constant 2 : index
    %c2_72 = arith.constant 2 : index
    %c0_73 = arith.constant 0 : index
    %70 = vector.load %arg8[%c0_70, %c2_71, %c2_72, %c0_73] : memref<2x10x10x4xf32, #tpu.memory_space<vmem>>, vector<2x8x8x4xf32>
    %71 = vector.shape_cast %70 : vector<2x8x8x4xf32> to vector<128x4xf32>
    %72 = arith.truncf %71 : vector<128x4xf32> to vector<128x4xbf16>
    %c8 = arith.constant 8 : index
    %c0_74 = arith.constant 0 : index
    %c0_75 = arith.constant 0 : index
    %73 = vector.load %arg1[%c8, %c0_74, %c0_75] : memref<9x4x8xbf16, #tpu.memory_space<vmem>>, vector<1x4x8xbf16>
    %74 = vector.shape_cast %73 : vector<1x4x8xbf16> to vector<4x8xbf16>
    %cst_76 = arith.constant dense<0.000000e+00> : vector<128x8xf32>
    %75 = tpu.matmul %72, %74, %cst_76 {dimension_numbers = #tpu.dot_dimension_numbers<[1], [0], [0], [1], [0, 0, 1, 1], [], []>} : vector<128x4xbf16>, vector<4x8xbf16>, vector<128x8xf32> -> vector<128x8xf32>
    %76 = arith.addf %69, %75 : vector<128x8xf32>
    %cst_77 = arith.constant dense<0.000000e+00> : vector<8xf32>
    %77 = vector.multi_reduction <add>, %76, %cst_77 [0] : vector<128x8xf32> to vector<8xf32>
    %78 = vector.shape_cast %77 : vector<8xf32> to vector<1x8xf32>
    %79 = arith.mulf %76, %76 : vector<128x8xf32>
    %cst_78 = arith.constant dense<0.000000e+00> : vector<8xf32>
    %80 = vector.multi_reduction <add>, %79, %cst_78 [0] : vector<128x8xf32> to vector<8xf32>
    %81 = vector.shape_cast %80 : vector<8xf32> to vector<1x8xf32>
    %cst_79 = arith.constant 7.812500e-03 : f32
    %82 = vector.broadcast %cst_79 : f32 to vector<1x8xf32>
    %83 = arith.mulf %78, %82 : vector<1x8xf32>
    %cst_80 = arith.constant 7.812500e-03 : f32
    %84 = vector.broadcast %cst_80 : f32 to vector<1x8xf32>
    %85 = arith.mulf %81, %84 : vector<1x8xf32>
    %86 = arith.mulf %83, %83 : vector<1x8xf32>
    %87 = arith.subf %85, %86 : vector<1x8xf32>
    %c0_81 = arith.constant 0 : index
    %c0_82 = arith.constant 0 : index
    %88 = vector.load %arg2[%c0_81, %c0_82] : memref<1x8xf32, #tpu.memory_space<vmem>>, vector<1x8xf32>
    %cst_83 = arith.constant 9.99999974E-6 : f32
    %89 = vector.broadcast %cst_83 : f32 to vector<1x8xf32>
    %90 = arith.addf %87, %89 : vector<1x8xf32>
    %91 = math.rsqrt %90 : vector<1x8xf32>
    %92 = arith.mulf %88, %91 : vector<1x8xf32>
    %c0_84 = arith.constant 0 : index
    %c0_85 = arith.constant 0 : index
    %93 = vector.load %arg3[%c0_84, %c0_85] : memref<1x8xf32, #tpu.memory_space<vmem>>, vector<1x8xf32>
    %94 = arith.mulf %83, %92 : vector<1x8xf32>
    %95 = arith.subf %93, %94 : vector<1x8xf32>
    %96 = vector.broadcast %92 : vector<1x8xf32> to vector<128x8xf32>
    %97 = arith.mulf %76, %96 : vector<128x8xf32>
    %98 = vector.broadcast %95 : vector<1x8xf32> to vector<128x8xf32>
    %99 = arith.addf %97, %98 : vector<128x8xf32>
    %cst_86 = arith.constant 0.000000e+00 : f32
    %100 = vector.broadcast %cst_86 : f32 to vector<128x8xf32>
    %101 = arith.maximumf %99, %100 : vector<128x8xf32>
    %102 = vector.shape_cast %101 : vector<128x8xf32> to vector<2x8x8x8xf32>
    %cst_87 = arith.constant 0.000000e+00 : f32
    %103 = vector.broadcast %cst_87 : f32 to vector<2x10x10x8xf32>
    %c0_88 = arith.constant 0 : index
    %c0_89 = arith.constant 0 : index
    %c0_90 = arith.constant 0 : index
    %c0_91 = arith.constant 0 : index
    %104 = vector.load %arg9[%c0_88, %c0_89, %c0_90, %c0_91] : memref<2x10x10x8xf32, #tpu.memory_space<vmem>>, vector<2x10x10x8xf32>
    tpu.vector_store %arg9[%c0_88, %c0_89, %c0_90, %c0_91], %103 {strides = array<i32>} : memref<2x10x10x8xf32, #tpu.memory_space<vmem>>, vector<2x10x10x8xf32>,
    %c0_92 = arith.constant 0 : index
    %c1_93 = arith.constant 1 : index
    %c1_94 = arith.constant 1 : index
    %c0_95 = arith.constant 0 : index
    %105 = vector.load %arg9[%c0_92, %c1_93, %c1_94, %c0_95] : memref<2x10x10x8xf32, #tpu.memory_space<vmem>>, vector<2x8x8x8xf32>
    tpu.vector_store %arg9[%c0_92, %c1_93, %c1_94, %c0_95], %102 {strides = array<i32>} : memref<2x10x10x8xf32, #tpu.memory_space<vmem>>, vector<2x8x8x8xf32>,
    %cst_96 = arith.constant 0.000000e+00 : f32
    %106 = vector.broadcast %cst_96 : f32 to vector<128x8xf32>
    %c0_97 = arith.constant 0 : index
    %c0_98 = arith.constant 0 : index
    %c0_99 = arith.constant 0 : index
    %c0_100 = arith.constant 0 : index
    %107 = vector.load %arg9[%c0_97, %c0_98, %c0_99, %c0_100] : memref<2x10x10x8xf32, #tpu.memory_space<vmem>>, vector<2x8x8x8xf32>
    %108 = vector.shape_cast %107 : vector<2x8x8x8xf32> to vector<128x8xf32>
    %109 = arith.truncf %108 : vector<128x8xf32> to vector<128x8xbf16>
    %c0_101 = arith.constant 0 : index
    %c0_102 = arith.constant 0 : index
    %c0_103 = arith.constant 0 : index
    %110 = vector.load %arg4[%c0_101, %c0_102, %c0_103] : memref<9x8x8xbf16, #tpu.memory_space<vmem>>, vector<1x8x8xbf16>
    %111 = vector.shape_cast %110 : vector<1x8x8xbf16> to vector<8x8xbf16>
    %cst_104 = arith.constant dense<0.000000e+00> : vector<128x8xf32>
    %112 = tpu.matmul %109, %111, %cst_104 {dimension_numbers = #tpu.dot_dimension_numbers<[1], [0], [0], [1], [0, 0, 1, 1], [], []>} : vector<128x8xbf16>, vector<8x8xbf16>, vector<128x8xf32> -> vector<128x8xf32>
    %113 = arith.addf %106, %112 : vector<128x8xf32>
    %c0_105 = arith.constant 0 : index
    %c0_106 = arith.constant 0 : index
    %c1_107 = arith.constant 1 : index
    %c0_108 = arith.constant 0 : index
    %114 = vector.load %arg9[%c0_105, %c0_106, %c1_107, %c0_108] : memref<2x10x10x8xf32, #tpu.memory_space<vmem>>, vector<2x8x8x8xf32>
    %115 = vector.shape_cast %114 : vector<2x8x8x8xf32> to vector<128x8xf32>
    %116 = arith.truncf %115 : vector<128x8xf32> to vector<128x8xbf16>
    %c1_109 = arith.constant 1 : index
    %c0_110 = arith.constant 0 : index
    %c0_111 = arith.constant 0 : index
    %117 = vector.load %arg4[%c1_109, %c0_110, %c0_111] : memref<9x8x8xbf16, #tpu.memory_space<vmem>>, vector<1x8x8xbf16>
    %118 = vector.shape_cast %117 : vector<1x8x8xbf16> to vector<8x8xbf16>
    %cst_112 = arith.constant dense<0.000000e+00> : vector<128x8xf32>
    %119 = tpu.matmul %116, %118, %cst_112 {dimension_numbers = #tpu.dot_dimension_numbers<[1], [0], [0], [1], [0, 0, 1, 1], [], []>} : vector<128x8xbf16>, vector<8x8xbf16>, vector<128x8xf32> -> vector<128x8xf32>
    %120 = arith.addf %113, %119 : vector<128x8xf32>
    %c0_113 = arith.constant 0 : index
    %c0_114 = arith.constant 0 : index
    %c2_115 = arith.constant 2 : index
    %c0_116 = arith.constant 0 : index
    %121 = vector.load %arg9[%c0_113, %c0_114, %c2_115, %c0_116] : memref<2x10x10x8xf32, #tpu.memory_space<vmem>>, vector<2x8x8x8xf32>
    %122 = vector.shape_cast %121 : vector<2x8x8x8xf32> to vector<128x8xf32>
    %123 = arith.truncf %122 : vector<128x8xf32> to vector<128x8xbf16>
    %c2_117 = arith.constant 2 : index
    %c0_118 = arith.constant 0 : index
    %c0_119 = arith.constant 0 : index
    %124 = vector.load %arg4[%c2_117, %c0_118, %c0_119] : memref<9x8x8xbf16, #tpu.memory_space<vmem>>, vector<1x8x8xbf16>
    %125 = vector.shape_cast %124 : vector<1x8x8xbf16> to vector<8x8xbf16>
    %cst_120 = arith.constant dense<0.000000e+00> : vector<128x8xf32>
    %126 = tpu.matmul %123, %125, %cst_120 {dimension_numbers = #tpu.dot_dimension_numbers<[1], [0], [0], [1], [0, 0, 1, 1], [], []>} : vector<128x8xbf16>, vector<8x8xbf16>, vector<128x8xf32> -> vector<128x8xf32>
    %127 = arith.addf %120, %126 : vector<128x8xf32>
    %c0_121 = arith.constant 0 : index
    %c1_122 = arith.constant 1 : index
    %c0_123 = arith.constant 0 : index
    %c0_124 = arith.constant 0 : index
    %128 = vector.load %arg9[%c0_121, %c1_122, %c0_123, %c0_124] : memref<2x10x10x8xf32, #tpu.memory_space<vmem>>, vector<2x8x8x8xf32>
    %129 = vector.shape_cast %128 : vector<2x8x8x8xf32> to vector<128x8xf32>
    %130 = arith.truncf %129 : vector<128x8xf32> to vector<128x8xbf16>
    %c3_125 = arith.constant 3 : index
    %c0_126 = arith.constant 0 : index
    %c0_127 = arith.constant 0 : index
    %131 = vector.load %arg4[%c3_125, %c0_126, %c0_127] : memref<9x8x8xbf16, #tpu.memory_space<vmem>>, vector<1x8x8xbf16>
    %132 = vector.shape_cast %131 : vector<1x8x8xbf16> to vector<8x8xbf16>
    %cst_128 = arith.constant dense<0.000000e+00> : vector<128x8xf32>
    %133 = tpu.matmul %130, %132, %cst_128 {dimension_numbers = #tpu.dot_dimension_numbers<[1], [0], [0], [1], [0, 0, 1, 1], [], []>} : vector<128x8xbf16>, vector<8x8xbf16>, vector<128x8xf32> -> vector<128x8xf32>
    %134 = arith.addf %127, %133 : vector<128x8xf32>
    %c0_129 = arith.constant 0 : index
    %c1_130 = arith.constant 1 : index
    %c1_131 = arith.constant 1 : index
    %c0_132 = arith.constant 0 : index
    %135 = vector.load %arg9[%c0_129, %c1_130, %c1_131, %c0_132] : memref<2x10x10x8xf32, #tpu.memory_space<vmem>>, vector<2x8x8x8xf32>
    %136 = vector.shape_cast %135 : vector<2x8x8x8xf32> to vector<128x8xf32>
    %137 = arith.truncf %136 : vector<128x8xf32> to vector<128x8xbf16>
    %c4_133 = arith.constant 4 : index
    %c0_134 = arith.constant 0 : index
    %c0_135 = arith.constant 0 : index
    %138 = vector.load %arg4[%c4_133, %c0_134, %c0_135] : memref<9x8x8xbf16, #tpu.memory_space<vmem>>, vector<1x8x8xbf16>
    %139 = vector.shape_cast %138 : vector<1x8x8xbf16> to vector<8x8xbf16>
    %cst_136 = arith.constant dense<0.000000e+00> : vector<128x8xf32>
    %140 = tpu.matmul %137, %139, %cst_136 {dimension_numbers = #tpu.dot_dimension_numbers<[1], [0], [0], [1], [0, 0, 1, 1], [], []>} : vector<128x8xbf16>, vector<8x8xbf16>, vector<128x8xf32> -> vector<128x8xf32>
    %141 = arith.addf %134, %140 : vector<128x8xf32>
    %c0_137 = arith.constant 0 : index
    %c1_138 = arith.constant 1 : index
    %c2_139 = arith.constant 2 : index
    %c0_140 = arith.constant 0 : index
    %142 = vector.load %arg9[%c0_137, %c1_138, %c2_139, %c0_140] : memref<2x10x10x8xf32, #tpu.memory_space<vmem>>, vector<2x8x8x8xf32>
    %143 = vector.shape_cast %142 : vector<2x8x8x8xf32> to vector<128x8xf32>
    %144 = arith.truncf %143 : vector<128x8xf32> to vector<128x8xbf16>
    %c5_141 = arith.constant 5 : index
    %c0_142 = arith.constant 0 : index
    %c0_143 = arith.constant 0 : index
    %145 = vector.load %arg4[%c5_141, %c0_142, %c0_143] : memref<9x8x8xbf16, #tpu.memory_space<vmem>>, vector<1x8x8xbf16>
    %146 = vector.shape_cast %145 : vector<1x8x8xbf16> to vector<8x8xbf16>
    %cst_144 = arith.constant dense<0.000000e+00> : vector<128x8xf32>
    %147 = tpu.matmul %144, %146, %cst_144 {dimension_numbers = #tpu.dot_dimension_numbers<[1], [0], [0], [1], [0, 0, 1, 1], [], []>} : vector<128x8xbf16>, vector<8x8xbf16>, vector<128x8xf32> -> vector<128x8xf32>
    %148 = arith.addf %141, %147 : vector<128x8xf32>
    %c0_145 = arith.constant 0 : index
    %c2_146 = arith.constant 2 : index
    %c0_147 = arith.constant 0 : index
    %c0_148 = arith.constant 0 : index
    %149 = vector.load %arg9[%c0_145, %c2_146, %c0_147, %c0_148] : memref<2x10x10x8xf32, #tpu.memory_space<vmem>>, vector<2x8x8x8xf32>
    %150 = vector.shape_cast %149 : vector<2x8x8x8xf32> to vector<128x8xf32>
    %151 = arith.truncf %150 : vector<128x8xf32> to vector<128x8xbf16>
    %c6_149 = arith.constant 6 : index
    %c0_150 = arith.constant 0 : index
    %c0_151 = arith.constant 0 : index
    %152 = vector.load %arg4[%c6_149, %c0_150, %c0_151] : memref<9x8x8xbf16, #tpu.memory_space<vmem>>, vector<1x8x8xbf16>
    %153 = vector.shape_cast %152 : vector<1x8x8xbf16> to vector<8x8xbf16>
    %cst_152 = arith.constant dense<0.000000e+00> : vector<128x8xf32>
    %154 = tpu.matmul %151, %153, %cst_152 {dimension_numbers = #tpu.dot_dimension_numbers<[1], [0], [0], [1], [0, 0, 1, 1], [], []>} : vector<128x8xbf16>, vector<8x8xbf16>, vector<128x8xf32> -> vector<128x8xf32>
    %155 = arith.addf %148, %154 : vector<128x8xf32>
    %c0_153 = arith.constant 0 : index
    %c2_154 = arith.constant 2 : index
    %c1_155 = arith.constant 1 : index
    %c0_156 = arith.constant 0 : index
    %156 = vector.load %arg9[%c0_153, %c2_154, %c1_155, %c0_156] : memref<2x10x10x8xf32, #tpu.memory_space<vmem>>, vector<2x8x8x8xf32>
    %157 = vector.shape_cast %156 : vector<2x8x8x8xf32> to vector<128x8xf32>
    %158 = arith.truncf %157 : vector<128x8xf32> to vector<128x8xbf16>
    %c7_157 = arith.constant 7 : index
    %c0_158 = arith.constant 0 : index
    %c0_159 = arith.constant 0 : index
    %159 = vector.load %arg4[%c7_157, %c0_158, %c0_159] : memref<9x8x8xbf16, #tpu.memory_space<vmem>>, vector<1x8x8xbf16>
    %160 = vector.shape_cast %159 : vector<1x8x8xbf16> to vector<8x8xbf16>
    %cst_160 = arith.constant dense<0.000000e+00> : vector<128x8xf32>
    %161 = tpu.matmul %158, %160, %cst_160 {dimension_numbers = #tpu.dot_dimension_numbers<[1], [0], [0], [1], [0, 0, 1, 1], [], []>} : vector<128x8xbf16>, vector<8x8xbf16>, vector<128x8xf32> -> vector<128x8xf32>
    %162 = arith.addf %155, %161 : vector<128x8xf32>
    %c0_161 = arith.constant 0 : index
    %c2_162 = arith.constant 2 : index
    %c2_163 = arith.constant 2 : index
    %c0_164 = arith.constant 0 : index
    %163 = vector.load %arg9[%c0_161, %c2_162, %c2_163, %c0_164] : memref<2x10x10x8xf32, #tpu.memory_space<vmem>>, vector<2x8x8x8xf32>
    %164 = vector.shape_cast %163 : vector<2x8x8x8xf32> to vector<128x8xf32>
    %165 = arith.truncf %164 : vector<128x8xf32> to vector<128x8xbf16>
    %c8_165 = arith.constant 8 : index
    %c0_166 = arith.constant 0 : index
    %c0_167 = arith.constant 0 : index
    %166 = vector.load %arg4[%c8_165, %c0_166, %c0_167] : memref<9x8x8xbf16, #tpu.memory_space<vmem>>, vector<1x8x8xbf16>
    %167 = vector.shape_cast %166 : vector<1x8x8xbf16> to vector<8x8xbf16>
    %cst_168 = arith.constant dense<0.000000e+00> : vector<128x8xf32>
    %168 = tpu.matmul %165, %167, %cst_168 {dimension_numbers = #tpu.dot_dimension_numbers<[1], [0], [0], [1], [0, 0, 1, 1], [], []>} : vector<128x8xbf16>, vector<8x8xbf16>, vector<128x8xf32> -> vector<128x8xf32>
    %169 = arith.addf %162, %168 : vector<128x8xf32>
    %cst_169 = arith.constant dense<0.000000e+00> : vector<8xf32>
    %170 = vector.multi_reduction <add>, %169, %cst_169 [0] : vector<128x8xf32> to vector<8xf32>
    %171 = vector.shape_cast %170 : vector<8xf32> to vector<1x8xf32>
    %172 = arith.mulf %169, %169 : vector<128x8xf32>
    %cst_170 = arith.constant dense<0.000000e+00> : vector<8xf32>
    %173 = vector.multi_reduction <add>, %172, %cst_170 [0] : vector<128x8xf32> to vector<8xf32>
    %174 = vector.shape_cast %173 : vector<8xf32> to vector<1x8xf32>
    %cst_171 = arith.constant 7.812500e-03 : f32
    %175 = vector.broadcast %cst_171 : f32 to vector<1x8xf32>
    %176 = arith.mulf %171, %175 : vector<1x8xf32>
    %cst_172 = arith.constant 7.812500e-03 : f32
    %177 = vector.broadcast %cst_172 : f32 to vector<1x8xf32>
    %178 = arith.mulf %174, %177 : vector<1x8xf32>
    %179 = arith.mulf %176, %176 : vector<1x8xf32>
    %180 = arith.subf %178, %179 : vector<1x8xf32>
    %c0_173 = arith.constant 0 : index
    %c0_174 = arith.constant 0 : index
    %181 = vector.load %arg5[%c0_173, %c0_174] : memref<1x8xf32, #tpu.memory_space<vmem>>, vector<1x8xf32>
    %cst_175 = arith.constant 9.99999974E-6 : f32
    %182 = vector.broadcast %cst_175 : f32 to vector<1x8xf32>
    %183 = arith.addf %180, %182 : vector<1x8xf32>
    %184 = math.rsqrt %183 : vector<1x8xf32>
    %185 = arith.mulf %181, %184 : vector<1x8xf32>
    %c0_176 = arith.constant 0 : index
    %c0_177 = arith.constant 0 : index
    %186 = vector.load %arg6[%c0_176, %c0_177] : memref<1x8xf32, #tpu.memory_space<vmem>>, vector<1x8xf32>
    %187 = arith.mulf %176, %185 : vector<1x8xf32>
    %188 = arith.subf %186, %187 : vector<1x8xf32>
    %189 = vector.broadcast %185 : vector<1x8xf32> to vector<128x8xf32>
    %190 = arith.mulf %169, %189 : vector<128x8xf32>
    %191 = vector.broadcast %188 : vector<1x8xf32> to vector<128x8xf32>
    %192 = arith.addf %190, %191 : vector<128x8xf32>
    %cst_178 = arith.constant 0.000000e+00 : f32
    %193 = vector.broadcast %cst_178 : f32 to vector<128x8xf32>
    %194 = arith.maximumf %192, %193 : vector<128x8xf32>
    %cst_179 = arith.constant 0.000000e+00 : f32
    %195 = vector.broadcast %cst_179 : f32 to vector<128x120xf32>
    %196 = tpu.concatenate %194, %195 in 1 : vector<128x8xf32>, vector<128x120xf32> -> vector<128x128xf32>
    %197 = tpu.transpose %196, [1, 0] : vector<128x128xf32> -> vector<128x128xf32>
    %198 = vector.extract_strided_slice %197 {offsets = [0, 0], sizes = [8, 128], strides = [1, 1]} : vector<128x128xf32> to vector<8x128xf32>
    %c0_180 = arith.constant 0 : index
    %c0_181 = arith.constant 0 : index
    %199 = vector.load %arg7[%c0_180, %c0_181] : memref<8x128xf32, #tpu.memory_space<vmem>>, vector<8x128xf32>
    tpu.vector_store %arg7[%c0_180, %c0_181], %198 {strides = array<i32>} : memref<8x128xf32, #tpu.memory_space<vmem>>, vector<8x128xf32>,
    return
  }
}

</mosaic_0001>

<bundles_post_ra>
// kernel: down_forward.1
= control target key start
LH: loop header
LB: loop body
LE: loop exit
PB: predicated region body
PF: predicated region fallthrough
CT: control target
= control target key end

     0   :  { %s3089_s23 = smov 124   ;;  %vm251_vm0 = vcmask 31744   ;;  %vm253_vm1 = vcmask 25600   ;;  %vm385_vm2 = vcmask 1041408   ;;  %vm1341_vm3 = vcmask 64512   ;;  %s4646_s0 = inlined_call_operand.vmem [shape: bf16[2,8,2,8,8], index: 0, kind: input, shape index: {}]   ;;  %s4647_s1 = inlined_call_operand.vmem [shape: bf16[9,4,8], index: 1, kind: input, shape index: {}]   ;;  %s4648_s4 = inlined_call_operand.vmem [shape: bf16[9,8,8], index: 4, kind: input, shape index: {}]   ;;  %s4649_s2 = inlined_call_operand.vmem [shape: f32[1,8], index: 2, kind: input, shape index: {}]   ;;  %s4650_s3 = inlined_call_operand.vmem [shape: f32[1,8], index: 3, kind: input, shape index: {}]   ;;  %s4651_s5 = inlined_call_operand.vmem [shape: f32[1,8], index: 5, kind: input, shape index: {}]   ;;  %s4652_s6 = inlined_call_operand.vmem [shape: f32[1,8], index: 6, kind: input, shape index: {}]   ;;  %s4653_s7 = inlined_call_operand.vmem [shape: f32[8,128], index: 7, kind: output, shape index: {}]  }
   0x1   :  { %v3043_v0 = vld [vmem:[%s4646_s0 + $0x40] sm:$0xff]   ;;  %v3044_v1 = vld [vmem:[%s4646_s0 + $0x48] sm:$0xff]   ;;  %v3045_v2 = vld [vmem:[%s4646_s0 + $0x50] sm:$0xff]   ;;  %vm1639_vm4 = vcmask 1043456   ;;  %vm1507_vm5 = vcmask 58368  }
   0x2   :  { %v3006_v3 = vunpack.c.l.bf16 %v3043_v0  ;;  %v3007_v4 = vunpack.c.h.bf16 %v3043_v0  ;;  %v3010_v5 = vunpack.c.l.bf16 %v3044_v1  ;;  %v3011_v6 = vunpack.c.h.bf16 %v3044_v1  ;;  %v2973_v7 = vld [vmem:[%s4646_s0] sm:$0xff]   ;;  %v3036_v8 = vld [vmem:[%s4646_s0 + $0x8] sm:$0xff]   ;;  %v3037_v9 = vld [vmem:[%s4646_s0 + $0x10] sm:$0xff]  }
   0x3   :  { %v3014_v10 = vunpack.c.l.bf16 %v3045_v2  ;;  %v3015_v11 = vunpack.c.h.bf16 %v3045_v2  ;;  %v2974_v12 = vunpack.c.l.bf16 %v2973_v7  ;;  %v2975_v13 = vunpack.c.h.bf16 %v2973_v7  ;;  %v3048_v14 = vld [vmem:[%s4646_s0 + $0x68] sm:$0xff]   ;;  %v3049_v23 = vld [vmem:[%s4646_s0 + $0x70] sm:$0xff]   ;;  %v3046_v30 = vld [vmem:[%s4646_s0 + $0x58] sm:$0xff]  }
   0x4   :  { %v99_v15 = vmax.f32 %v3006_v3, %v3007_v4  ;;  %v3152_v16 = vmax.f32 %v3010_v5, %v3011_v6  ;;  %v2978_v17 = vunpack.c.l.bf16 %v3036_v8  ;;  %v2979_v18 = vunpack.c.h.bf16 %v3036_v8  ;;  %v3047_v33 = vld [vmem:[%s4646_s0 + $0x60] sm:$0xff]   ;;  %v3040_v35 = vld [vmem:[%s4646_s0 + $0x28] sm:$0xff]   ;;  %v3041_v40 = vld [vmem:[%s4646_s0 + $0x30] sm:$0xff]  }
   0x5   :  { %v3154_v19 = vmax.f32 %v3014_v10, %v3015_v11  ;;  %v91_v20 = vmax.f32 %v2974_v12, %v2975_v13  ;;  %v2982_v21 = vunpack.c.l.bf16 %v3037_v9  ;;  %v2983_v22 = vunpack.c.h.bf16 %v3037_v9  ;;  %v3038_v47 = vld [vmem:[%s4646_s0 + $0x18] sm:$0xff]   ;;  %v3039_v50 = vld [vmem:[%s4646_s0 + $0x20] sm:$0xff]  }
   0x6   :  { %v115_v24 = vpack.c.bf16 %v99_v15, %v99_v15  ;;  %v3159_v25 = vmax.f32 %v2978_v17, %v2979_v18  ;;  %v3026_v26 = vunpack.c.l.bf16 %v3048_v14  ;;  %v3027_v29 = vunpack.c.h.bf16 %v3048_v14  ;;  %v3050_v56 = vld [vmem:[%s4646_s0 + $0x78] sm:$0xff]   ;;  %v2812_v15 = vld [vmem:[%s4647_s1 + $0x2] sm:$0x3]  ;;  %v334_v17 = vld [vmem:[%s4647_s1] sm:$0x3] }
   0x7   :  { %v107_v27 = vpack.c.bf16 %v91_v20, %v91_v20  ;;  %v3161_v28 = vmax.f32 %v2982_v21, %v2983_v22  ;;  %v3030_v32 = vunpack.c.l.bf16 %v3049_v23  ;;  %v3031_v34 = vunpack.c.h.bf16 %v3049_v23  ;;  %v3042_v62 = vld [vmem:[%s4646_s0 + $0x38] sm:$0xff]  }
   0x8   :  { %v3166_v31 = vunpack.c.l.bf16 %v115_v24  ;;  %v3178_v37 = vmax.f32 %v3026_v26, %v3027_v29  ;;  %v3018_v38 = vunpack.c.l.bf16 %v3046_v30  ;;  %v3019_v39 = vunpack.c.h.bf16 %v3046_v30  ;;  %v2829_v24 = vld [vmem:[%s4647_s1 + $0x4] sm:$0x3]  ;;  %v2838_v26 = vld [vmem:[%s4647_s1 + $0x6] sm:$0x3] }
   0x9   :  { %v3176_v36 = vunpack.c.l.bf16 %v107_v27  ;;  %v3055_v41 = vpack.i.bf16 %v3154_v19, %v3152_v16  ;;  %v3185_v42 = vmax.f32 %v3030_v32, %v3031_v34  ;;  %v3022_v43 = vunpack.c.l.bf16 %v3047_v33 }
   0xa   :  { %171 = vrot.lane.b32.xlu0 %v3166_v31, %s3089_s23  ;;  %v3023_v44 = vunpack.c.h.bf16 %v3047_v33  ;;  %v3187_v45 = vmax.f32 %v3018_v38, %v3019_v39  ;;  %v2994_v46 = vunpack.c.l.bf16 %v3040_v35  ;;  %v2995_v48 = vunpack.c.h.bf16 %v3040_v35  ;;  %v2847_v35 = vld [vmem:[%s4647_s1 + $0x8] sm:$0x3] }
   0xb   :  { %3056 = vrot.lane.b32.xlu1 %v3055_v41, %s3089_s23  ;;  %v2998_v49 = vunpack.c.l.bf16 %v3041_v40  ;;  %v2999_v52 = vunpack.c.h.bf16 %v3041_v40  ;;  %v2986_v54 = vunpack.c.l.bf16 %v3038_v47  ;;  %v2987_v55 = vunpack.c.h.bf16 %v3038_v47 }
   0xc   :  { %v3196_v51 = vmax.f32 %v3022_v43, %v3023_v44  ;;  %v3198_v53 = vmax.f32 %v2994_v46, %v2995_v48  ;;  %v2990_v58 = vunpack.c.l.bf16 %v3039_v50  ;;  %v3060_v59 = vpack.i.bf16 %v3161_v28, %v3159_v25 }
   0xd   :  { %v3203_v57 = vmax.f32 %v2998_v49, %v2999_v52  ;;  %v2991_v60 = vunpack.c.h.bf16 %v3039_v50  ;;  %v3207_v61 = vmax.f32 %v2986_v54, %v2987_v55  ;;  %v3034_v63 = vunpack.c.l.bf16 %v3050_v56 }
   0xe   :  { %v3035_v0 = vunpack.c.h.bf16 %v3050_v56  ;;  %v3075_v2 = vpack.i.bf16 %v3185_v42, %v3178_v37  ;;  %v3065_v3 = vpack.i.bf16 %v3196_v51, %v3187_v45  ;;  %v3002_v4 = vunpack.c.l.bf16 %v3042_v62 }
   0xf   :  { %v3214_v1 = vmax.f32 %v2990_v58, %v2991_v60  ;;  %v3003_v6 = vunpack.c.h.bf16 %v3042_v62  ;;  %v4654_v7 = vmov 0.0   ;;  %v3080_v8 = vpack.i.bf16 %v3203_v57, %v3198_v53 }
  0x10   :  { %3066 = vrot.lane.b32.xlu2 %v3065_v3, %s3089_s23  ;;  %v106_v5 = vmax.f32 %v3034_v63, %v3035_v0  ;;  %275 = vst.msk [vmem:[#allocation2 + $0xb0] sm:$0xff] %vm251_vm0, %v4654_v7  ;;  %v387_v18 = vsel %vm385_vm2, %v2812_v15, 0  ;;  %v463_v20 = vsel %vm385_vm2, %v334_v17, 0  ;;  %v565_v27 = vsel %vm385_vm2, %v2829_v24, 0 }
  0x11   :  { %276 = vst.msk [vmem:[#allocation2 + $0xb8] sm:$0x3] %vm253_vm1, %v4654_v7  ;;  %v3070_v9 = vpack.i.bf16 %v3214_v1, %v3207_v61  ;;  %v98_v11 = vmax.f32 %v3002_v4, %v3003_v6  ;;  %3051 = vmatpush.bf16.msra.mxu2 %v387_v18  ;;  %3052 = vmatpush.bf16.msra.mxu3 %v463_v20  ;;  %v683_v29 = vsel %vm385_vm2, %v2838_v26, 0  ;;  %v801_v38 = vsel %vm385_vm2, %v2847_v35, 0 }
  0x12   :  { %155 = vrot.lane.b32.xlu0 %v3176_v36, %s3089_s23  ;;  %252 = vst.msk [vmem:[#allocation2] sm:$0xff] %vm251_vm0, %v4654_v7  ;;  %v122_v10 = vpack.c.bf16 %v106_v5, %v106_v5  ;;  %396 = vmatpush.bf16.msra.mxu0 %v387_v18 }
  0x13   :  { %3061 = vrot.lane.b32.xlu1 %v3060_v59, %s3089_s23  ;;  %254 = vst.msk [vmem:[#allocation2 + $0x8] sm:$0x3] %vm253_vm1, %v4654_v7  ;;  %v114_v13 = vpack.c.bf16 %v98_v11, %v98_v11  ;;  %472 = vmatpush.bf16.msra.mxu1 %v463_v20 }
  0x14   :  { %255 = vst.msk [vmem:[#allocation2 + $0x10] sm:$0xff] %vm251_vm0, %v4654_v7  ;;  %v3245_v12 = vunpack.c.l.bf16 %v122_v10 }
  0x15   :  { %256 = vst.msk [vmem:[#allocation2 + $0x18] sm:$0x3] %vm253_vm1, %v4654_v7  ;;  %v3257_v14 = vunpack.c.l.bf16 %v114_v13  ;;  %574 = vmatpush.bf16.msrb.mxu2 %v565_v27  ;;  %692 = vmatpush.bf16.msrb.mxu3 %v683_v29 }
  0x16   :  { %257 = vst.msk [vmem:[#allocation2 + $0x20] sm:$0xff] %vm251_vm0, %v4654_v7  ;;  %810 = vmatpush.bf16.msrb.mxu0 %v801_v38 }
  0x17   :  { %258 = vst.msk [vmem:[#allocation2 + $0x28] sm:$0x3] %vm253_vm1, %v4654_v7 }
  0x18   :  { %3071 = vrot.lane.b32.xlu2 %v3070_v9, %s3089_s23  ;;  %259 = vst.msk [vmem:[#allocation2 + $0x30] sm:$0xff] %vm251_vm0, %v4654_v7 }
  0x19   :  { %260 = vst.msk [vmem:[#allocation2 + $0x38] sm:$0x3] %vm253_vm1, %v4654_v7 }
  0x1a   :  { %3076 = vrot.lane.b32.xlu0 %v3075_v2, %s3089_s23  ;;  %261 = vst.msk [vmem:[#allocation2 + $0x40] sm:$0xff] %vm251_vm0, %v4654_v7  ;;  %v335_v26 = vld [vmem:[#allocation2 + $0x1] sm:$0xff] }
  0x1b   :  { %3081 = vrot.lane.b32.xlu1 %v3080_v8, %s3089_s23  ;;  %262 = vst.msk [vmem:[#allocation2 + $0x48] sm:$0x3] %vm253_vm1, %v4654_v7 }
  0x1c   :  { %263 = vst.msk [vmem:[#allocation2 + $0x50] sm:$0xff] %vm251_vm0, %v4654_v7 }
  0x1d   :  { %264 = vst.msk [vmem:[#allocation2 + $0x58] sm:$0x3] %vm253_vm1, %v4654_v7 }
  0x1e   :  { %265 = vst.msk [vmem:[#allocation2 + $0x60] sm:$0xff] %vm251_vm0, %v4654_v7 }
  0x1f   :  { %266 = vst.msk [vmem:[#allocation2 + $0x68] sm:$0x3] %vm253_vm1, %v4654_v7 }
  0x20   :  { %169 = vrot.lane.b32.xlu2 %v3257_v14, %s3089_s23  ;;  %267 = vst.msk [vmem:[#allocation2 + $0x70] sm:$0xff] %vm251_vm0, %v4654_v7 }
  0x21   :  { %268 = vst.msk [vmem:[#allocation2 + $0x78] sm:$0x3] %vm253_vm1, %v4654_v7 }
  0x22   :  { %185 = vrot.lane.b32.xlu0 %v3245_v12, %s3089_s23  ;;  %269 = vst.msk [vmem:[#allocation2 + $0x80] sm:$0xff] %vm251_vm0, %v4654_v7 }
  0x23   :  { %270 = vst.msk [vmem:[#allocation2 + $0x88] sm:$0x3] %vm253_vm1, %v4654_v7 }
  0x24   :  { %271 = vst.msk [vmem:[#allocation2 + $0x90] sm:$0xff] %vm251_vm0, %v4654_v7 }
  0x25   :  { %272 = vst.msk [vmem:[#allocation2 + $0x98] sm:$0x3] %vm253_vm1, %v4654_v7 }
  0x26   :  { %273 = vst.msk [vmem:[#allocation2 + $0xa0] sm:$0xff] %vm251_vm0, %v4654_v7 }
  0x27   :  { %274 = vst.msk [vmem:[#allocation2 + $0xa8] sm:$0x3] %vm253_vm1, %v4654_v7 }
  0x28   :  { %277 = vst.msk [vmem:[#allocation2 + $0xc0] sm:$0xff] %vm251_vm0, %v4654_v7 }
  0x29   :  { %278 = vst.msk [vmem:[#allocation2 + $0xc8] sm:$0x3] %vm253_vm1, %v4654_v7 }
  0x2a   :  { %279 = vst.msk [vmem:[#allocation2 + $0xd0] sm:$0xff] %vm251_vm0, %v4654_v7 }
  0x2b   :  { %280 = vst.msk [vmem:[#allocation2 + $0xd8] sm:$0x3] %vm253_vm1, %v4654_v7 }
  0x2c   :  { %281 = vst.msk [vmem:[#allocation2 + $0xe0] sm:$0xff] %vm251_vm0, %v4654_v7 }
  0x2d   :  { %282 = vst.msk [vmem:[#allocation2 + $0xe8] sm:$0x3] %vm253_vm1, %v4654_v7  ;;  %v318_v8 = vld [vmem:[#allocation2 + $0xa0] sm:$0xff] }
  0x2e   :  { %283 = vst.msk [vmem:[#allocation2 + $0xf0] sm:$0xff] %vm251_vm0, %v4654_v7 }
  0x2f   :  { %284 = vst.msk [vmem:[#allocation2 + $0xf8] sm:$0x3] %vm253_vm1, %v4654_v7 }
  0x30   :  { %285 = vst.msk [vmem:[#allocation2 + $0x100] sm:$0xff] %vm251_vm0, %v4654_v7 }
  0x31   :  { %286 = vst.msk [vmem:[#allocation2 + $0x108] sm:$0x3] %vm253_vm1, %v4654_v7 }
  0x32   :  { %287 = vst.msk [vmem:[#allocation2 + $0x110] sm:$0xff] %vm251_vm0, %v4654_v7 }
  0x33   :  { %288 = vst.msk [vmem:[#allocation2 + $0x118] sm:$0x3] %vm253_vm1, %v4654_v7 }
  0x34   :  { %289 = vst.msk [vmem:[#allocation2 + $0x120] sm:$0xff] %vm251_vm0, %v4654_v7 }
  0x35   :  { %290 = vst.msk [vmem:[#allocation2 + $0x128] sm:$0x3] %vm253_vm1, %v4654_v7 }
  0x36   :  { %291 = vst.msk [vmem:[#allocation2 + $0x130] sm:$0xff] %vm251_vm0, %v4654_v7 }
  0x37   :  { %292 = vst.msk [vmem:[#allocation2 + $0x138] sm:$0x3] %vm253_vm1, %v4654_v7 }
  0x38   :  { %1506 = vst.msk [vmem:[#allocation3] sm:$0xff] %vm1341_vm3, %v4654_v7 }
  0x39   :  { %1509 = vst.msk [vmem:[#allocation3 + $0x10] sm:$0xff] %vm1341_vm3, %v4654_v7 }
  0x3a   :  { %1511 = vst.msk [vmem:[#allocation3 + $0x20] sm:$0xff] %vm1341_vm3, %v4654_v7 }
  0x3b   :  { %1513 = vst.msk [vmem:[#allocation3 + $0x30] sm:$0xff] %vm1341_vm3, %v4654_v7 }
  0x3c   :  { %1515 = vst.msk [vmem:[#allocation3 + $0x40] sm:$0xff] %vm1341_vm3, %v4654_v7 }
  0x3d   :  { %1517 = vst.msk [vmem:[#allocation3 + $0x50] sm:$0xff] %vm1341_vm3, %v4654_v7 }
  0x3e   :  { %1519 = vst.msk [vmem:[#allocation3 + $0x60] sm:$0xff] %vm1341_vm3, %v4654_v7 }
  0x3f   :  { %1521 = vst.msk [vmem:[#allocation3 + $0x70] sm:$0xff] %vm1341_vm3, %v4654_v7 }
  0x40   :  { %1523 = vst.msk [vmem:[#allocation3 + $0x80] sm:$0xff] %vm1341_vm3, %v4654_v7 }
  0x41   :  { %1525 = vst.msk [vmem:[#allocation3 + $0x90] sm:$0xff] %vm1341_vm3, %v4654_v7 }
  0x42   :  { %1527 = vst.msk [vmem:[#allocation3 + $0xa0] sm:$0xff] %vm1341_vm3, %v4654_v7 }
  0x43   :  { %1529 = vst.msk [vmem:[#allocation3 + $0xb0] sm:$0xff] %vm1341_vm3, %v4654_v7 }
  0x44   :  { %1531 = vst.msk [vmem:[#allocation3 + $0xc0] sm:$0xff] %vm1341_vm3, %v4654_v7 }
  0x45   :  { %1533 = vst.msk [vmem:[#allocation3 + $0xd0] sm:$0xff] %vm1341_vm3, %v4654_v7 }
  0x46   :  { %1535 = vst.msk [vmem:[#allocation3 + $0xe0] sm:$0xff] %vm1341_vm3, %v4654_v7 }
  0x47   :  { %1537 = vst.msk [vmem:[#allocation3 + $0xf0] sm:$0xff] %vm1341_vm3, %v4654_v7 }
  0x48   :  { %1539 = vst.msk [vmem:[#allocation3 + $0x100] sm:$0xff] %vm1341_vm3, %v4654_v7 }
  0x49   :  { %1541 = vst.msk [vmem:[#allocation3 + $0x110] sm:$0xff] %vm1341_vm3, %v4654_v7 }
  0x4a   :  { %1543 = vst.msk [vmem:[#allocation3 + $0x120] sm:$0xff] %vm1341_vm3, %v4654_v7 }
  0x4b   :  { %1545 = vst.msk [vmem:[#allocation3 + $0x130] sm:$0xff] %vm1341_vm3, %v4654_v7 }
  0x6a   :  { %v3067_v21 = vpop.permute.xlu2 %3066 }
  0x6b   :  { %v3069_v22 = vunpack.i.h.bf16 %v3067_v21  ;;  %v3068_v23 = vunpack.i.l.bf16 %v3067_v21 }
  0x6d   :  { %v215_v30 = vmax.f32 %v3196_v51, %v3069_v22  ;;  %v214_v32 = vmax.f32 %v3187_v45, %v3068_v23 }
  0x6f   :  { %v231_v33 = vpack.c.bf16 %v215_v30, %v215_v30  ;;  %v230_v34 = vpack.c.bf16 %v214_v32, %v214_v32 }
  0x71   :  { %v247_v39 = vunpack.c.l.bf16 %v231_v33  ;;  %v246_v40 = vunpack.c.l.bf16 %v230_v34  ;;  %v310_v34 = vld [vmem:[#allocation2] sm:$0xff] }
  0x72   :  { %v3072_v41 = vpop.permute.xlu2 %3071 }
  0x73   :  { %306 = vst.msk [vmem:[#allocation2 + $0xf1] sm:$0xff] %vm251_vm0, %v247_v39  ;;  %v3074_v43 = vunpack.i.h.bf16 %v3072_v41  ;;  %v3073_v44 = vunpack.i.l.bf16 %v3072_v41 }
  0x74   :  { %305 = vst.msk [vmem:[#allocation2 + $0xe1] sm:$0xff] %vm251_vm0, %v246_v40 }
  0x75   :  { %v207_v45 = vmax.f32 %v3214_v1, %v3074_v43  ;;  %v206_v46 = vmax.f32 %v3207_v61, %v3073_v44 }
  0x77   :  { %v223_v49 = vpack.c.bf16 %v207_v45, %v207_v45  ;;  %v222_v50 = vpack.c.bf16 %v206_v46, %v206_v46 }
  0x79   :  { %v239_v54 = vunpack.c.l.bf16 %v223_v49  ;;  %v238_v55 = vunpack.c.l.bf16 %v222_v50 }
  0x7b   :  { %298 = vst.msk [vmem:[#allocation2 + $0x51] sm:$0xff] %vm251_vm0, %v239_v54  ;;  %v3365_v22 = vld [vmem:[#allocation2 + $0xe0] sm:$0xff] }
  0x7c   :  { %v172_v47 = vpop.permute.xlu0 %171  ;;  %297 = vst.msk [vmem:[#allocation2 + $0x41] sm:$0xff] %vm251_vm0, %v238_v55 }
  0x7d   :  { %v211_v48 = vmax.f32 %v3166_v31, %v172_v47  ;;  %v3057_v52 = vpop.permute.xlu1 %3056 }
  0x7e   :  { %v3059_v56 = vunpack.i.h.bf16 %v3057_v52  ;;  %v3058_v58 = vunpack.i.l.bf16 %v3057_v52 }
  0x7f   :  { %v227_v51 = vpack.c.bf16 %v211_v48, %v211_v48 }
  0x80   :  { %v213_v60 = vmax.f32 %v3154_v19, %v3059_v56  ;;  %v212_v62 = vmax.f32 %v3152_v16, %v3058_v58  ;;  %v343_v19 = vld [vmem:[#allocation2 + $0xa1] sm:$0xff] }
  0x81   :  { %v243_v59 = vunpack.c.l.bf16 %v227_v51 }
  0x82   :  { %v229_v31 = vpack.c.bf16 %v213_v60, %v213_v60  ;;  %v228_v61 = vpack.c.bf16 %v212_v62, %v212_v62 }
  0x83   :  { %302 = vst.msk [vmem:[#allocation2 + $0xb1] sm:$0xff] %vm251_vm0, %v243_v59 }
  0x84   :  { %v156_v63 = vpop.permute.xlu0 %155  ;;  %v245_v1 = vunpack.c.l.bf16 %v229_v31  ;;  %v244_v2 = vunpack.c.l.bf16 %v228_v61 }
  0x85   :  { %v203_v0 = vmax.f32 %v3176_v36, %v156_v63  ;;  %v3062_v4 = vpop.permute.xlu1 %3061 }
  0x86   :  { %304 = vst.msk [vmem:[#allocation2 + $0xd1] sm:$0xff] %vm251_vm0, %v245_v1  ;;  %v3064_v5 = vunpack.i.h.bf16 %v3062_v4  ;;  %v3063_v6 = vunpack.i.l.bf16 %v3062_v4 }
  0x87   :  { %v219_v3 = vpack.c.bf16 %v203_v0, %v203_v0  ;;  %303 = vst.msk [vmem:[#allocation2 + $0xc1] sm:$0xff] %vm251_vm0, %v244_v2  ;;  %v3412_v2 = vld [vmem:[#allocation2 + $0xf1] sm:$0xff] }
  0x88   :  { %v205_v9 = vmax.f32 %v3161_v28, %v3064_v5  ;;  %v204_v10 = vmax.f32 %v3159_v25, %v3063_v6  ;;  %v3363_v25 = vld [vmem:[#allocation2 + $0xe1] sm:$0xff] }
  0x89   :  { %v235_v16 = vunpack.c.l.bf16 %v219_v3 }
  0x8a   :  { %v3354_v11 = vld [vmem:[#allocation2 + $0xb1] sm:$0xff]  ;;  %v221_v17 = vpack.c.bf16 %v205_v9, %v205_v9  ;;  %v220_v18 = vpack.c.bf16 %v204_v10, %v204_v10 }
  0x8b   :  { %v3356_v36 = vld [vmem:[#allocation2 + $0xb0] sm:$0xff]  ;;  %294 = vst.msk [vmem:[#allocation2 + $0x11] sm:$0xff] %vm251_vm0, %v235_v16  ;;  %v355_v13 = vpack.c.bf16 %v3354_v11, %v343_v19 }
  0x8c   :  { %v330_v15 = vpack.c.bf16 %v3356_v36, %v318_v8  ;;  %v3077_v20 = vpop.permute.xlu0 %3076  ;;  %v237_v23 = vunpack.c.l.bf16 %v221_v17  ;;  %v236_v24 = vunpack.c.l.bf16 %v220_v18  ;;  %v2865_v18 = vld [vmem:[%s4647_s1 + $0xc] sm:$0x3] }
  0x8d   :  { %2817 = vmatmul.msk.bf16.vlgmr.msra.gmra.mxu2 %vm251_vm0, %v355_v13  ;;  %v3079_v28 = vunpack.i.h.bf16 %v3077_v20  ;;  %v3078_v21 = vunpack.i.l.bf16 %v3077_v20  ;;  %v3369_v30 = vld [vmem:[#allocation2 + $0xd1] sm:$0xff]  ;;  %v3082_v33 = vpop.permute.xlu1 %3081  ;;  %v2874_v20 = vld [vmem:[%s4647_s1 + $0xe] sm:$0x3] }
  0x8e   :  { %2825 = vmatmul.msk.bf16.vlgmr.msra.gmra.mxu3 %vm251_vm0, %v330_v15  ;;  %v3371_v32 = vld [vmem:[#allocation2 + $0xd0] sm:$0xff]  ;;  %296 = vst.msk [vmem:[#allocation2 + $0x31] sm:$0xff] %vm251_vm0, %v237_v23  ;;  %v3374_v35 = vld [vmem:[#allocation2 + $0xc1] sm:$0xff]  ;;  %v3084_v39 = vunpack.i.h.bf16 %v3082_v33  ;;  %v3083_v40 = vunpack.i.l.bf16 %v3082_v33  ;;  %v3445_v15 = vpack.c.bf16 %v3412_v2, %v3363_v25 }
  0x8f   :  { %v217_v27 = vmax.f32 %v3185_v42, %v3079_v28  ;;  %v216_v29 = vmax.f32 %v3178_v37, %v3078_v21  ;;  %v3376_v38 = vld [vmem:[#allocation2 + $0xc0] sm:$0xff]  ;;  %v653_v41 = vpack.c.bf16 %v3365_v22, %v3371_v32  ;;  %v771_v37 = vpack.c.bf16 %v3363_v25, %v3369_v30  ;;  %295 = vst.msk [vmem:[#allocation2 + $0x21] sm:$0xff] %vm251_vm0, %v236_v24  ;;  %v2856_v28 = vld [vmem:[%s4647_s1 + $0xa] sm:$0x3]  ;;  %v340_v21 = vld [vmem:[#allocation2 + $0x51] sm:$0xff] }
  0x90   :  { %v209_v46 = vmax.f32 %v3203_v57, %v3084_v39  ;;  %v208_v47 = vmax.f32 %v3198_v53, %v3083_v40  ;;  %v652_v48 = vpack.c.bf16 %v3376_v38, %v3356_v36  ;;  %v770_v49 = vpack.c.bf16 %v3374_v35, %v3354_v11  ;;  %v170_v57 = vpop.permute.xlu2 %169  ;;  %v315_v23 = vld [vmem:[#allocation2 + $0x50] sm:$0xff]  ;;  %v314_v33 = vld [vmem:[#allocation2 + $0x40] sm:$0xff] }
  0x91   :  { %v233_v42 = vpack.c.bf16 %v217_v27, %v217_v27  ;;  %v232_v43 = vpack.c.bf16 %v216_v29, %v216_v29  ;;  %v210_v62 = vmax.f32 %v3257_v14, %v170_v57  ;;  %v3404_v63 = vpack.c.bf16 %v3369_v30, %v3374_v35  ;;  %v3414_v14 = vld [vmem:[#allocation2 + $0xf0] sm:$0xff]  ;;  %v339_v29 = vld [vmem:[#allocation2 + $0x41] sm:$0xff] }
  0x92   :  { %v3383_v44 = vld [vmem:[#allocation2 + $0x11] sm:$0xff]  ;;  %v225_v55 = vpack.c.bf16 %v209_v46, %v209_v46  ;;  %v224_v56 = vpack.c.bf16 %v208_v47, %v208_v47  ;;  %v3408_v0 = vpack.c.bf16 %v3371_v32, %v3376_v38  ;;  %v3449_v17 = vpack.c.bf16 %v3414_v14, %v3365_v22 }
  0x93   :  { %v3385_v45 = vld [vmem:[#allocation2 + $0x10] sm:$0xff]  ;;  %v351_v50 = vpack.c.bf16 %v3383_v44, %v335_v26  ;;  %v249_v52 = vunpack.c.l.bf16 %v233_v42  ;;  %v248_v54 = vunpack.c.l.bf16 %v232_v43  ;;  %v226_v61 = vpack.c.bf16 %v210_v62, %v210_v62 }
  0x94   :  { %v326_v51 = vpack.c.bf16 %v3385_v45, %v310_v34  ;;  %v186_v58 = vpop.permute.xlu0 %185  ;;  %v241_v59 = vunpack.c.l.bf16 %v225_v55  ;;  %v240_v60 = vunpack.c.l.bf16 %v224_v56  ;;  %v1038_v24 = vsel %vm385_vm2, %v2865_v18, 0  ;;  %v2883_v40 = vld [vmem:[%s4647_s1 + $0x10] sm:$0x3]  ;;  %v515_v57 = vld [vmem:[#allocation2 + $0x12] sm:$0xff] }
  0x95   :  { %2813 = vmatmul.msk.bf16.vlgmr.msra.gmra.mxu0 %vm251_vm0, %v351_v50  ;;  %308 = vst.msk [vmem:[#allocation2 + $0x111] sm:$0xff] %vm251_vm0, %v249_v52  ;;  %v218_v53 = vmax.f32 %v3245_v12, %v186_v58  ;;  %v242_v1 = vunpack.c.l.bf16 %v226_v61  ;;  %v3425_v5 = vld [vmem:[#allocation2 + $0x31] sm:$0xff]  ;;  %v1156_v26 = vsel %vm385_vm2, %v2874_v20, 0  ;;  %v919_v27 = vsel %vm385_vm2, %v2856_v28, 0  ;;  %1047 = vmatpush.bf16.msra.mxu2 %v1038_v24 }
  0x96   :  { %2821 = vmatmul.msk.bf16.vlgmr.msra.gmra.mxu1 %vm251_vm0, %v326_v51  ;;  %307 = vst.msk [vmem:[#allocation2 + $0x101] sm:$0xff] %vm251_vm0, %v248_v54  ;;  %v3427_v6 = vld [vmem:[#allocation2 + $0x30] sm:$0xff]  ;;  %v337_v16 = vld [vmem:[#allocation2 + $0x21] sm:$0xff]  ;;  %1165 = vmatpush.bf16.msra.mxu3 %v1156_v26  ;;  %v3467_v34 = vpack.c.bf16 %v340_v21, %v339_v29  ;;  %v3469_v39 = vpack.c.bf16 %v315_v23, %v314_v33  ;;  %v1274_v46 = vsel %vm385_vm2, %v2883_v40, 0 }
  0x97   :  { %v234_v31 = vpack.c.bf16 %v218_v53, %v218_v53  ;;  %300 = vst.msk [vmem:[#allocation2 + $0x71] sm:$0xff] %vm251_vm0, %v241_v59  ;;  %v312_v9 = vld [vmem:[#allocation2 + $0x20] sm:$0xff]  ;;  %v3434_v10 = vpack.c.bf16 %v3425_v5, %v337_v16  ;;  %928 = vmatpush.bf16.msrb.mxu1 %v919_v27  ;;  %1283 = vmatpush.bf16.msra.mxu0 %v1274_v46 }
  0x98   :  { %299 = vst.msk [vmem:[#allocation2 + $0x61] sm:$0xff] %vm251_vm0, %v240_v60  ;;  %v3437_v13 = vpack.c.bf16 %v3427_v6, %v312_v9  ;;  %v514_v53 = vld [vmem:[#allocation2 + $0x2] sm:$0xff]  ;;  %v648_v60 = vpack.c.bf16 %v312_v9, %v3385_v45  ;;  %v649_v18 = vpack.c.bf16 %v314_v33, %v3427_v6  ;;  %v767_v9 = vpack.c.bf16 %v339_v29, %v3425_v5 }
  0x99   :  { %v250_v12 = vunpack.c.l.bf16 %v234_v31  ;;  %301 = vst.msk [vmem:[#allocation2 + $0x81] sm:$0xff] %vm251_vm0, %v242_v1  ;;  %v530_v59 = vpack.c.bf16 %v515_v57, %v514_v53  ;;  %v869_v62 = vld [vmem:[#allocation2 + $0x22] sm:$0xff]  ;;  %v766_v31 = vpack.c.bf16 %v337_v16, %v3383_v44  ;;  %v519_v44 = vld [vmem:[#allocation2 + $0x52] sm:$0xff] }
  0x9a   :  { %v884_v61 = vpack.c.bf16 %v869_v62, %v515_v57  ;;  %v871_v45 = vld [vmem:[#allocation2 + $0x42] sm:$0xff] }
  0x9b   :  { %309 = vst.msk [vmem:[#allocation2 + $0x121] sm:$0xff] %vm251_vm0, %v250_v12  ;;  %v517_v12 = vld [vmem:[#allocation2 + $0x32] sm:$0xff]  ;;  %v3518_v16 = vpack.c.bf16 %v519_v44, %v871_v45 }
  0x9c   :  { %v3478_v42 = vld [vmem:[#allocation2 + $0x111] sm:$0xff]  ;;  %v3509_v1 = vpack.c.bf16 %v517_v12, %v869_v62  ;;  %v885_v20 = vpack.c.bf16 %v871_v45, %v517_v12 }
  0x9d   :  { %2818 = vmatmul.msk.bf16.gmra.mxu2 %vm251_vm0, %v3404_v63  ;;  %v3421_v3 = vld [vmem:[#allocation2 + $0x101] sm:$0xff]  ;;  %v3480_v43 = vld [vmem:[#allocation2 + $0x110] sm:$0xff] }
  0x9e   :  { %2826 = vmatmul.msk.bf16.gmra.mxu3 %vm251_vm0, %v3408_v0  ;;  %v3423_v4 = vld [vmem:[#allocation2 + $0x100] sm:$0xff]  ;;  %v772_v8 = vpack.c.bf16 %v3421_v3, %v3412_v2  ;;  %v3485_v47 = vpack.c.bf16 %v3478_v42, %v3421_v3  ;;  %v342_v51 = vld [vmem:[#allocation2 + $0x71] sm:$0xff] }
  0x9f   :  { %v654_v19 = vpack.c.bf16 %v3423_v4, %v3414_v14  ;;  %v3489_v50 = vpack.c.bf16 %v3480_v43, %v3423_v4  ;;  %v317_v52 = vld [vmem:[#allocation2 + $0x70] sm:$0xff]  ;;  %v341_v54 = vld [vmem:[#allocation2 + $0x61] sm:$0xff] }
  0xa0   :  { %v316_v55 = vld [vmem:[#allocation2 + $0x60] sm:$0xff]  ;;  %v3495_v56 = vpack.c.bf16 %v342_v51, %v341_v54  ;;  %v768_v24 = vpack.c.bf16 %v341_v54, %v340_v21  ;;  %v521_v5 = vld [vmem:[#allocation2 + $0x72] sm:$0xff] }
  0xa1   :  { %v3497_v58 = vpack.c.bf16 %v317_v52, %v316_v55  ;;  %v650_v28 = vpack.c.bf16 %v316_v55, %v315_v23  ;;  %v873_v6 = vld [vmem:[#allocation2 + $0x62] sm:$0xff]  ;;  %v523_v55 = vld [vmem:[#allocation2 + $0xb2] sm:$0xff] }
  0xa2   :  { %v886_v26 = vpack.c.bf16 %v873_v6, %v519_v44  ;;  %v3525_v27 = vld [vmem:[#allocation2 + $0x80] sm:$0xff]  ;;  %v3527_v29 = vpack.c.bf16 %v521_v5, %v873_v6 }
  0xa3   :  { %v651_v33 = vpack.c.bf16 %v3525_v27, %v317_v52  ;;  %v3533_v23 = vld [vmem:[#allocation2 + $0x81] sm:$0xff] }
  0xa4   :  { %v3535_v21 = vld [vmem:[#allocation2 + $0x82] sm:$0xff]  ;;  %v769_v40 = vpack.c.bf16 %v3533_v23, %v342_v51 }
  0xa5   :  { %2814 = vmatmul.msk.bf16.gmra.mxu0 %vm251_vm0, %v3434_v10  ;;  %v887_v46 = vpack.c.bf16 %v3535_v21, %v521_v5  ;;  %v522_v54 = vld [vmem:[#allocation2 + $0xa2] sm:$0xff] }
  0xa6   :  { %2822 = vmatmul.msk.bf16.gmra.mxu1 %vm251_vm0, %v3437_v13  ;;  %v534_v52 = vpack.c.bf16 %v523_v55, %v522_v54 }
  0xad   :  { %2819 = vmatmul.msk.bf16.gmra.mxu2 %vm251_vm0, %v3445_v15 }
  0xae   :  { %2827 = vmatmul.msk.bf16.gmra.mxu3 %vm251_vm0, %v3449_v17 }
  0xb5   :  { %2815 = vmatmul.msk.bf16.gmra.mxu0 %vm251_vm0, %v3467_v34 }
  0xb6   :  { %2823 = vmatmul.msk.bf16.gmra.mxu1 %vm251_vm0, %v3469_v39 }
  0xbd   :  { %2820 = vmatmul.msk.bf16.gmra.mxu2 %vm251_vm0, %v3485_v47 }
  0xbe   :  { %2828 = vmatmul.msk.bf16.gmra.mxu3 %vm251_vm0, %v3489_v50 }
  0xc5   :  { %2816 = vmatmul.msk.bf16.gmra.mxu0 %vm251_vm0, %v3495_v56 }
  0xc6   :  { %2824 = vmatmul.msk.bf16.gmra.mxu1 %vm251_vm0, %v3497_v58 }
  0xcd   :  { %2830 = vmatmul.msk.bf16.vlgmr.msrb.gmra.mxu2 %vm251_vm0, %v530_v59  ;;  %v877_v59 = vld [vmem:[#allocation2 + $0xc2] sm:$0xff] }
  0xce   :  { %2839 = vmatmul.msk.bf16.vlgmr.msrb.gmra.mxu3 %vm251_vm0, %v648_v60 }
  0xd5   :  { %2848 = vmatmul.msk.bf16.vlgmr.msrb.gmra.mxu0 %vm251_vm0, %v766_v31 }
  0xd6   :  { %2857 = vmatmul.msk.bf16.vlgmr.msrb.gmra.mxu1 %vm251_vm0, %v884_v61  ;;  %v888_v61 = vpack.c.bf16 %v877_v59, %v523_v55 }
  0xdd   :  { %2831 = vmatmul.msk.bf16.gmra.mxu2 %vm251_vm0, %v3509_v1 }
  0xde   :  { %2840 = vmatmul.msk.bf16.gmra.mxu3 %vm251_vm0, %v649_v18 }
  0xe5   :  { %2849 = vmatmul.msk.bf16.gmra.mxu0 %vm251_vm0, %v767_v9 }
  0xe6   :  { %2858 = vmatmul.msk.bf16.gmra.mxu1 %vm251_vm0, %v885_v20 }
  0xed   :  { %2832 = vmatmul.msk.bf16.gmra.mxu2 %vm251_vm0, %v3518_v16 }
  0xee   :  { %2841 = vmatmul.msk.bf16.gmra.mxu3 %vm251_vm0, %v650_v28 }
  0xf5   :  { %2850 = vmatmul.msk.bf16.gmra.mxu0 %vm251_vm0, %v768_v24 }
  0xf6   :  { %2859 = vmatmul.msk.bf16.gmra.mxu1 %vm251_vm0, %v886_v26 }
  0xfd   :  { %2833 = vmatmul.msk.bf16.gmra.mxu2 %vm251_vm0, %v3527_v29 }
  0xfe   :  { %2842 = vmatmul.msk.bf16.gmra.mxu3 %vm251_vm0, %v651_v33 }
 0x105   :  { %2851 = vmatmul.msk.bf16.gmra.mxu0 %vm251_vm0, %v769_v40 }
 0x106   :  { %2860 = vmatmul.msk.bf16.gmra.mxu1 %vm251_vm0, %v887_v46 }
 0x10d   :  { %2834 = vmatmul.msk.bf16.gmra.mxu2 %vm251_vm0, %v534_v52 }
 0x10e   :  { %2843 = vmatmul.msk.bf16.gmra.mxu3 %vm251_vm0, %v652_v48  ;;  %v525_v48 = vld [vmem:[#allocation2 + $0xd2] sm:$0xff] }
 0x10f   :  { %v3561_v9 = vpack.c.bf16 %v525_v48, %v877_v59 }
 0x110   :  { %v418_v53 = vpop.f32.mrf.mxu2 }
 0x111   :  { %v494_v57 = vpop.f32.mrf.mxu3 }
 0x112   :  { %v3546_v51 = vadd.f32 %v494_v57, %v418_v53  ;;  %v398_v60 = vpop.f32.mrf.mxu0  ;;  %v3601_v57 = vld [vmem:[#allocation2 + $0x120] sm:$0xff] }
 0x113   :  { %v474_v62 = vpop.f32.mrf.mxu1  ;;  %v655_v2 = vpack.c.bf16 %v3601_v57, %v3480_v43 }
 0x114   :  { %v3548_v31 = vadd.f32 %v474_v62, %v398_v60 }
 0x115   :  { %2852 = vmatmul.msk.bf16.gmra.mxu0 %vm251_vm0, %v770_v49  ;;  %v879_v49 = vld [vmem:[#allocation2 + $0xe2] sm:$0xff] }
 0x116   :  { %2861 = vmatmul.msk.bf16.gmra.mxu1 %vm251_vm0, %v888_v61  ;;  %v889_v24 = vpack.c.bf16 %v879_v49, %v525_v48 }
 0x118   :  { %v420_v36 = vpop.f32.mrf.mxu2 }
 0x119   :  { %v496_v38 = vpop.f32.mrf.mxu3 }
 0x11a   :  { %v3555_v12 = vadd.f32 %v496_v38, %v420_v36  ;;  %v3557_v18 = vpop.f32.mrf.mxu0  ;;  %v3616_v36 = vld [vmem:[#allocation2 + $0x121] sm:$0xff] }
 0x11b   :  { %v3559_v45 = vpop.f32.mrf.mxu1  ;;  %v3618_v38 = vld [vmem:[#allocation2 + $0x122] sm:$0xff]  ;;  %v773_v43 = vpack.c.bf16 %v3616_v36, %v3478_v42 }
 0x11d   :  { %2835 = vmatmul.msk.bf16.gmra.mxu2 %vm251_vm0, %v3561_v9 }
 0x11e   :  { %2844 = vmatmul.msk.bf16.gmra.mxu3 %vm251_vm0, %v653_v41  ;;  %v527_v41 = vld [vmem:[#allocation2 + $0xf2] sm:$0xff] }
 0x11f   :  { %v3584_v40 = vpack.c.bf16 %v527_v41, %v879_v49 }
 0x120   :  { %v423_v11 = vpop.f32.mrf.mxu2 }
 0x121   :  { %v499_v35 = vpop.f32.mrf.mxu3 }
 0x122   :  { %v3569_v20 = vadd.f32 %v499_v35, %v423_v11  ;;  %v403_v44 = vpop.f32.mrf.mxu0 }
 0x123   :  { %v479_v28 = vpop.f32.mrf.mxu1 }
 0x124   :  { %v3571_v6 = vadd.f32 %v479_v28, %v403_v44 }
 0x125   :  { %2853 = vmatmul.msk.bf16.gmra.mxu0 %vm251_vm0, %v771_v37  ;;  %v881_v37 = vld [vmem:[#allocation2 + $0x102] sm:$0xff] }
 0x126   :  { %2862 = vmatmul.msk.bf16.gmra.mxu1 %vm251_vm0, %v889_v24  ;;  %v890_v53 = vpack.c.bf16 %v881_v37, %v527_v41 }
 0x128   :  { %v425_v22 = vpop.f32.mrf.mxu2 }
 0x129   :  { %v501_v32 = vpop.f32.mrf.mxu3 }
 0x12a   :  { %v3578_v26 = vadd.f32 %v501_v32, %v425_v22  ;;  %v3580_v5 = vpop.f32.mrf.mxu0 }
 0x12b   :  { %v3582_v33 = vpop.f32.mrf.mxu1 }
 0x12d   :  { %2836 = vmatmul.msk.bf16.gmra.mxu2 %vm251_vm0, %v3584_v40 }
 0x12e   :  { %2845 = vmatmul.msk.bf16.gmra.mxu3 %vm251_vm0, %v654_v19  ;;  %v529_v19 = vld [vmem:[#allocation2 + $0x112] sm:$0xff] }
 0x12f   :  { %v3609_v61 = vpack.c.bf16 %v529_v19, %v881_v37  ;;  %v891_v44 = vpack.c.bf16 %v3618_v38, %v529_v19 }
 0x130   :  { %v428_v25 = vpop.f32.mrf.mxu2 }
 0x131   :  { %v504_v30 = vpop.f32.mrf.mxu3 }
 0x132   :  { %v3592_v46 = vadd.f32 %v504_v30, %v428_v25  ;;  %v408_v54 = vpop.f32.mrf.mxu0 }
 0x133   :  { %v484_v55 = vpop.f32.mrf.mxu1 }
 0x134   :  { %v3594_v52 = vadd.f32 %v484_v55, %v408_v54 }
 0x135   :  { %2854 = vmatmul.msk.bf16.gmra.mxu0 %vm251_vm0, %v772_v8 }
 0x136   :  { %2863 = vmatmul.msk.bf16.gmra.mxu1 %vm251_vm0, %v890_v53 }
 0x138   :  { %v430_v14 = vpop.f32.mrf.mxu2 }
 0x139   :  { %v506_v4 = vpop.f32.mrf.mxu3 }
 0x13a   :  { %v3603_v59 = vadd.f32 %v506_v4, %v430_v14  ;;  %v3605_v60 = vpop.f32.mrf.mxu0  ;;  %v477_v14 = vadd.f32 %v3559_v45, %v3557_v18 }
 0x13b   :  { %v3607_v62 = vpop.f32.mrf.mxu1 }
 0x13d   :  { %2837 = vmatmul.msk.bf16.gmra.mxu2 %vm251_vm0, %v3609_v61 }
 0x13e   :  { %2846 = vmatmul.msk.bf16.gmra.mxu3 %vm251_vm0, %v655_v2 }
 0x140   :  { %v433_v3 = vpop.f32.mrf.mxu2 }
 0x141   :  { %v509_v8 = vpop.f32.mrf.mxu3 }
 0x142   :  { %v3620_v48 = vadd.f32 %v509_v8, %v433_v3  ;;  %v413_v11 = vpop.f32.mrf.mxu0 }
 0x143   :  { %v489_v35 = vpop.f32.mrf.mxu1 }
 0x144   :  { %v3622_v49 = vadd.f32 %v489_v35, %v413_v11 }
 0x145   :  { %2855 = vmatmul.msk.bf16.gmra.mxu0 %vm251_vm0, %v773_v43 }
 0x146   :  { %2864 = vmatmul.msk.bf16.gmra.mxu1 %vm251_vm0, %v891_v44 }
 0x148   :  { %v435_v28 = vpop.f32.mrf.mxu2 }
 0x149   :  { %v511_v24 = vpop.f32.mrf.mxu3 }
 0x14a   :  { %v3629_v22 = vadd.f32 %v511_v24, %v435_v28  ;;  %v3631_v32 = vpop.f32.mrf.mxu0  ;;  %v482_v28 = vadd.f32 %v3582_v33, %v3580_v5 }
 0x14b   :  { %v3633_v41 = vpop.f32.mrf.mxu1 }
 0x14d   :  { %2866 = vmatmul.msk.bf16.vlgmr.msra.gmra.mxu2 %vm251_vm0, %v3437_v13 }
 0x14e   :  { %2875 = vmatmul.msk.bf16.vlgmr.msra.gmra.mxu3 %vm251_vm0, %v3434_v10 }
 0x150   :  { %v576_v42 = vpop.f32.mrf.mxu2 }
 0x151   :  { %v694_v25 = vpop.f32.mrf.mxu3  ;;  %v616_v30 = vadd.f32 %v576_v42, %v3548_v31 }
 0x152   :  { %v812_v37 = vpop.f32.mrf.mxu0 }
 0x153   :  { %v930_v54 = vpop.f32.mrf.mxu1  ;;  %v734_v55 = vadd.f32 %v694_v25, %v616_v30 }
 0x155   :  { %v852_v53 = vadd.f32 %v812_v37, %v734_v55  ;;  %2884 = vmatmul.msk.bf16.vlgmr.msra.gmra.mxu0 %vm251_vm0, %v3509_v1 }
 0x157   :  { %v3644_v4 = vadd.f32 %v930_v54, %v852_v53 }
 0x158   :  { %v578_v13 = vpop.f32.mrf.mxu2 }
 0x159   :  { %v696_v19 = vpop.f32.mrf.mxu3  ;;  %v617_v2 = vadd.f32 %v578_v13, %v477_v14  ;;  %v487_v13 = vadd.f32 %v3607_v62, %v3605_v60  ;;  %v1230_v62 = vld [vmem:[#allocation2 + $0x92] sm:$0xff] }
 0x15a   :  { %v814_v10 = vpop.f32.mrf.mxu0 }
 0x15b   :  { %v3646_v3 = vpop.f32.mrf.mxu1  ;;  %v735_v8 = vadd.f32 %v696_v19, %v617_v2 }
 0x15d   :  { %v3648_v31 = vadd.f32 %v814_v10, %v735_v8  ;;  %2867 = vmatmul.msk.bf16.gmra.mxu2 %vm251_vm0, %v3469_v39  ;;  %v994_v10 = vld [vmem:[#allocation2 + $0x90] sm:$0xff] }
 0x15e   :  { %2876 = vmatmul.msk.bf16.gmra.mxu3 %vm251_vm0, %v3467_v34 }
 0x160   :  { %v581_v1 = vpop.f32.mrf.mxu2 }
 0x161   :  { %v699_v11 = vpop.f32.mrf.mxu3  ;;  %v618_v18 = vadd.f32 %v581_v1, %v3571_v6 }
 0x162   :  { %v817_v45 = vpop.f32.mrf.mxu0 }
 0x163   :  { %v935_v35 = vpop.f32.mrf.mxu1  ;;  %v736_v43 = vadd.f32 %v699_v11, %v618_v18 }
 0x165   :  { %v854_v44 = vadd.f32 %v817_v45, %v736_v43  ;;  %2885 = vmatmul.msk.bf16.gmra.mxu0 %vm251_vm0, %v3518_v16 }
 0x167   :  { %v3659_v24 = vadd.f32 %v935_v35, %v854_v44 }
 0x168   :  { %v583_v39 = vpop.f32.mrf.mxu2 }
 0x169   :  { %v701_v42 = vpop.f32.mrf.mxu3  ;;  %v619_v25 = vadd.f32 %v583_v39, %v482_v28  ;;  %v1242_v28 = vpack.c.bf16 %v1230_v62, %v3535_v21 }
 0x16a   :  { %v819_v34 = vpop.f32.mrf.mxu0 }
 0x16b   :  { %v737_v30 = vadd.f32 %v701_v42, %v619_v25  ;;  %v3661_v37 = vpop.f32.mrf.mxu1 }
 0x16d   :  { %v3663_v6 = vadd.f32 %v819_v34, %v737_v30  ;;  %2868 = vmatmul.msk.bf16.gmra.mxu2 %vm251_vm0, %v3497_v58 }
 0x16e   :  { %2877 = vmatmul.msk.bf16.gmra.mxu3 %vm251_vm0, %v3495_v56  ;;  %v1112_v56 = vld [vmem:[#allocation2 + $0x91] sm:$0xff] }
 0x16f   :  { %v1124_v18 = vpack.c.bf16 %v1112_v56, %v3533_v23 }
 0x170   :  { %v586_v16 = vpop.f32.mrf.mxu2 }
 0x171   :  { %v704_v54 = vpop.f32.mrf.mxu3  ;;  %v620_v5 = vadd.f32 %v586_v16, %v3594_v52  ;;  %v1006_v52 = vpack.c.bf16 %v994_v10, %v3525_v27  ;;  %v492_v27 = vadd.f32 %v3633_v41, %v3631_v32 }
 0x172   :  { %v822_v33 = vpop.f32.mrf.mxu0 }
 0x173   :  { %v738_v55 = vadd.f32 %v704_v54, %v620_v5  ;;  %v940_v14 = vpop.f32.mrf.mxu1 }
 0x175   :  { %v856_v53 = vadd.f32 %v822_v33, %v738_v55  ;;  %2886 = vmatmul.msk.bf16.gmra.mxu0 %vm251_vm0, %v3527_v29 }
 0x177   :  { %v3674_v19 = vadd.f32 %v940_v14, %v856_v53 }
 0x178   :  { %v588_v58 = vpop.f32.mrf.mxu2 }
 0x179   :  { %v706_v2 = vpop.f32.mrf.mxu3  ;;  %v621_v8 = vadd.f32 %v588_v58, %v487_v13 }
 0x17a   :  { %v824_v1 = vpop.f32.mrf.mxu0 }
 0x17b   :  { %v739_v11 = vadd.f32 %v706_v2, %v621_v8 }
 0x17d   :  { %v3678_v45 = vadd.f32 %v824_v1, %v739_v11  ;;  %2869 = vmatmul.msk.bf16.gmra.mxu2 %vm251_vm0, %v1006_v52 }
 0x17e   :  { %2878 = vmatmul.msk.bf16.gmra.mxu3 %vm251_vm0, %v1124_v18  ;;  %v1238_v18 = vld [vmem:[#allocation2 + $0x132] sm:$0xff] }
 0x180   :  { %v591_v29 = vpop.f32.mrf.mxu2 }
 0x181   :  { %v709_v60 = vpop.f32.mrf.mxu3  ;;  %v622_v35 = vadd.f32 %v591_v29, %v3622_v49 }
 0x182   :  { %v827_v43 = vpop.f32.mrf.mxu0 }
 0x183   :  { %v740_v44 = vadd.f32 %v709_v60, %v622_v35  ;;  %v1246_v35 = vpack.c.bf16 %v1238_v18, %v3618_v38 }
 0x185   :  { %v3684_v39 = vadd.f32 %v827_v43, %v740_v44  ;;  %2887 = vmatmul.msk.bf16.gmra.mxu0 %vm251_vm0, %v1242_v28 }
 0x188   :  { %v593_v23 = vpop.f32.mrf.mxu2 }
 0x189   :  { %v711_v42 = vpop.f32.mrf.mxu3  ;;  %v623_v25 = vadd.f32 %v593_v23, %v492_v27 }
 0x18a   :  { %v829_v34 = vpop.f32.mrf.mxu0 }
 0x18b   :  { %v741_v30 = vadd.f32 %v711_v42, %v623_v25 }
 0x18d   :  { %v3689_v16 = vadd.f32 %v829_v34, %v741_v30  ;;  %2870 = vmatmul.msk.bf16.gmra.mxu2 %vm251_vm0, %v3408_v0 }
 0x18e   :  { %2879 = vmatmul.msk.bf16.gmra.mxu3 %vm251_vm0, %v3404_v63 }
 0x190   :  { %v596_v21 = vpop.f32.mrf.mxu2 }
 0x191   :  { %v714_v49 = vpop.f32.mrf.mxu3  ;;  %v624_v54 = vadd.f32 %v596_v21, %v3546_v51 }
 0x192   :  { %v832_v5 = vpop.f32.mrf.mxu0 }
 0x193   :  { %v742_v33 = vadd.f32 %v714_v49, %v624_v54  ;;  %v942_v54 = vpop.f32.mrf.mxu1 }
 0x195   :  { %v3696_v32 = vadd.f32 %v832_v5, %v742_v33  ;;  %2888 = vmatmul.msk.bf16.gmra.mxu0 %vm251_vm0, %v3561_v9 }
 0x198   :  { %v3700_v41 = vpop.f32.mrf.mxu2 }
 0x199   :  { %v3702_v55 = vpop.f32.mrf.mxu3 }
 0x19a   :  { %v3704_v53 = vpop.f32.mrf.mxu0 }
 0x19d   :  { %2871 = vmatmul.msk.bf16.gmra.mxu2 %vm251_vm0, %v3449_v17 }
 0x19e   :  { %2880 = vmatmul.msk.bf16.gmra.mxu3 %vm251_vm0, %v3445_v15 }
 0x1a0   :  { %v601_v63 = vpop.f32.mrf.mxu2 }
 0x1a1   :  { %v719_v0 = vpop.f32.mrf.mxu3  ;;  %v626_v51 = vadd.f32 %v601_v63, %v3569_v20 }
 0x1a2   :  { %v837_v14 = vpop.f32.mrf.mxu0 }
 0x1a3   :  { %v744_v13 = vadd.f32 %v719_v0, %v626_v51 }
 0x1a5   :  { %v3711_v58 = vadd.f32 %v837_v14, %v744_v13  ;;  %2889 = vmatmul.msk.bf16.gmra.mxu0 %vm251_vm0, %v3584_v40  ;;  %v1002_v40 = vld [vmem:[#allocation2 + $0x130] sm:$0xff] }
 0x1a6   :  { %v1010_v11 = vpack.c.bf16 %v1002_v40, %v3601_v57 }
 0x1a8   :  { %v3715_v9 = vpop.f32.mrf.mxu2 }
 0x1a9   :  { %v3717_v2 = vpop.f32.mrf.mxu3 }
 0x1aa   :  { %v3719_v10 = vpop.f32.mrf.mxu0 }
 0x1ad   :  { %2872 = vmatmul.msk.bf16.gmra.mxu2 %vm251_vm0, %v3489_v50 }
 0x1ae   :  { %2881 = vmatmul.msk.bf16.gmra.mxu3 %vm251_vm0, %v3485_v47 }
 0x1b0   :  { %v606_v15 = vpop.f32.mrf.mxu2 }
 0x1b1   :  { %v724_v17 = vpop.f32.mrf.mxu3  ;;  %v628_v20 = vadd.f32 %v606_v15, %v3592_v46  ;;  %v1120_v46 = vld [vmem:[#allocation2 + $0x131] sm:$0xff] }
 0x1b2   :  { %v842_v56 = vpop.f32.mrf.mxu0  ;;  %v1128_v52 = vpack.c.bf16 %v1120_v46, %v3616_v36  ;;  %v2892_v46 = vld [vmem:[%s4648_s4 + $0x4] sm:$0xf] }
 0x1b3   :  { %v746_v8 = vadd.f32 %v724_v17, %v628_v20 }
 0x1b5   :  { %v3726_v1 = vadd.f32 %v842_v56, %v746_v8  ;;  %2890 = vmatmul.msk.bf16.gmra.mxu0 %vm251_vm0, %v3609_v61 }
 0x1b8   :  { %v3734_v50 = vpop.f32.mrf.mxu2 }
 0x1b9   :  { %v3736_v47 = vpop.f32.mrf.mxu3 }
 0x1ba   :  { %v3742_v61 = vpop.f32.mrf.mxu0 }
 0x1bd   :  { %2873 = vmatmul.msk.bf16.gmra.mxu2 %vm251_vm0, %v1010_v11 }
 0x1be   :  { %2882 = vmatmul.msk.bf16.gmra.mxu3 %vm251_vm0, %v1128_v52  ;;  %v1641_v52 = vsel %vm1639_vm4, %v2892_v46, 0  ;;  %v971_v46 = vadd.f32 %v3646_v3, %v3648_v31  ;;  %v975_v31 = vadd.f32 %v942_v54, %v3678_v45 }
 0x1bf   :  { %1650 = vmatpush.bf16.msra.mxu1 %v1641_v52 }
 0x1c0   :  { %v611_v57 = vpop.f32.mrf.mxu2 }
 0x1c1   :  { %v729_v36 = vpop.f32.mrf.mxu3  ;;  %v630_v29 = vadd.f32 %v611_v57, %v3620_v48 }
 0x1c2   :  { %v847_v60 = vpop.f32.mrf.mxu0 }
 0x1c3   :  { %v748_v62 = vadd.f32 %v729_v36, %v630_v29 }
 0x1c5   :  { %v3772_v43 = vadd.f32 %v847_v60, %v748_v62  ;;  %2891 = vmatmul.msk.bf16.gmra.mxu0 %vm251_vm0, %v1246_v35 }
 0x1c7   :  { %4656 = vst [vmem:[#allocation4_spill] sm:$0xff] %v3772_v43 }
 0x1c8   :  { %v3781_v38 = vpop.f32.mrf.mxu2 }
 0x1c9   :  { %v3783_v48 = vpop.f32.mrf.mxu3 }
 0x1ca   :  { %4657 = vst [vmem:[#allocation5_spill] sm:$0xff] %v3783_v48  ;;  %v3789_v44 = vpop.f32.mrf.mxu0  ;;  %v973_v48 = vadd.f32 %v3661_v37, %v3663_v6 }
 0x1cb   :  { %4658 = vst [vmem:[#allocation6_spill] sm:$0xff] %v3789_v44  ;;  %v627_v44 = vadd.f32 %v3715_v9, %v3578_v26 }
 0x1d0   :  { %v1049_v28 = vpop.f32.mrf.mxu2 }
 0x1d1   :  { %v1167_v27 = vpop.f32.mrf.mxu3  ;;  %v1089_v23 = vadd.f32 %v1049_v28, %v3644_v4  ;;  %v945_v4 = vpop.f32.mrf.mxu1 }
 0x1d2   :  { %v1285_v42 = vpop.f32.mrf.mxu0 }
 0x1d3   :  { %v1207_v25 = vadd.f32 %v1167_v27, %v1089_v23 }
 0x1d5   :  { %v3792_v34 = vadd.f32 %v1285_v42, %v1207_v25 }
 0x1d8   :  { %v1051_v30 = vpop.f32.mrf.mxu2 }
 0x1d9   :  { %v1169_v21 = vpop.f32.mrf.mxu3  ;;  %v1090_v7 = vadd.f32 %v1051_v30, %v971_v46 }
 0x1da   :  { %v3794_v49 = vpop.f32.mrf.mxu0 }
 0x1e0   :  { %v1054_v5 = vpop.f32.mrf.mxu2 }
 0x1e1   :  { %v1172_v33 = vpop.f32.mrf.mxu3  ;;  %v1091_v63 = vadd.f32 %v1054_v5, %v3659_v24  ;;  %v947_v24 = vpop.f32.mrf.mxu1 }
 0x1e2   :  { %v1290_v0 = vpop.f32.mrf.mxu0 }
 0x1e3   :  { %v1209_v51 = vadd.f32 %v1172_v33, %v1091_v63 }
 0x1e5   :  { %v3797_v14 = vadd.f32 %v1290_v0, %v1209_v51 }
 0x1e8   :  { %v1056_v13 = vpop.f32.mrf.mxu2 }
 0x1e9   :  { %v1174_v15 = vpop.f32.mrf.mxu3  ;;  %v950_v60 = vpop.f32.mrf.mxu1  ;;  %v1092_v3 = vadd.f32 %v1056_v13, %v973_v48 }
 0x1ea   :  { %v3799_v17 = vpop.f32.mrf.mxu0 }
 0x1f0   :  { %v1059_v20 = vpop.f32.mrf.mxu2 }
 0x1f1   :  { %v1177_v56 = vpop.f32.mrf.mxu3  ;;  %v1093_v8 = vadd.f32 %v1059_v20, %v3674_v19  ;;  %v952_v28 = vpop.f32.mrf.mxu1 }
 0x1f2   :  { %v1295_v40 = vpop.f32.mrf.mxu0 }
 0x1f3   :  { %v1211_v11 = vadd.f32 %v1177_v56, %v1093_v8 }
 0x1f5   :  { %v3806_v57 = vadd.f32 %v1295_v40, %v1211_v11  ;;  %v625_v11 = vadd.f32 %v3700_v41, %v3555_v12  ;;  %v745_v12 = vadd.f32 %v3717_v2, %v627_v44  ;;  %v977_v2 = vadd.f32 %v947_v24, %v3689_v16 }
 0x1f7   :  { %v863_v45 = vadd.f32 %v3719_v10, %v745_v12 }
 0x1f8   :  { %v1061_v36 = vpop.f32.mrf.mxu2 }
 0x1f9   :  { %v1179_v18 = vpop.f32.mrf.mxu3  ;;  %v955_v33 = vpop.f32.mrf.mxu1  ;;  %v1094_v37 = vadd.f32 %v1061_v36, %v975_v31  ;;  %v1381_v36 = vmul.f32 %v3797_v14, %v3797_v14 }
 0x1fa   :  { %v3808_v29 = vpop.f32.mrf.mxu0 }
 0x200   :  { %v1064_v62 = vpop.f32.mrf.mxu2 }
 0x201   :  { %v1182_v19 = vpop.f32.mrf.mxu3  ;;  %v957_v56 = vpop.f32.mrf.mxu1 }
 0x202   :  { %v3810_v35 = vpop.f32.mrf.mxu0  ;;  %v981_v10 = vadd.f32 %v957_v56, %v863_v45 }
 0x208   :  { %v1066_v27 = vpop.f32.mrf.mxu2 }
 0x209   :  { %v3812_v23 = vpop.f32.mrf.mxu3  ;;  %v960_v43 = vpop.f32.mrf.mxu1  ;;  %v1096_v13 = vadd.f32 %v1066_v27, %v977_v2  ;;  %v1345_v27 = vsel %vm1341_vm3, %v3797_v14, 0.0 }
 0x20a   :  { %v3814_v42 = vpop.f32.mrf.mxu0  ;;  %v982_v16 = vadd.f32 %v960_v43, %v3726_v1  ;;  %v1342_v1 = vsel %vm1341_vm3, %v3792_v34, 0.0 }
 0x210   :  { %v1069_v25 = vpop.f32.mrf.mxu2 }
 0x211   :  { %v3816_v5 = vpop.f32.mrf.mxu3  ;;  %v962_v54 = vpop.f32.mrf.mxu1 }
 0x212   :  { %v3818_v63 = vpop.f32.mrf.mxu0 }
 0x213   :  { %4659 = vst [vmem:[#allocation7_spill] sm:$0xff] %v3818_v63  ;;  %v1208_v63 = vadd.f32 %v1169_v21, %v1090_v7  ;;  %v1210_v7 = vadd.f32 %v1174_v15, %v1092_v3  ;;  %v980_v21 = vadd.f32 %v955_v33, %v3711_v58 }
 0x218   :  { %v1071_v0 = vpop.f32.mrf.mxu2 }
 0x219   :  { %v3820_v51 = vpop.f32.mrf.mxu3 }
 0x21a   :  { %v3822_v20 = vpop.f32.mrf.mxu0 }
 0x21b   :  { %4660 = vst [vmem:[#allocation8_spill] sm:$0xff] %v3822_v20  ;;  %v629_v20 = vadd.f32 %v3734_v50, %v3603_v59  ;;  %v976_v59 = vadd.f32 %v945_v4, %v3684_v39 }
 0x21d   :  { %v747_v26 = vadd.f32 %v3736_v47, %v629_v20  ;;  %v1095_v48 = vadd.f32 %v1064_v62, %v976_v59  ;;  %v978_v47 = vadd.f32 %v950_v60, %v3696_v32 }
 0x21f   :  { %v865_v50 = vadd.f32 %v3742_v61, %v747_v26  ;;  %v1379_v61 = vmul.f32 %v3792_v34, %v3792_v34  ;;  %v1097_v15 = vadd.f32 %v1069_v25, %v978_v47  ;;  %v1214_v25 = vadd.f32 %v3812_v23, %v1096_v13 }
 0x220   :  { %v1074_v8 = vpop.f32.mrf.mxu2 }
 0x221   :  { %v3824_v40 = vpop.f32.mrf.mxu3  ;;  %v983_v24 = vadd.f32 %v962_v54, %v865_v50  ;;  %v1215_v33 = vadd.f32 %v3816_v5, %v1097_v15  ;;  %v1099_v56 = vadd.f32 %v1074_v8, %v980_v21  ;;  %v1349_v5 = vsel %vm1341_vm3, %v3806_v57, 0.0  ;;  %v965_v54 = vpop.f32.mrf.mxu1  ;;  %v4665_v15 = vld [vmem:[#allocation4_spill] sm:$0xff] }
 0x222   :  { %4661 = vst [vmem:[#allocation9_spill] sm:$0xff] %v3824_v40  ;;  %v3830_v52 = vpop.f32.mrf.mxu0  ;;  %v743_v40 = vadd.f32 %v3702_v55, %v625_v11  ;;  %v3849_v55 = vadd.f32 %v3794_v49, %v1208_v63  ;;  %v3859_v49 = vadd.f32 %v3799_v17, %v1210_v7  ;;  %v631_v17 = vadd.f32 %v3781_v38, %v3629_v22 }
 0x223   :  { %v1395_v22 = vsel %vm1341_vm3, %v1379_v61, 0.0  ;;  %v1398_v63 = vsel %vm1341_vm3, %v1381_v36, 0.0  ;;  %v3900_v31 = vadd.f32 %v3814_v42, %v1214_v25 }
 0x224   :  { %v861_v9 = vadd.f32 %v3704_v53, %v743_v40  ;;  %v1212_v53 = vadd.f32 %v1179_v18, %v1094_v37  ;;  %v1380_v39 = vmul.f32 %v3849_v55, %v3849_v55  ;;  %v1343_v58 = vsel %vm1341_vm3, %v3849_v55, 0.0 }
 0x225   :  { %v1213_v18 = vadd.f32 %v1182_v19, %v1095_v48  ;;  %v1382_v19 = vmul.f32 %v3859_v49, %v3859_v49  ;;  %v1344_v38 = vadd.f32 %v1343_v58, %v1342_v1  ;;  %v1386_v13 = vmul.f32 %v3900_v31, %v3900_v31 }
 0x226   :  { %v979_v44 = vadd.f32 %v952_v28, %v861_v9  ;;  %v3873_v43 = vadd.f32 %v3808_v29, %v1212_v53  ;;  %v1396_v28 = vsel %vm1341_vm3, %v1380_v39, 0.0  ;;  %v1383_v29 = vmul.f32 %v3806_v57, %v3806_v57  ;;  %v4662_v9 = vld [vmem:[#allocation7_spill] sm:$0xff] }
 0x227   :  { %v3891_v20 = vadd.f32 %v3810_v35, %v1213_v18  ;;  %v1397_v40 = vadd.f32 %v1396_v28, %v1395_v22  ;;  %v1346_v46 = vadd.f32 %v1345_v27, %v1344_v38  ;;  %v1400_v3 = vsel %vm1341_vm3, %v1382_v19, 0.0  ;;  %v4666_v27 = vld [vmem:[#allocation5_spill] sm:$0xff] }
 0x228   :  { %v1076_v41 = vpop.f32.mrf.mxu2  ;;  %v1098_v60 = vadd.f32 %v1071_v0, %v979_v44  ;;  %v1347_v0 = vsel %vm1341_vm3, %v3859_v49, 0.0  ;;  %v1384_v23 = vmul.f32 %v3873_v43, %v3873_v43  ;;  %v1402_v8 = vsel %vm1341_vm3, %v1383_v29, 0.0  ;;  %v4664_v44 = vld [vmem:[#allocation8_spill] sm:$0xff] }
 0x229   :  { %v3841_v30 = vpop.f32.mrf.mxu3  ;;  %v1100_v12 = vadd.f32 %v1076_v41, %v981_v10  ;;  %v1399_v26 = vadd.f32 %v1398_v63, %v1397_v40  ;;  %v1348_v35 = vadd.f32 %v1347_v0, %v1346_v46  ;;  %v3904_v37 = vadd.f32 %v4662_v9, %v1215_v33  ;;  %v4663_v2 = vld [vmem:[#allocation9_spill] sm:$0xff] }
 0x22a   :  { %v3845_v6 = vpop.f32.mrf.mxu0  ;;  %v1216_v11 = vadd.f32 %v3820_v51, %v1098_v60  ;;  %v1351_v51 = vsel %vm1341_vm3, %v3873_v43, 0.0  ;;  %v1385_v45 = vmul.f32 %v3891_v20, %v3891_v20  ;;  %v1217_v50 = vadd.f32 %v4663_v2, %v1099_v56 }
 0x22b   :  { %v1401_v48 = vadd.f32 %v1400_v3, %v1399_v26  ;;  %v1350_v41 = vadd.f32 %v1349_v5, %v1348_v35  ;;  %v1404_v47 = vsel %vm1341_vm3, %v1384_v23, 0.0  ;;  %v1353_v39 = vsel %vm1341_vm3, %v3891_v20, 0.0 }
 0x22c   :  { %v3913_v53 = vadd.f32 %v4664_v44, %v1216_v11  ;;  %v1218_v10 = vadd.f32 %v3841_v30, %v1100_v12  ;;  %v1387_v36 = vmul.f32 %v3904_v37, %v3904_v37  ;;  %v1406_v18 = vsel %vm1341_vm3, %v1385_v45, 0.0  ;;  %v4667_v11 = vld [vmem:[#allocation6_spill] sm:$0xff] }
 0x22d   :  { %v1352_v58 = vadd.f32 %v1351_v51, %v1350_v41  ;;  %v1355_v1 = vsel %vm1341_vm3, %v3900_v31, 0.0  ;;  %v3927_v60 = vadd.f32 %v3830_v52, %v1217_v50  ;;  %v749_v19 = vadd.f32 %v4666_v27, %v631_v17 }
 0x22e   :  { %v1388_v25 = vmul.f32 %v3913_v53, %v3913_v53  ;;  %v1408_v22 = vsel %vm1341_vm3, %v1386_v13, 0.0  ;;  %v1357_v38 = vsel %vm1341_vm3, %v3904_v37, 0.0  ;;  %v3936_v29 = vadd.f32 %v3845_v6, %v1218_v10 }
 0x22f   :  { %v1359_v56 = vsel %vm1341_vm3, %v3913_v53, 0.0  ;;  %v1389_v40 = vmul.f32 %v3927_v60, %v3927_v60  ;;  %v867_v6 = vadd.f32 %v4667_v11, %v749_v19  ;;  %v1361_v35 = vsel %vm1341_vm3, %v3927_v60, 0.0 }
 0x230   :  { %v1079_v32 = vpop.f32.mrf.mxu2  ;;  %v1412_v12 = vsel %vm1341_vm3, %v1388_v25, 0.0  ;;  %v1363_v45 = vsel %vm1341_vm3, %v3936_v29, 0.0 }
 0x231   :  { %v1197_v4 = vpop.f32.mrf.mxu3  ;;  %v1101_v42 = vadd.f32 %v1079_v32, %v982_v16  ;;  %v984_v16 = vadd.f32 %v965_v54, %v4665_v15  ;;  %v1403_v32 = vadd.f32 %v1402_v8, %v1401_v48  ;;  %v1390_v8 = vmul.f32 %v3936_v29, %v3936_v29 }
 0x232   :  { %v3875_v62 = vpop.f32.mrf.mxu0  ;;  %v1414_v51 = vsel %vm1341_vm3, %v1389_v40, 0.0 }
 0x233   :  { %v1219_v28 = vadd.f32 %v1197_v4, %v1101_v42  ;;  %v1405_v30 = vadd.f32 %v1404_v47, %v1403_v32  ;;  %v1410_v4 = vsel %vm1341_vm3, %v1387_v36, 0.0  ;;  %v967_v42 = vpop.f32.mrf.mxu1  ;;  %v1416_v44 = vsel %vm1341_vm3, %v1390_v8, 0.0 }
 0x234   :  { %v985_v47 = vadd.f32 %v967_v42, %v867_v6  ;;  %v4668_v42 = vmov 0.0  }
 0x235   :  { %v1407_v63 = vadd.f32 %v1406_v18, %v1405_v30  ;;  %v3944_v46 = vadd.f32 %v3875_v62, %v1219_v28  ;;  %1544 = vst.msk [vmem:[#allocation3 + $0x128] sm:$0x3] %vm1507_vm5, %v4668_v42 }
 0x236   :  { %1508 = vst.msk [vmem:[#allocation3 + $0x8] sm:$0x3] %vm1507_vm5, %v4668_v42 }
 0x237   :  { %v1409_v3 = vadd.f32 %v1408_v22, %v1407_v63  ;;  %v1391_v2 = vmul.f32 %v3944_v46, %v3944_v46  ;;  %1510 = vst.msk [vmem:[#allocation3 + $0x18] sm:$0x3] %vm1507_vm5, %v4668_v42 }
 0x238   :  { %v1081_v59 = vpop.f32.mrf.mxu2  ;;  %1512 = vst.msk [vmem:[#allocation3 + $0x28] sm:$0x3] %vm1507_vm5, %v4668_v42 }
 0x239   :  { %v1199_v7 = vpop.f32.mrf.mxu3  ;;  %v1102_v61 = vadd.f32 %v1081_v59, %v983_v24  ;;  %v1354_v24 = vadd.f32 %v1353_v39, %v1352_v58  ;;  %1514 = vst.msk [vmem:[#allocation3 + $0x38] sm:$0x3] %vm1507_vm5, %v4668_v42 }
 0x23a   :  { %v1317_v21 = vpop.f32.mrf.mxu0  ;;  %1516 = vst.msk [vmem:[#allocation3 + $0x48] sm:$0x3] %vm1507_vm5, %v4668_v42 }
 0x23b   :  { %v1220_v33 = vadd.f32 %v1199_v7, %v1102_v61  ;;  %v1356_v52 = vadd.f32 %v1355_v1, %v1354_v24  ;;  %v1411_v7 = vadd.f32 %v1410_v4, %v1409_v3  ;;  %v1418_v61 = vsel %vm1341_vm3, %v1391_v2, 0.0  ;;  %1518 = vst.msk [vmem:[#allocation3 + $0x58] sm:$0x3] %vm1507_vm5, %v4668_v42 }
 0x23c   :  { %1520 = vst.msk [vmem:[#allocation3 + $0x68] sm:$0x3] %vm1507_vm5, %v4668_v42 }
 0x23d   :  { %v1358_v5 = vadd.f32 %v1357_v38, %v1356_v52  ;;  %v3952_v9 = vadd.f32 %v1317_v21, %v1220_v33  ;;  %v1413_v48 = vadd.f32 %v1412_v12, %v1411_v7  ;;  %v1365_v21 = vsel %vm1341_vm3, %v3944_v46, 0.0  ;;  %1522 = vst.msk [vmem:[#allocation3 + $0x78] sm:$0x3] %vm1507_vm5, %v4668_v42 }
 0x23e   :  { %1524 = vst.msk [vmem:[#allocation3 + $0x88] sm:$0x3] %vm1507_vm5, %v4668_v42 }
 0x23f   :  { %v1360_v62 = vadd.f32 %v1359_v56, %v1358_v5  ;;  %v1392_v54 = vmul.f32 %v3952_v9, %v3952_v9  ;;  %v1415_v39 = vadd.f32 %v1414_v51, %v1413_v48  ;;  %v1367_v15 = vsel %vm1341_vm3, %v3952_v9, 0.0  ;;  %1526 = vst.msk [vmem:[#allocation3 + $0x98] sm:$0x3] %vm1507_vm5, %v4668_v42 }
 0x240   :  { %v1084_v0 = vpop.f32.mrf.mxu2  ;;  %1528 = vst.msk [vmem:[#allocation3 + $0xa8] sm:$0x3] %vm1507_vm5, %v4668_v42 }
 0x241   :  { %v1202_v17 = vpop.f32.mrf.mxu3  ;;  %v1103_v23 = vadd.f32 %v1084_v0, %v984_v16  ;;  %v1362_v41 = vadd.f32 %v1361_v35, %v1360_v62  ;;  %v1417_v58 = vadd.f32 %v1416_v44, %v1415_v39  ;;  %v1420_v1 = vsel %vm1341_vm3, %v1392_v54, 0.0  ;;  %v2909_v44 = vld [vmem:[%s4648_s4 + $0x8] sm:$0xf]  ;;  %v2918_v54 = vld [vmem:[%s4648_s4 + $0xc] sm:$0xf] }
 0x242   :  { %v1320_v26 = vpop.f32.mrf.mxu0  ;;  %v1937_v39 = vsel %vm1639_vm4, %v2918_v54, 0  ;;  %1530 = vst.msk [vmem:[#allocation3 + $0xb8] sm:$0x3] %vm1507_vm5, %v4668_v42  ;;  %v1768_v54 = vld [vmem:[#allocation3 + $0x2] sm:$0xff] }
 0x243   :  { %v1221_v59 = vadd.f32 %v1202_v17, %v1103_v23  ;;  %v1364_v13 = vadd.f32 %v1363_v45, %v1362_v41  ;;  %v1419_v19 = vadd.f32 %v1418_v61, %v1417_v58  ;;  %v1588_v41 = vld [vmem:[%s4648_s4] sm:$0xf]  ;;  %1946 = vmatpush.bf16.msrb.mxu0 %v1937_v39  ;;  %1532 = vst.msk [vmem:[#allocation3 + $0xc8] sm:$0x3] %vm1507_vm5, %v4668_v42 }
 0x244   :  { %1534 = vst.msk [vmem:[#allocation3 + $0xd8] sm:$0x3] %vm1507_vm5, %v4668_v42 }
 0x245   :  { %v3959_v50 = vadd.f32 %v1320_v26, %v1221_v59  ;;  %v1366_v36 = vadd.f32 %v1365_v21, %v1364_v13  ;;  %v1421_v38 = vadd.f32 %v1420_v1, %v1419_v19  ;;  %v1819_v21 = vsel %vm1639_vm4, %v2909_v44, 0  ;;  %1536 = vst.msk [vmem:[#allocation3 + $0xe8] sm:$0x3] %vm1507_vm5, %v4668_v42  ;;  %v1589_v44 = vld [vmem:[#allocation3 + $0x1] sm:$0xff] }
 0x246   :  { %1828 = vmatpush.bf16.msrb.mxu3 %v1819_v21  ;;  %1538 = vst.msk [vmem:[#allocation3 + $0xf8] sm:$0x3] %vm1507_vm5, %v4668_v42  ;;  %v1564_v21 = vld [vmem:[#allocation3] sm:$0xff] }
 0x247   :  { %v1393_v16 = vmul.f32 %v3959_v50, %v3959_v50  ;;  %v1369_v28 = vsel %vm1341_vm3, %v3959_v50, 0.0  ;;  %v1368_v30 = vadd.f32 %v1367_v15, %v1366_v36  ;;  %v2927_v15 = vld [vmem:[%s4648_s4 + $0x10] sm:$0xf]  ;;  %1540 = vst.msk [vmem:[#allocation3 + $0x108] sm:$0x3] %vm1507_vm5, %v4668_v42 }
 0x248   :  { %v1086_v10 = vpop.f32.mrf.mxu2  ;;  %v1436_v36 = vld [vmem:[%s4649_s2] sm:$0x1]  ;;  %1542 = vst.msk [vmem:[#allocation3 + $0x118] sm:$0x3] %vm1507_vm5, %v4668_v42 }
 0x249   :  { %v1104_v32 = vadd.f32 %v1086_v10, %v985_v47  ;;  %v1204_v18 = vpop.f32.mrf.mxu3  ;;  %v1422_v25 = vsel %vm1341_vm3, %v1393_v16, 0.0  ;;  %v1370_v33 = vadd.f32 %v1369_v28, %v1368_v30  ;;  %v1717_v47 = vsel %vm1639_vm4, %v1588_v41, 0  ;;  %1546 = vst.msk [vmem:[#allocation3 + $0x138] sm:$0x3] %vm1507_vm5, %v4668_v42 }
 0x24a   :  { %v1322_v24 = vpop.f32.mrf.mxu0  ;;  %v1423_v4 = vadd.f32 %v1422_v25, %v1421_v38  ;;  %1726 = vmatpush.bf16.msrb.mxu2 %v1717_v47 }
 0x24b   :  { %v1222_v27 = vadd.f32 %v1204_v18, %v1104_v32  ;;  %v2055_v32 = vsel %vm1639_vm4, %v2927_v15, 0 }
 0x24c   :  { %2064 = vmatpush.bf16.msrb.mxu1 %v2055_v32 }
 0x24d   :  { %v3975_v22 = vadd.f32 %v1322_v24, %v1222_v27  ;;  %v1449_v27 = vld [vmem:[%s4650_s3] sm:$0x1] }
 0x24f   :  { %v1371_v63 = vsel %vm1341_vm3, %v3975_v22, 0.0  ;;  %v1394_v52 = vmul.f32 %v3975_v22, %v3975_v22 }
 0x250   :  { %v1372_v0 = vadd.f32 %v1371_v63, %v1370_v33 }
 0x251   :  { %v1424_v17 = vsel %vm1341_vm3, %v1394_v52, 0.0 }
 0x252   :  { %v1373_v56 = vrot.slane %v1372_v0, 4  ;;  %v1425_v40 = vadd.f32 %v1424_v17, %v1423_v4 }
 0x254   :  { %v1374_v23 = vadd.f32 %v1373_v56, %v1372_v0  ;;  %v1426_v11 = vrot.slane %v1425_v40, 4 }
 0x256   :  { %v1375_v6 = vrot.slane %v1374_v23, 2  ;;  %v1427_v3 = vadd.f32 %v1426_v11, %v1425_v40 }
 0x258   :  { %v1376_v5 = vadd.f32 %v1375_v6, %v1374_v23  ;;  %v1428_v12 = vrot.slane %v1427_v3, 2 }
 0x25a   :  { %v1377_v26 = vrot.slane %v1376_v5, 1  ;;  %v1429_v35 = vadd.f32 %v1428_v12, %v1427_v3 }
 0x25c   :  { %v1378_v8 = vadd.f32 %v1377_v26, %v1376_v5  ;;  %v1430_v59 = vrot.slane %v1429_v35, 1 }
 0x25e   :  { %v1431_v7 = vadd.f32 %v1430_v59, %v1429_v35  ;;  %v1432_v62 = vmul.f32 0.0078125, %v1378_v8 }
 0x260   :  { %v1433_v51 = vmul.f32 0.0078125, %v1431_v7  ;;  %v1434_v45 = vmul.f32 %v1432_v62, %v1432_v62 }
 0x262   :  { %v1435_v2 = vsub.f32 %v1433_v51, %v1434_v45 }
 0x264   :  { %v1437_v48 = vadd.f32 1e-05, %v1435_v2 }
 0x266   :  { %3085 = vrsqrt.f32 %v1437_v48  ;;  %vm1444_vm7 = vweird.f32 %v1437_v48 }
 0x26c   :  { %v3086_v13 = vpop.eup %3085 }
 0x26d   :  { %v1439_v10 = vmul.f32 %v3086_v13, %v1437_v48  ;;  %vm1445_vm6 = vweird.f32 %v3086_v13 }
 0x26e   :  { %vm1446_vm8 = vmor %vm1444_vm7, %vm1445_vm6 }
 0x26f   :  { %v1440_v61 = vmul.f32 %v3086_v13, %v1439_v10 }
 0x271   :  { %v1441_v16 = vmul.f32 0.5, %v1440_v61 }
 0x273   :  { %v1442_v58 = vsub.f32 1.5, %v1441_v16 }
 0x275   :  { %v1443_v18 = vmul.f32 %v3086_v13, %v1442_v58 }
 0x277   :  { %v1447_v1 = vsel %vm1446_vm8, %v3086_v13, %v1443_v18 }
 0x278   :  { %v1448_v28 = vmul.f32 %v1447_v1, %v1436_v36 }
 0x27a   :  { %v1450_v19 = vmul.f32 %v1448_v28, %v1432_v62  ;;  %v1453_v30 = vperm.slane %v1448_v28, 0 }
 0x27c   :  { %v1451_v24 = vsub.f32 %v1449_v27, %v1450_v19  ;;  %v1470_v25 = vmul.f32 %v1453_v30, %v3975_v22  ;;  %v1455_v38 = vmul.f32 %v1453_v30, %v3792_v34  ;;  %v1456_v33 = vmul.f32 %v1453_v30, %v3849_v55 }
 0x27d   :  { %v1457_v63 = vmul.f32 %v1453_v30, %v3797_v14  ;;  %v1458_v52 = vmul.f32 %v1453_v30, %v3859_v49  ;;  %v1459_v0 = vmul.f32 %v1453_v30, %v3806_v57  ;;  %v1460_v17 = vmul.f32 %v1453_v30, %v3873_v43 }
 0x27e   :  { %v1472_v4 = vperm.slane %v1451_v24, 0  ;;  %v1461_v56 = vmul.f32 %v1453_v30, %v3891_v20  ;;  %v1462_v40 = vmul.f32 %v1453_v30, %v3900_v31  ;;  %v1463_v23 = vmul.f32 %v1453_v30, %v3904_v37 }
 0x27f   :  { %v1464_v22 = vmul.f32 %v1453_v30, %v3913_v53  ;;  %v1465_v34 = vmul.f32 %v1453_v30, %v3927_v60  ;;  %v1466_v20 = vmul.f32 %v1453_v30, %v3936_v29  ;;  %v1467_v53 = vmul.f32 %v1453_v30, %v3944_v46 }
 0x280   :  { %v1489_v55 = vadd.f32 %v1472_v4, %v1470_v25  ;;  %v1474_v11 = vadd.f32 %v1472_v4, %v1455_v38  ;;  %v1475_v14 = vadd.f32 %v1472_v4, %v1456_v33  ;;  %v1476_v6 = vadd.f32 %v1472_v4, %v1457_v63 }
 0x281   :  { %v1477_v49 = vadd.f32 %v1472_v4, %v1458_v52  ;;  %v1478_v3 = vadd.f32 %v1472_v4, %v1459_v0  ;;  %v1479_v5 = vadd.f32 %v1472_v4, %v1460_v17  ;;  %v1480_v57 = vadd.f32 %v1472_v4, %v1461_v56 }
 0x282   :  { %v1505_v12 = vmax.f32 %v1489_v55, 0.0  ;;  %v1490_v43 = vmax.f32 %v1474_v11, 0.0  ;;  %v1491_v26 = vmax.f32 %v1475_v14, 0.0  ;;  %v1492_v31 = vmax.f32 %v1476_v6, 0.0 }
 0x283   :  { %v1493_v35 = vmax.f32 %v1477_v49, 0.0  ;;  %v1494_v37 = vmax.f32 %v1478_v3, 0.0  ;;  %v1481_v60 = vadd.f32 %v1472_v4, %v1462_v40  ;;  %v1482_v8 = vadd.f32 %v1472_v4, %v1463_v23 }
 0x284   :  { %1563 = vst.msk [vmem:[#allocation3 + $0x121] sm:$0xff] %vm1341_vm3, %v1505_v12  ;;  %v1483_v59 = vadd.f32 %v1472_v4, %v1464_v22  ;;  %v1484_v7 = vadd.f32 %v1472_v4, %v1465_v34  ;;  %v1485_v62 = vadd.f32 %v1472_v4, %v1466_v20  ;;  %v1486_v51 = vadd.f32 %v1472_v4, %v1467_v53 }
 0x285   :  { %1548 = vst.msk [vmem:[#allocation3 + $0x11] sm:$0xff] %vm1341_vm3, %v1490_v43  ;;  %v1468_v45 = vmul.f32 %v1453_v30, %v3952_v9  ;;  %v1469_v2 = vmul.f32 %v1453_v30, %v3959_v50  ;;  %v1495_v29 = vmax.f32 %v1479_v5, 0.0  ;;  %v1496_v46 = vmax.f32 %v1480_v57, 0.0 }
 0x286   :  { %1549 = vst.msk [vmem:[#allocation3 + $0x21] sm:$0xff] %vm1341_vm3, %v1491_v26  ;;  %v1497_v41 = vmax.f32 %v1481_v60, 0.0  ;;  %v1498_v47 = vmax.f32 %v1482_v8, 0.0  ;;  %v1499_v9 = vmax.f32 %v1483_v59, 0.0  ;;  %v1500_v50 = vmax.f32 %v1484_v7, 0.0 }
 0x287   :  { %1550 = vst.msk [vmem:[#allocation3 + $0x31] sm:$0xff] %vm1341_vm3, %v1492_v31  ;;  %v1487_v42 = vadd.f32 %v1472_v4, %v1468_v45  ;;  %v1488_v48 = vadd.f32 %v1472_v4, %v1469_v2  ;;  %v1501_v61 = vmax.f32 %v1485_v62, 0.0  ;;  %v1502_v1 = vmax.f32 %v1486_v51, 0.0 }
 0x288   :  { %1551 = vst.msk [vmem:[#allocation3 + $0x41] sm:$0xff] %vm1341_vm3, %v1493_v35 }
 0x289   :  { %1552 = vst.msk [vmem:[#allocation3 + $0x51] sm:$0xff] %vm1341_vm3, %v1494_v37  ;;  %v1503_v30 = vmax.f32 %v1487_v42, 0.0  ;;  %v1504_v63 = vmax.f32 %v1488_v48, 0.0 }
 0x28a   :  { %1553 = vst.msk [vmem:[#allocation3 + $0x61] sm:$0xff] %vm1341_vm3, %v1495_v29 }
 0x28b   :  { %1554 = vst.msk [vmem:[#allocation3 + $0x71] sm:$0xff] %vm1341_vm3, %v1496_v46 }
 0x28c   :  { %v4068_v39 = vld [vmem:[#allocation3 + $0x11] sm:$0xff]  ;;  %1555 = vst.msk [vmem:[#allocation3 + $0x81] sm:$0xff] %vm1341_vm3, %v1497_v41 }
 0x28d   :  { %v1565_v13 = vld [vmem:[#allocation3 + $0x10] sm:$0xff]  ;;  %v1605_v15 = vpack.c.bf16 %v4068_v39, %v1589_v44  ;;  %v1887_v58 = vld [vmem:[#allocation3 + $0x20] sm:$0xff]  ;;  %1556 = vst.msk [vmem:[#allocation3 + $0xb1] sm:$0xff] %vm1341_vm3, %v1498_v47 }
 0x28e   :  { %v4070_v10 = vld [vmem:[#allocation3 + $0x12] sm:$0xff]  ;;  %v1580_v16 = vpack.c.bf16 %v1565_v13, %v1564_v21  ;;  %v4075_v36 = vld [vmem:[#allocation3 + $0x21] sm:$0xff]  ;;  %v1902_v28 = vpack.c.bf16 %v1887_v58, %v1565_v13  ;;  %1557 = vst.msk [vmem:[#allocation3 + $0xc1] sm:$0xff] %vm1341_vm3, %v1499_v9 }
 0x28f   :  { %v1784_v32 = vpack.c.bf16 %v4070_v10, %v1768_v54  ;;  %v4077_v18 = vld [vmem:[#allocation3 + $0x22] sm:$0xff]  ;;  %v4080_v27 = vld [vmem:[#allocation3 + $0x31] sm:$0xff]  ;;  %v2020_v24 = vpack.c.bf16 %v4075_v36, %v4068_v39  ;;  %2893 = vmatmul.msk.bf16.vlgmr.msra.gmra.mxu1 %vm1341_vm3, %v1605_v15  ;;  %1558 = vst.msk [vmem:[#allocation3 + $0xd1] sm:$0xff] %vm1341_vm3, %v1500_v50 }
 0x290   :  { %v4082_v19 = vld [vmem:[#allocation3 + $0x32] sm:$0xff]  ;;  %v2138_v25 = vpack.c.bf16 %v4077_v18, %v4070_v10  ;;  %2901 = vmatmul.msk.bf16.vlgmr.msrb.gmra.mxu2 %vm1341_vm3, %v1580_v16  ;;  %v4091_v38 = vld [vmem:[#allocation3 + $0x41] sm:$0xff]  ;;  %2919 = vmatmul.msk.bf16.vlgmr.msrb.gmra.mxu0 %vm1341_vm3, %v1902_v28  ;;  %1559 = vst.msk [vmem:[#allocation3 + $0xe1] sm:$0xff] %vm1341_vm3, %v1501_v61  ;;  %v4156_v7 = vpack.c.bf16 %v4080_v27, %v4075_v36 }
 0x291   :  { %v4093_v33 = vld [vmem:[#allocation3 + $0x42] sm:$0xff]  ;;  %2910 = vmatmul.msk.bf16.vlgmr.msrb.gmra.mxu3 %vm1341_vm3, %v1784_v32  ;;  %v4098_v52 = vld [vmem:[#allocation3 + $0x51] sm:$0xff]  ;;  %v2021_v0 = vpack.c.bf16 %v4091_v38, %v4080_v27  ;;  %1560 = vst.msk [vmem:[#allocation3 + $0xf1] sm:$0xff] %vm1341_vm3, %v1502_v1  ;;  %v4162_v51 = vpack.c.bf16 %v4082_v19, %v4077_v18 }
 0x292   :  { %v4100_v4 = vld [vmem:[#allocation3 + $0x52] sm:$0xff]  ;;  %v2139_v17 = vpack.c.bf16 %v4093_v33, %v4082_v19  ;;  %v4107_v56 = vld [vmem:[#allocation3 + $0x61] sm:$0xff]  ;;  %1561 = vst.msk [vmem:[#allocation3 + $0x101] sm:$0xff] %vm1341_vm3, %v1503_v30  ;;  %v4173_v46 = vpack.c.bf16 %v4098_v52, %v4091_v38 }
 0x293   :  { %v4109_v40 = vld [vmem:[#allocation3 + $0x62] sm:$0xff]  ;;  %v2022_v23 = vpack.c.bf16 %v4107_v56, %v4098_v52  ;;  %1562 = vst.msk [vmem:[#allocation3 + $0x111] sm:$0xff] %vm1341_vm3, %v1504_v63  ;;  %v1567_v53 = vld [vmem:[#allocation3 + $0x30] sm:$0xff]  ;;  %v4179_v48 = vpack.c.bf16 %v4100_v4, %v4093_v33 }
 0x294   :  { %v2140_v22 = vpack.c.bf16 %v4109_v40, %v4100_v4  ;;  %v4118_v34 = vld [vmem:[#allocation3 + $0xb1] sm:$0xff]  ;;  %v1889_v59 = vld [vmem:[#allocation3 + $0x40] sm:$0xff]  ;;  %v4158_v62 = vpack.c.bf16 %v1567_v53, %v1887_v58 }
 0x295   :  { %v4120_v55 = vld [vmem:[#allocation3 + $0xb2] sm:$0xff]  ;;  %v4122_v11 = vld [vmem:[#allocation3 + $0xc1] sm:$0xff]  ;;  %v1903_v45 = vpack.c.bf16 %v1889_v59, %v1567_v53 }
 0x296   :  { %v4124_v14 = vld [vmem:[#allocation3 + $0xc2] sm:$0xff]  ;;  %v4126_v6 = vld [vmem:[#allocation3 + $0xd1] sm:$0xff]  ;;  %v2024_v3 = vpack.c.bf16 %v4122_v11, %v4118_v34 }
 0x297   :  { %v4128_v49 = vld [vmem:[#allocation3 + $0xd2] sm:$0xff]  ;;  %v4134_v57 = vld [vmem:[#allocation3 + $0xe1] sm:$0xff] }
 0x298   :  { %v4136_v12 = vld [vmem:[#allocation3 + $0xe2] sm:$0xff]  ;;  %v4138_v43 = vld [vmem:[#allocation3 + $0xf1] sm:$0xff] }
 0x299   :  { %v4140_v26 = vld [vmem:[#allocation3 + $0xf2] sm:$0xff]  ;;  %v4146_v35 = vld [vmem:[#allocation3 + $0x101] sm:$0xff] }
 0x29a   :  { %v4148_v37 = vld [vmem:[#allocation3 + $0x102] sm:$0xff]  ;;  %v1569_v2 = vld [vmem:[#allocation3 + $0x50] sm:$0xff] }
 0x29b   :  { %v1891_v29 = vld [vmem:[#allocation3 + $0x60] sm:$0xff]  ;;  %v4175_v42 = vpack.c.bf16 %v1569_v2, %v1889_v59  ;;  %v4188_v47 = vld [vmem:[#allocation3 + $0x71] sm:$0xff] }
 0x29c   :  { %v1904_v41 = vpack.c.bf16 %v1891_v29, %v1569_v2  ;;  %v1571_v44 = vld [vmem:[#allocation3 + $0x70] sm:$0xff]  ;;  %v4192_v54 = vld [vmem:[#allocation3 + $0x80] sm:$0xff]  ;;  %v4196_v9 = vpack.c.bf16 %v4188_v47, %v4107_v56  ;;  %v4220_v2 = vpack.c.bf16 %v4126_v6, %v4122_v11 }
 0x29d   :  { %v4190_v21 = vld [vmem:[#allocation3 + $0x72] sm:$0xff]  ;;  %v4198_v50 = vpack.c.bf16 %v1571_v44, %v1891_v29  ;;  %v1905_v61 = vpack.c.bf16 %v4192_v54, %v1571_v44  ;;  %v1597_v15 = vld [vmem:[#allocation3 + $0xa1] sm:$0xff] }
 0x29e   :  { %v4202_v13 = vpack.c.bf16 %v4190_v21, %v4109_v40  ;;  %v1572_v16 = vld [vmem:[#allocation3 + $0xa0] sm:$0xff]  ;;  %v1573_v32 = vld [vmem:[#allocation3 + $0xb0] sm:$0xff]  ;;  %v1609_v28 = vpack.c.bf16 %v4118_v34, %v1597_v15  ;;  %v2945_v15 = vld [vmem:[%s4648_s4 + $0x18] sm:$0xf] }
 0x29f   :  { %2894 = vmatmul.msk.bf16.gmra.mxu1 %vm1341_vm3, %v4156_v7  ;;  %v1776_v58 = vld [vmem:[#allocation3 + $0xa2] sm:$0xff]  ;;  %v1584_v30 = vpack.c.bf16 %v1573_v32, %v1572_v16  ;;  %v1575_v59 = vld [vmem:[#allocation3 + $0xd0] sm:$0xff] }
 0x2a0   :  { %2902 = vmatmul.msk.bf16.gmra.mxu2 %vm1341_vm3, %v4158_v62  ;;  %2920 = vmatmul.msk.bf16.gmra.mxu0 %vm1341_vm3, %v1903_v45  ;;  %v1895_v1 = vld [vmem:[#allocation3 + $0xc0] sm:$0xff]  ;;  %v1788_v63 = vpack.c.bf16 %v4120_v55, %v1776_v58  ;;  %v1577_v58 = vld [vmem:[#allocation3 + $0xf0] sm:$0xff] }
 0x2a1   :  { %2911 = vmatmul.msk.bf16.gmra.mxu3 %vm1341_vm3, %v4162_v51  ;;  %v1906_v53 = vpack.c.bf16 %v1895_v1, %v1573_v32  ;;  %v1897_v45 = vld [vmem:[#allocation3 + $0xe0] sm:$0xff]  ;;  %v4222_v29 = vpack.c.bf16 %v1575_v59, %v1895_v1  ;;  %v2292_v32 = vsel %vm1639_vm4, %v2945_v15, 0  ;;  %v4268_v15 = vld [vmem:[#allocation3 + $0x111] sm:$0xff] }
 0x2a2   :  { %v1907_v44 = vpack.c.bf16 %v1897_v45, %v1575_v59  ;;  %2301 = vmatpush.bf16.msra.mxu3 %v2292_v32  ;;  %v1899_v1 = vld [vmem:[#allocation3 + $0x100] sm:$0xff]  ;;  %v4270_v32 = vld [vmem:[#allocation3 + $0x112] sm:$0xff] }
 0x2a3   :  { %v1908_v59 = vpack.c.bf16 %v1899_v1, %v1577_v58  ;;  %v4282_v8 = vpack.c.bf16 %v4270_v32, %v4148_v37  ;;  %v2011_v4 = vld [vmem:[#allocation3 + $0x81] sm:$0xff] }
 0x2a4   :  { %v4338_v40 = vld [vmem:[#allocation3 + $0x82] sm:$0xff] }
 0x2af   :  { %2895 = vmatmul.msk.bf16.gmra.mxu1 %vm1341_vm3, %v4173_v46 }
 0x2b0   :  { %2903 = vmatmul.msk.bf16.gmra.mxu2 %vm1341_vm3, %v4175_v42  ;;  %2921 = vmatmul.msk.bf16.gmra.mxu0 %vm1341_vm3, %v1904_v41  ;;  %v4226_v41 = vpack.c.bf16 %v4128_v49, %v4124_v14 }
 0x2b1   :  { %2912 = vmatmul.msk.bf16.gmra.mxu3 %vm1341_vm3, %v4179_v48 }
 0x2bf   :  { %2896 = vmatmul.msk.bf16.gmra.mxu1 %vm1341_vm3, %v4196_v9 }
 0x2c0   :  { %2904 = vmatmul.msk.bf16.gmra.mxu2 %vm1341_vm3, %v4198_v50  ;;  %2922 = vmatmul.msk.bf16.gmra.mxu0 %vm1341_vm3, %v1905_v61  ;;  %v2936_v61 = vld [vmem:[%s4648_s4 + $0x14] sm:$0xf] }
 0x2c1   :  { %2913 = vmatmul.msk.bf16.gmra.mxu3 %vm1341_vm3, %v4202_v13  ;;  %v2173_v16 = vsel %vm1639_vm4, %v2936_v61, 0 }
 0x2c2   :  { %2182 = vmatpush.bf16.msra.mxu2 %v2173_v16  ;;  %v1579_v16 = vld [vmem:[#allocation3 + $0x110] sm:$0xff] }
 0x2cf   :  { %2897 = vmatmul.msk.bf16.gmra.mxu1 %vm1341_vm3, %v1609_v28  ;;  %v4245_v28 = vpack.c.bf16 %v4138_v43, %v4134_v57 }
 0x2d0   :  { %2905 = vmatmul.msk.bf16.gmra.mxu2 %vm1341_vm3, %v1584_v30  ;;  %2923 = vmatmul.msk.bf16.gmra.mxu0 %vm1341_vm3, %v1906_v53  ;;  %v4247_v30 = vpack.c.bf16 %v1577_v58, %v1897_v45  ;;  %v4254_v53 = vpack.c.bf16 %v4140_v26, %v4136_v12  ;;  %v2963_v45 = vld [vmem:[%s4648_s4 + $0x20] sm:$0xf] }
 0x2d1   :  { %2914 = vmatmul.msk.bf16.gmra.mxu3 %vm1341_vm3, %v1788_v63  ;;  %v2954_v63 = vld [vmem:[%s4648_s4 + $0x1c] sm:$0xf]  ;;  %v2528_v61 = vsel %vm1639_vm4, %v2963_v45, 0  ;;  %v4272_v58 = vld [vmem:[#allocation3 + $0x120] sm:$0xff] }
 0x2d2   :  { %2537 = vmatpush.bf16.msra.mxu1 %v2528_v61 }
 0x2df   :  { %2898 = vmatmul.msk.bf16.gmra.mxu1 %vm1341_vm3, %v4220_v2 }
 0x2e0   :  { %2906 = vmatmul.msk.bf16.gmra.mxu2 %vm1341_vm3, %v4222_v29  ;;  %2924 = vmatmul.msk.bf16.gmra.mxu0 %vm1341_vm3, %v1907_v44  ;;  %v2410_v44 = vsel %vm1639_vm4, %v2954_v63, 0  ;;  %v4276_v63 = vpack.c.bf16 %v4268_v15, %v4146_v35 }
 0x2e1   :  { %2915 = vmatmul.msk.bf16.gmra.mxu3 %vm1341_vm3, %v4226_v41  ;;  %2419 = vmatpush.bf16.msra.mxu0 %v2410_v44  ;;  %v1909_v44 = vpack.c.bf16 %v4272_v58, %v1579_v16 }
 0x2ef   :  { %2899 = vmatmul.msk.bf16.gmra.mxu1 %vm1341_vm3, %v4245_v28 }
 0x2f0   :  { %2907 = vmatmul.msk.bf16.gmra.mxu2 %vm1341_vm3, %v4247_v30  ;;  %2925 = vmatmul.msk.bf16.gmra.mxu0 %vm1341_vm3, %v1908_v59  ;;  %v4278_v59 = vpack.c.bf16 %v1579_v16, %v1899_v1 }
 0x2f1   :  { %2916 = vmatmul.msk.bf16.gmra.mxu3 %vm1341_vm3, %v4254_v53 }
 0x2ff   :  { %2900 = vmatmul.msk.bf16.gmra.mxu1 %vm1341_vm3, %v4276_v63 }
 0x300   :  { %2908 = vmatmul.msk.bf16.gmra.mxu2 %vm1341_vm3, %v4278_v59  ;;  %2926 = vmatmul.msk.bf16.gmra.mxu0 %vm1341_vm3, %v1909_v44 }
 0x301   :  { %2917 = vmatmul.msk.bf16.gmra.mxu3 %vm1341_vm3, %v4282_v8 }
 0x30c   :  { %v1652_v45 = vpop.f32.mrf.mxu1 }
 0x30d   :  { %v1948_v1 = vpop.f32.mrf.mxu0 }
 0x30f   :  { %2928 = vmatmul.msk.bf16.vlgmr.msrb.gmra.mxu1 %vm1341_vm3, %v2020_v24 }
 0x310   :  { %2937 = vmatmul.msk.bf16.vlgmr.msra.gmra.mxu2 %vm1341_vm3, %v2138_v25  ;;  %2955 = vmatmul.msk.bf16.vlgmr.msra.gmra.mxu0 %vm1341_vm3, %v4156_v7 }
 0x311   :  { %2946 = vmatmul.msk.bf16.vlgmr.msra.gmra.mxu3 %vm1341_vm3, %v4158_v62 }
 0x313   :  { %v1728_v61 = vpop.f32.mrf.mxu2 }
 0x314   :  { %v1729_v16 = vadd.f32 %v1728_v61, %v1652_v45  ;;  %v1830_v44 = vpop.f32.mrf.mxu3  ;;  %v1654_v60 = vpop.f32.mrf.mxu1 }
 0x315   :  { %v1950_v20 = vpop.f32.mrf.mxu0 }
 0x316   :  { %v1870_v31 = vadd.f32 %v1830_v44, %v1729_v16 }
 0x318   :  { %v4304_v39 = vadd.f32 %v1948_v1, %v1870_v31 }
 0x31b   :  { %v1730_v36 = vpop.f32.mrf.mxu2 }
 0x31c   :  { %v1731_v24 = vadd.f32 %v1730_v36, %v1654_v60  ;;  %v1832_v5 = vpop.f32.mrf.mxu3  ;;  %v1657_v10 = vpop.f32.mrf.mxu1 }
 0x31d   :  { %v1953_v25 = vpop.f32.mrf.mxu0 }
 0x31e   :  { %v1871_v18 = vadd.f32 %v1832_v5, %v1731_v24 }
 0x31f   :  { %2929 = vmatmul.msk.bf16.gmra.mxu1 %vm1341_vm3, %v2021_v0 }
 0x320   :  { %2938 = vmatmul.msk.bf16.gmra.mxu2 %vm1341_vm3, %v2139_v17  ;;  %v4314_v7 = vadd.f32 %v1950_v20, %v1871_v18  ;;  %2956 = vmatmul.msk.bf16.gmra.mxu0 %vm1341_vm3, %v4173_v46  ;;  %v2366_v18 = vld [vmem:[#allocation3 + $0x91] sm:$0xff] }
 0x321   :  { %2947 = vmatmul.msk.bf16.gmra.mxu3 %vm1341_vm3, %v4175_v42 }
 0x323   :  { %v1733_v5 = vpop.f32.mrf.mxu2 }
 0x324   :  { %v1734_v31 = vadd.f32 %v1733_v5, %v1657_v10  ;;  %v1835_v60 = vpop.f32.mrf.mxu3  ;;  %v1659_v62 = vpop.f32.mrf.mxu1  ;;  %v2248_v10 = vld [vmem:[#allocation3 + $0x90] sm:$0xff] }
 0x325   :  { %v1955_v38 = vpop.f32.mrf.mxu0 }
 0x326   :  { %v1872_v27 = vadd.f32 %v1835_v60, %v1734_v31  ;;  %v2141_v31 = vpack.c.bf16 %v4338_v40, %v4190_v21  ;;  %v2260_v60 = vpack.c.bf16 %v2248_v10, %v4192_v54 }
 0x328   :  { %v4320_v0 = vadd.f32 %v1953_v25, %v1872_v27 }
 0x32b   :  { %v1735_v45 = vpop.f32.mrf.mxu2 }
 0x32c   :  { %v1736_v19 = vadd.f32 %v1735_v45, %v1659_v62  ;;  %v1837_v33 = vpop.f32.mrf.mxu3  ;;  %v1662_v17 = vpop.f32.mrf.mxu1  ;;  %v2378_v62 = vpack.c.bf16 %v2366_v18, %v2011_v4 }
 0x32d   :  { %v1958_v1 = vpop.f32.mrf.mxu0 }
 0x32e   :  { %v1873_v20 = vadd.f32 %v1837_v33, %v1736_v19 }
 0x32f   :  { %2930 = vmatmul.msk.bf16.gmra.mxu1 %vm1341_vm3, %v2022_v23 }
 0x330   :  { %2939 = vmatmul.msk.bf16.gmra.mxu2 %vm1341_vm3, %v2140_v22  ;;  %v4330_v46 = vadd.f32 %v1955_v38, %v1873_v20  ;;  %2957 = vmatmul.msk.bf16.gmra.mxu0 %vm1341_vm3, %v4196_v9  ;;  %v2023_v9 = vpack.c.bf16 %v2011_v4, %v4188_v47 }
 0x331   :  { %2948 = vmatmul.msk.bf16.gmra.mxu3 %vm1341_vm3, %v4198_v50 }
 0x333   :  { %v1738_v42 = vpop.f32.mrf.mxu2 }
 0x334   :  { %v1739_v61 = vadd.f32 %v1738_v42, %v1662_v17  ;;  %v1840_v16 = vpop.f32.mrf.mxu3  ;;  %v1664_v44 = vpop.f32.mrf.mxu1 }
 0x335   :  { %v1960_v56 = vpop.f32.mrf.mxu0 }
 0x336   :  { %v1874_v52 = vadd.f32 %v1840_v16, %v1739_v61 }
 0x338   :  { %v4336_v23 = vadd.f32 %v1958_v1, %v1874_v52 }
 0x33b   :  { %v1740_v36 = vpop.f32.mrf.mxu2 }
 0x33c   :  { %v1741_v22 = vadd.f32 %v1740_v36, %v1664_v44  ;;  %v1842_v24 = vpop.f32.mrf.mxu3  ;;  %v1667_v50 = vpop.f32.mrf.mxu1  ;;  %v4669_v44 = vpack.c.bf16 %v4124_v14, %v4120_v55 }
 0x33d   :  { %v1963_v5 = vpop.f32.mrf.mxu0 }
 0x33e   :  { %v1875_v25 = vadd.f32 %v1842_v24, %v1741_v22 }
 0x33f   :  { %2931 = vmatmul.msk.bf16.gmra.mxu1 %vm1341_vm3, %v2023_v9 }
 0x340   :  { %2940 = vmatmul.msk.bf16.gmra.mxu2 %vm1341_vm3, %v2141_v31  ;;  %v4346_v27 = vadd.f32 %v1960_v56, %v1875_v25  ;;  %2958 = vmatmul.msk.bf16.gmra.mxu0 %vm1341_vm3, %v2378_v62 }
 0x341   :  { %2949 = vmatmul.msk.bf16.gmra.mxu3 %vm1341_vm3, %v2260_v60 }
 0x343   :  { %v1743_v38 = vpop.f32.mrf.mxu2 }
 0x344   :  { %v1744_v45 = vadd.f32 %v1743_v38, %v1667_v50  ;;  %v1845_v19 = vpop.f32.mrf.mxu3  ;;  %v1669_v47 = vpop.f32.mrf.mxu1 }
 0x345   :  { %v1965_v17 = vpop.f32.mrf.mxu0 }
 0x346   :  { %v1876_v33 = vadd.f32 %v1845_v19, %v1744_v45 }
 0x348   :  { %v4350_v21 = vadd.f32 %v1963_v5, %v1876_v33 }
 0x34b   :  { %v1745_v54 = vpop.f32.mrf.mxu2 }
 0x34c   :  { %v1746_v20 = vadd.f32 %v1745_v54, %v1669_v47  ;;  %v1847_v1 = vpop.f32.mrf.mxu3  ;;  %v1672_v42 = vpop.f32.mrf.mxu1 }
 0x34d   :  { %v1968_v16 = vpop.f32.mrf.mxu0 }
 0x34e   :  { %v1877_v61 = vadd.f32 %v1847_v1, %v1746_v20 }
 0x34f   :  { %2932 = vmatmul.msk.bf16.gmra.mxu1 %vm1341_vm3, %v2024_v3 }
 0x350   :  { %2941 = vmatmul.msk.bf16.gmra.mxu2 %vm1341_vm3, %v4669_v44  ;;  %v4360_v52 = vadd.f32 %v1965_v17, %v1877_v61  ;;  %2959 = vmatmul.msk.bf16.gmra.mxu0 %vm1341_vm3, %v4220_v2  ;;  %v4671_v2 = vpack.c.bf16 %v4136_v12, %v4128_v49 }
 0x351   :  { %2950 = vmatmul.msk.bf16.gmra.mxu3 %vm1341_vm3, %v4222_v29  ;;  %v4670_v29 = vpack.c.bf16 %v4134_v57, %v4126_v6 }
 0x353   :  { %v1748_v56 = vpop.f32.mrf.mxu2 }
 0x354   :  { %v1749_v36 = vadd.f32 %v1748_v56, %v1672_v42  ;;  %v1850_v4 = vpop.f32.mrf.mxu3  ;;  %v1674_v22 = vpop.f32.mrf.mxu1  ;;  %v2256_v56 = vld [vmem:[#allocation3 + $0x130] sm:$0xff] }
 0x355   :  { %v1970_v11 = vpop.f32.mrf.mxu0 }
 0x356   :  { %v1878_v34 = vadd.f32 %v1850_v4, %v1749_v36  ;;  %v2374_v36 = vld [vmem:[#allocation3 + $0x131] sm:$0xff] }
 0x358   :  { %v4366_v3 = vadd.f32 %v1968_v16, %v1878_v34 }
 0x35b   :  { %v1750_v24 = vpop.f32.mrf.mxu2 }
 0x35c   :  { %v1751_v55 = vadd.f32 %v1750_v24, %v1674_v22  ;;  %v1852_v14 = vpop.f32.mrf.mxu3  ;;  %v1677_v10 = vpop.f32.mrf.mxu1 }
 0x35d   :  { %v1973_v50 = vpop.f32.mrf.mxu0 }
 0x35e   :  { %v1879_v18 = vadd.f32 %v1852_v14, %v1751_v55 }
 0x35f   :  { %2933 = vmatmul.msk.bf16.gmra.mxu1 %vm1341_vm3, %v4670_v29 }
 0x360   :  { %2942 = vmatmul.msk.bf16.gmra.mxu2 %vm1341_vm3, %v4671_v2  ;;  %v4376_v25 = vadd.f32 %v1970_v11, %v1879_v18  ;;  %2960 = vmatmul.msk.bf16.gmra.mxu0 %vm1341_vm3, %v4245_v28  ;;  %v4673_v28 = vpack.c.bf16 %v4148_v37, %v4140_v26  ;;  %v2019_v26 = vld [vmem:[#allocation3 + $0x121] sm:$0xff]  ;;  %v2264_v11 = vpack.c.bf16 %v2256_v56, %v4272_v58 }
 0x361   :  { %2951 = vmatmul.msk.bf16.gmra.mxu3 %vm1341_vm3, %v4247_v30  ;;  %v4672_v30 = vpack.c.bf16 %v4146_v35, %v4138_v43  ;;  %v4400_v37 = vld [vmem:[#allocation3 + $0x122] sm:$0xff]  ;;  %v2382_v24 = vpack.c.bf16 %v2374_v36, %v2019_v26 }
 0x362   :  { %v2145_v34 = vpack.c.bf16 %v4400_v37, %v4270_v32 }
 0x363   :  { %v1753_v5 = vpop.f32.mrf.mxu2 }
 0x364   :  { %v1754_v9 = vadd.f32 %v1753_v5, %v1677_v10  ;;  %v1855_v31 = vpop.f32.mrf.mxu3  ;;  %v1679_v60 = vpop.f32.mrf.mxu1 }
 0x365   :  { %v1975_v57 = vpop.f32.mrf.mxu0 }
 0x366   :  { %v1880_v6 = vadd.f32 %v1855_v31, %v1754_v9 }
 0x368   :  { %v4382_v62 = vadd.f32 %v1973_v50, %v1880_v6 }
 0x36b   :  { %v1755_v38 = vpop.f32.mrf.mxu2 }
 0x36c   :  { %v1756_v49 = vadd.f32 %v1755_v38, %v1679_v60  ;;  %v1857_v12 = vpop.f32.mrf.mxu3  ;;  %v1682_v45 = vpop.f32.mrf.mxu1 }
 0x36d   :  { %v1978_v47 = vpop.f32.mrf.mxu0 }
 0x36e   :  { %v1881_v19 = vadd.f32 %v1857_v12, %v1756_v49 }
 0x36f   :  { %2934 = vmatmul.msk.bf16.gmra.mxu1 %vm1341_vm3, %v4672_v30 }
 0x370   :  { %2943 = vmatmul.msk.bf16.gmra.mxu2 %vm1341_vm3, %v4673_v28  ;;  %v4392_v33 = vadd.f32 %v1975_v57, %v1881_v19  ;;  %2961 = vmatmul.msk.bf16.gmra.mxu0 %vm1341_vm3, %v4276_v63  ;;  %v2027_v63 = vpack.c.bf16 %v2019_v26, %v4268_v15 }
 0x371   :  { %2952 = vmatmul.msk.bf16.gmra.mxu3 %vm1341_vm3, %v4278_v59 }
 0x373   :  { %v1758_v17 = vpop.f32.mrf.mxu2 }
 0x374   :  { %v1759_v54 = vadd.f32 %v1758_v17, %v1682_v45  ;;  %v1860_v20 = vpop.f32.mrf.mxu3  ;;  %v1684_v1 = vpop.f32.mrf.mxu1 }
 0x375   :  { %v1980_v35 = vpop.f32.mrf.mxu0 }
 0x376   :  { %v1882_v43 = vadd.f32 %v1860_v20, %v1759_v54 }
 0x378   :  { %v4398_v42 = vadd.f32 %v1978_v47, %v1882_v43 }
 0x37b   :  { %v1760_v61 = vpop.f32.mrf.mxu2 }
 0x37c   :  { %v1761_v16 = vadd.f32 %v1760_v61, %v1684_v1  ;;  %v1862_v44 = vpop.f32.mrf.mxu3  ;;  %v1687_v59 = vpop.f32.mrf.mxu1 }
 0x37d   :  { %v1983_v22 = vpop.f32.mrf.mxu0 }
 0x37e   :  { %v1883_v4 = vadd.f32 %v1862_v44, %v1761_v16 }
 0x37f   :  { %2935 = vmatmul.msk.bf16.gmra.mxu1 %vm1341_vm3, %v2027_v63 }
 0x380   :  { %2944 = vmatmul.msk.bf16.gmra.mxu2 %vm1341_vm3, %v2145_v34  ;;  %v4408_v55 = vadd.f32 %v1980_v35, %v1883_v4  ;;  %2962 = vmatmul.msk.bf16.gmra.mxu0 %vm1341_vm3, %v2382_v24 }
 0x381   :  { %2953 = vmatmul.msk.bf16.gmra.mxu3 %vm1341_vm3, %v2264_v11 }
 0x383   :  { %v1763_v14 = vpop.f32.mrf.mxu2 }
 0x384   :  { %v1764_v10 = vadd.f32 %v1763_v14, %v1687_v59  ;;  %v1865_v18 = vpop.f32.mrf.mxu3  ;;  %v1689_v15 = vpop.f32.mrf.mxu1 }
 0x385   :  { %v1985_v29 = vpop.f32.mrf.mxu0 }
 0x386   :  { %v1884_v50 = vadd.f32 %v1865_v18, %v1764_v10 }
 0x388   :  { %v4412_v32 = vadd.f32 %v1983_v22, %v1884_v50 }
 0x38b   :  { %v1765_v58 = vpop.f32.mrf.mxu2 }
 0x38c   :  { %v1766_v2 = vadd.f32 %v1765_v58, %v1689_v15  ;;  %v1867_v5 = vpop.f32.mrf.mxu3  ;;  %v2066_v9 = vpop.f32.mrf.mxu1  ;;  %v2484_v58 = vld [vmem:[#allocation3 + $0x92] sm:$0xff] }
 0x38d   :  { %v2106_v60 = vadd.f32 %v2066_v9, %v4304_v39  ;;  %v2421_v6 = vpop.f32.mrf.mxu0 }
 0x38e   :  { %v1885_v31 = vadd.f32 %v1867_v5, %v1766_v2 }
 0x38f   :  { %2964 = vmatmul.msk.bf16.vlgmr.msra.gmra.mxu1 %vm1341_vm3, %v4162_v51 }
 0x390   :  { %v4417_v57 = vadd.f32 %v1985_v29, %v1885_v31 }
 0x393   :  { %v2184_v38 = vpop.f32.mrf.mxu2 }
 0x394   :  { %v2224_v49 = vadd.f32 %v2184_v38, %v2106_v60  ;;  %v2303_v12 = vpop.f32.mrf.mxu3  ;;  %v2068_v45 = vpop.f32.mrf.mxu1 }
 0x395   :  { %v2107_v47 = vadd.f32 %v2068_v45, %v4314_v7  ;;  %v2423_v28 = vpop.f32.mrf.mxu0 }
 0x396   :  { %v2343_v19 = vadd.f32 %v2303_v12, %v2224_v49 }
 0x398   :  { %v4420_v30 = vadd.f32 %v2421_v6, %v2343_v19 }
 0x39b   :  { %v2186_v17 = vpop.f32.mrf.mxu2 }
 0x39c   :  { %v2225_v54 = vadd.f32 %v2186_v17, %v2107_v47  ;;  %v2305_v20 = vpop.f32.mrf.mxu3  ;;  %v2071_v39 = vpop.f32.mrf.mxu1 }
 0x39d   :  { %v2108_v43 = vadd.f32 %v2071_v39, %v4320_v0  ;;  %v2426_v35 = vpop.f32.mrf.mxu0 }
 0x39e   :  { %v2344_v1 = vadd.f32 %v2305_v20, %v2225_v54 }
 0x39f   :  { %2965 = vmatmul.msk.bf16.gmra.mxu1 %vm1341_vm3, %v4179_v48 }
 0x3a0   :  { %v2462_v51 = vadd.f32 %v2423_v28, %v2344_v1 }
 0x3a3   :  { %v2189_v61 = vpop.f32.mrf.mxu2 }
 0x3a4   :  { %v2226_v26 = vadd.f32 %v2189_v61, %v2108_v43  ;;  %v2308_v16 = vpop.f32.mrf.mxu3  ;;  %v2073_v44 = vpop.f32.mrf.mxu1 }
 0x3a5   :  { %v2109_v56 = vadd.f32 %v2073_v44, %v4330_v46  ;;  %v2428_v63 = vpop.f32.mrf.mxu0 }
 0x3a6   :  { %v2345_v7 = vadd.f32 %v2308_v16, %v2226_v26 }
 0x3a8   :  { %v2463_v36 = vadd.f32 %v2426_v35, %v2345_v7 }
 0x3ab   :  { %v2191_v59 = vpop.f32.mrf.mxu2 }
 0x3ac   :  { %v2227_v4 = vadd.f32 %v2191_v59, %v2109_v56  ;;  %v2310_v22 = vpop.f32.mrf.mxu3  ;;  %v2076_v34 = vpop.f32.mrf.mxu1 }
 0x3ad   :  { %v2110_v0 = vadd.f32 %v2076_v34, %v4336_v23  ;;  %v2431_v50 = vpop.f32.mrf.mxu0  ;;  %v2496_v23 = vpack.c.bf16 %v2484_v58, %v4338_v40 }
 0x3ae   :  { %v2346_v11 = vadd.f32 %v2310_v22, %v2227_v4 }
 0x3af   :  { %2966 = vmatmul.msk.bf16.gmra.mxu1 %vm1341_vm3, %v4202_v13 }
 0x3b0   :  { %v2464_v48 = vadd.f32 %v2428_v63, %v2346_v11 }
 0x3b3   :  { %v2194_v24 = vpop.f32.mrf.mxu2 }
 0x3b4   :  { %v2228_v14 = vadd.f32 %v2194_v24, %v2110_v0  ;;  %v2313_v10 = vpop.f32.mrf.mxu3  ;;  %v2078_v18 = vpop.f32.mrf.mxu1 }
 0x3b5   :  { %v4430_v46 = vadd.f32 %v2078_v18, %v4346_v27 }
 0x3b6   :  { %v2347_v15 = vadd.f32 %v2313_v10, %v2228_v14 }
 0x3b8   :  { %v2465_v29 = vadd.f32 %v2431_v50, %v2347_v15 }
 0x3bb   :  { %v2196_v47 = vpop.f32.mrf.mxu2 }
 0x3bc   :  { %v2081_v2 = vpop.f32.mrf.mxu1  ;;  %v2315_v17 = vpop.f32.mrf.mxu3  ;;  %v2229_v58 = vadd.f32 %v2196_v47, %v4430_v46 }
 0x3bd   :  { %v4433_v5 = vadd.f32 %v2081_v2, %v4350_v21 }
 0x3bf   :  { %2967 = vmatmul.msk.bf16.gmra.mxu1 %vm1341_vm3, %v2496_v23 }
 0x3c4   :  { %v2083_v13 = vpop.f32.mrf.mxu1  ;;  %v2318_v39 = vpop.f32.mrf.mxu3 }
 0x3c5   :  { %v4438_v9 = vadd.f32 %v2083_v13, %v4360_v52 }
 0x3cc   :  { %v2086_v31 = vpop.f32.mrf.mxu1 }
 0x3cd   :  { %v4441_v60 = vadd.f32 %v2086_v31, %v4366_v3 }
 0x3cf   :  { %2968 = vmatmul.msk.bf16.gmra.mxu1 %vm1341_vm3, %v4226_v41 }
 0x3d4   :  { %v2088_v27 = vpop.f32.mrf.mxu1 }
 0x3d5   :  { %v2115_v6 = vadd.f32 %v2088_v27, %v4376_v25 }
 0x3dc   :  { %v2091_v21 = vpop.f32.mrf.mxu1 }
 0x3dd   :  { %v4447_v38 = vadd.f32 %v2091_v21, %v4382_v62  ;;  %v2492_v62 = vld [vmem:[#allocation3 + $0x132] sm:$0xff] }
 0x3df   :  { %2969 = vmatmul.msk.bf16.gmra.mxu1 %vm1341_vm3, %v4254_v53  ;;  %v2500_v53 = vpack.c.bf16 %v2492_v62, %v4400_v37  ;;  %v2433_v37 = vpop.f32.mrf.mxu0 }
 0x3e4   :  { %v2093_v40 = vpop.f32.mrf.mxu1 }
 0x3e5   :  { %v4452_v52 = vadd.f32 %v2093_v40, %v4392_v33 }
 0x3e7   :  { %v2436_v35 = vpop.f32.mrf.mxu0 }
 0x3ec   :  { %v2096_v49 = vpop.f32.mrf.mxu1 }
 0x3ed   :  { %v4455_v3 = vadd.f32 %v2096_v49, %v4398_v42  ;;  %v2348_v49 = vadd.f32 %v2315_v17, %v2229_v58 }
 0x3ef   :  { %2970 = vmatmul.msk.bf16.gmra.mxu1 %vm1341_vm3, %v4282_v8  ;;  %v2438_v44 = vpop.f32.mrf.mxu0 }
 0x3f4   :  { %v2098_v41 = vpop.f32.mrf.mxu1 }
 0x3f5   :  { %v4460_v25 = vadd.f32 %v2098_v41, %v4408_v55 }
 0x3f7   :  { %v2441_v59 = vpop.f32.mrf.mxu0 }
 0x3fc   :  { %v2101_v12 = vpop.f32.mrf.mxu1 }
 0x3fd   :  { %v4463_v45 = vadd.f32 %v2101_v12, %v4412_v32  ;;  %v2199_v32 = vpop.f32.mrf.mxu2 }
 0x3fe   :  { %v2230_v2 = vadd.f32 %v2199_v32, %v4433_v5 }
 0x3ff   :  { %2971 = vmatmul.msk.bf16.gmra.mxu1 %vm1341_vm3, %v2500_v53  ;;  %v2443_v34 = vpop.f32.mrf.mxu0 }
 0x400   :  { %v2349_v41 = vadd.f32 %v2318_v39, %v2230_v2 }
 0x404   :  { %v2103_v33 = vpop.f32.mrf.mxu1 }
 0x405   :  { %v4468_v42 = vadd.f32 %v2103_v33, %v4417_v57  ;;  %v2201_v57 = vpop.f32.mrf.mxu2  ;;  %v2466_v33 = vadd.f32 %v2433_v37, %v2348_v49 }
 0x406   :  { %v2231_v23 = vadd.f32 %v2201_v57, %v4438_v9 }
 0x407   :  { %v2446_v24 = vpop.f32.mrf.mxu0 }
 0x40c   :  { %v2539_v19 = vpop.f32.mrf.mxu1 }
 0x40d   :  { %v4471_v8 = vadd.f32 %v2539_v19, %v4420_v30  ;;  %v2320_v30 = vpop.f32.mrf.mxu3  ;;  %v2204_v16 = vpop.f32.mrf.mxu2  ;;  %v2467_v19 = vadd.f32 %v2436_v35, %v2349_v41 }
 0x40e   :  { %v2232_v13 = vadd.f32 %v2204_v16, %v4441_v60  ;;  %v2350_v62 = vadd.f32 %v2320_v30, %v2231_v23 }
 0x40f   :  { %v4485_v15 = vpop.f32.mrf.mxu0  ;;  %v2632_v9 = vmul.f32 %v4471_v8, %v4471_v8 }
 0x410   :  { %v2468_v17 = vadd.f32 %v2438_v44, %v2350_v62 }
 0x411   :  { %v2648_v35 = vsel %vm1341_vm3, %v2632_v9, 0.0 }
 0x414   :  { %v2541_v55 = vpop.f32.mrf.mxu1 }
 0x415   :  { %v4473_v28 = vadd.f32 %v2541_v55, %v2462_v51  ;;  %v2323_v7 = vpop.f32.mrf.mxu3  ;;  %v2206_v56 = vpop.f32.mrf.mxu2 }
 0x416   :  { %v2233_v27 = vadd.f32 %v2206_v56, %v2115_v6  ;;  %v2351_v12 = vadd.f32 %v2323_v7, %v2232_v13 }
 0x417   :  { %v4493_v21 = vpop.f32.mrf.mxu0  ;;  %v2633_v46 = vmul.f32 %v4473_v28, %v4473_v28  ;;  %v2596_v60 = vsel %vm1341_vm3, %v4473_v28, 0.0 }
 0x419   :  { %v2649_v32 = vsel %vm1341_vm3, %v2633_v46, 0.0 }
 0x41c   :  { %v2544_v54 = vpop.f32.mrf.mxu1 }
 0x41d   :  { %v4475_v20 = vadd.f32 %v2544_v54, %v2463_v36  ;;  %v2325_v36 = vpop.f32.mrf.mxu3  ;;  %v2209_v63 = vpop.f32.mrf.mxu2  ;;  %v2469_v54 = vadd.f32 %v2441_v59, %v2351_v12 }
 0x41e   :  { %v2234_v53 = vadd.f32 %v2209_v63, %v4447_v38  ;;  %v2352_v5 = vadd.f32 %v2325_v36, %v2233_v27  ;;  %v2595_v38 = vsel %vm1341_vm3, %v4471_v8, 0.0 }
 0x41f   :  { %v2634_v6 = vmul.f32 %v4475_v20, %v4475_v20  ;;  %v2598_v39 = vsel %vm1341_vm3, %v4475_v20, 0.0  ;;  %v2453_v63 = vpop.f32.mrf.mxu0 }
 0x420   :  { %v2470_v30 = vadd.f32 %v2443_v34, %v2352_v5 }
 0x421   :  { %v2651_v44 = vsel %vm1341_vm3, %v2634_v6, 0.0 }
 0x424   :  { %v2546_v1 = vpop.f32.mrf.mxu1 }
 0x425   :  { %v4477_v43 = vadd.f32 %v2546_v1, %v2464_v48  ;;  %v2328_v11 = vpop.f32.mrf.mxu3  ;;  %v2211_v48 = vpop.f32.mrf.mxu2 }
 0x426   :  { %v2353_v47 = vadd.f32 %v2328_v11, %v2234_v53  ;;  %v2235_v37 = vadd.f32 %v2211_v48, %v4452_v52  ;;  %v2650_v52 = vadd.f32 %v2649_v32, %v2648_v35 }
 0x427   :  { %v2635_v1 = vmul.f32 %v4477_v43, %v4477_v43  ;;  %v2600_v56 = vsel %vm1341_vm3, %v4477_v43, 0.0 }
 0x428   :  { %v2471_v48 = vadd.f32 %v2446_v24, %v2353_v47  ;;  %v2652_v27 = vadd.f32 %v2651_v44, %v2650_v52 }
 0x429   :  { %v2653_v34 = vsel %vm1341_vm3, %v2635_v1, 0.0 }
 0x42a   :  { %v2654_v12 = vadd.f32 %v2653_v34, %v2652_v27 }
 0x42c   :  { %v2549_v61 = vpop.f32.mrf.mxu1 }
 0x42d   :  { %v4479_v26 = vadd.f32 %v2549_v61, %v2465_v29  ;;  %v2330_v10 = vpop.f32.mrf.mxu3  ;;  %v2214_v18 = vpop.f32.mrf.mxu2  ;;  %v2597_v61 = vadd.f32 %v2596_v60, %v2595_v38 }
 0x42e   :  { %v2354_v13 = vadd.f32 %v2330_v10, %v2235_v37  ;;  %v2456_v37 = vpop.f32.mrf.mxu0 }
 0x42f   :  { %v2636_v59 = vmul.f32 %v4479_v26, %v4479_v26  ;;  %v2599_v11 = vadd.f32 %v2598_v39, %v2597_v61  ;;  %v2602_v58 = vsel %vm1341_vm3, %v4479_v26, 0.0 }
 0x431   :  { %v2601_v49 = vadd.f32 %v2600_v56, %v2599_v11 }
 0x433   :  { %v2603_v10 = vadd.f32 %v2602_v58, %v2601_v49 }
 0x434   :  { %v2551_v51 = vpop.f32.mrf.mxu1 }
 0x435   :  { %v2333_v29 = vpop.f32.mrf.mxu3  ;;  %v2216_v31 = vpop.f32.mrf.mxu2  ;;  %v4513_v57 = vadd.f32 %v2551_v51, %v2466_v33  ;;  %v2236_v51 = vadd.f32 %v2214_v18, %v4455_v3  ;;  %v2655_v3 = vsel %vm1341_vm3, %v2636_v59, 0.0 }
 0x437   :  { %v2637_v2 = vmul.f32 %v4513_v57, %v4513_v57  ;;  %v2604_v24 = vsel %vm1341_vm3, %v4513_v57, 0.0  ;;  %v2355_v62 = vadd.f32 %v2333_v29, %v2236_v51  ;;  %v2472_v29 = vadd.f32 %v4485_v15, %v2354_v13 }
 0x438   :  { %v2605_v60 = vadd.f32 %v2604_v24, %v2603_v10 }
 0x43c   :  { %v2554_v4 = vpop.f32.mrf.mxu1 }
 0x43d   :  { %v2335_v55 = vpop.f32.mrf.mxu3  ;;  %v2219_v7 = vpop.f32.mrf.mxu2  ;;  %v4522_v36 = vadd.f32 %v2554_v4, %v2467_v19  ;;  %v2237_v4 = vadd.f32 %v2216_v31, %v4460_v25  ;;  %v2657_v25 = vsel %vm1341_vm3, %v2637_v2, 0.0 }
 0x43f   :  { %v2638_v18 = vmul.f32 %v4522_v36, %v4522_v36  ;;  %v2606_v31 = vsel %vm1341_vm3, %v4522_v36, 0.0  ;;  %v2356_v5 = vadd.f32 %v2335_v55, %v2237_v4 }
 0x440   :  { %v2607_v55 = vadd.f32 %v2606_v31, %v2605_v60 }
 0x441   :  { %v2659_v6 = vsel %vm1341_vm3, %v2638_v18, 0.0  ;;  %v2474_v61 = vadd.f32 %v2453_v63, %v2356_v5  ;;  %v2458_v5 = vpop.f32.mrf.mxu0 }
 0x444   :  { %v2556_v22 = vpop.f32.mrf.mxu1 }
 0x445   :  { %v4530_v23 = vadd.f32 %v2556_v22, %v2468_v17  ;;  %v2238_v22 = vadd.f32 %v2219_v7, %v4463_v45  ;;  %v2338_v9 = vpop.f32.mrf.mxu3  ;;  %v2473_v17 = vadd.f32 %v4493_v21, %v2355_v62 }
 0x447   :  { %v2639_v53 = vmul.f32 %v4530_v23, %v4530_v23  ;;  %v2608_v33 = vsel %vm1341_vm3, %v4530_v23, 0.0 }
 0x448   :  { %v2609_v35 = vadd.f32 %v2608_v33, %v2607_v55 }
 0x449   :  { %v2661_v15 = vsel %vm1341_vm3, %v2639_v53, 0.0 }
 0x44c   :  { %v4481_v0 = vpop.f32.mrf.mxu1 }
 0x44d   :  { %v4539_v41 = vadd.f32 %v4481_v0, %v2469_v54  ;;  %v2656_v0 = vadd.f32 %v2655_v3, %v2654_v12  ;;  %v2221_v54 = vpop.f32.mrf.mxu2  ;;  %v2340_v27 = vpop.f32.mrf.mxu3 }
 0x44e   :  { %v2239_v56 = vadd.f32 %v2221_v54, %v4468_v42 }
 0x44f   :  { %v2640_v19 = vmul.f32 %v4539_v41, %v4539_v41  ;;  %v2658_v38 = vadd.f32 %v2657_v25, %v2656_v0  ;;  %v2610_v32 = vsel %vm1341_vm3, %v4539_v41, 0.0 }
 0x450   :  { %v2611_v51 = vadd.f32 %v2610_v32, %v2609_v35  ;;  %v2358_v24 = vadd.f32 %v2340_v27, %v2239_v56 }
 0x454   :  { %v4483_v14 = vpop.f32.mrf.mxu1 }
 0x455   :  { %v4548_v46 = vadd.f32 %v4483_v14, %v2470_v30  ;;  %v2357_v14 = vadd.f32 %v2338_v9, %v2238_v22  ;;  %v2663_v30 = vsel %vm1341_vm3, %v2640_v19, 0.0 }
 0x457   :  { %v2641_v39 = vmul.f32 %v4548_v46, %v4548_v46  ;;  %v2612_v21 = vsel %vm1341_vm3, %v4548_v46, 0.0 }
 0x458   :  { %v2613_v58 = vadd.f32 %v2612_v21, %v2611_v51 }
 0x459   :  { %v2665_v52 = vsel %vm1341_vm3, %v2641_v39, 0.0 }
 0x45c   :  { %v4487_v50 = vpop.f32.mrf.mxu1 }
 0x45d   :  { %v4557_v47 = vadd.f32 %v4487_v50, %v2471_v48  ;;  %v2660_v50 = vadd.f32 %v2659_v6, %v2658_v38 }
 0x45f   :  { %v2642_v7 = vmul.f32 %v4557_v47, %v4557_v47  ;;  %v2662_v59 = vadd.f32 %v2661_v15, %v2660_v50  ;;  %v2614_v63 = vsel %vm1341_vm3, %v4557_v47, 0.0 }
 0x460   :  { %v2615_v3 = vadd.f32 %v2614_v63, %v2613_v58 }
 0x461   :  { %v2664_v34 = vadd.f32 %v2663_v30, %v2662_v59 }
 0x463   :  { %v2666_v49 = vadd.f32 %v2665_v52, %v2664_v34 }
 0x464   :  { %v4495_v40 = vpop.f32.mrf.mxu1 }
 0x465   :  { %v4566_v1 = vadd.f32 %v4495_v40, %v2472_v29  ;;  %v2475_v40 = vadd.f32 %v2456_v37, %v2357_v14 }
 0x467   :  { %v2643_v11 = vmul.f32 %v4566_v1, %v4566_v1  ;;  %v2616_v42 = vsel %vm1341_vm3, %v4566_v1, 0.0 }
 0x468   :  { %v2617_v10 = vadd.f32 %v2616_v42, %v2615_v3 }
 0x469   :  { %v2669_v18 = vsel %vm1341_vm3, %v2643_v11, 0.0 }
 0x46c   :  { %v2569_v16 = vpop.f32.mrf.mxu1 }
 0x46d   :  { %v4573_v44 = vadd.f32 %v2569_v16, %v2473_v17  ;;  %v2667_v16 = vsel %vm1341_vm3, %v2642_v7, 0.0 }
 0x46e   :  { %v2668_v12 = vadd.f32 %v2667_v16, %v2666_v49 }
 0x46f   :  { %v2644_v13 = vmul.f32 %v4573_v44, %v4573_v44  ;;  %v2618_v62 = vsel %vm1341_vm3, %v4573_v44, 0.0 }
 0x470   :  { %v2670_v9 = vadd.f32 %v2669_v18, %v2668_v12  ;;  %v2619_v0 = vadd.f32 %v2618_v62, %v2617_v10  ;;  %v2689_v18 = vld [vmem:[%s4651_s5] sm:$0x1] }
 0x471   :  { %v2671_v25 = vsel %vm1341_vm3, %v2644_v13, 0.0  ;;  %v2702_v10 = vld [vmem:[%s4652_s6] sm:$0x1] }
 0x472   :  { %v2672_v6 = vadd.f32 %v2671_v25, %v2670_v9 }
 0x474   :  { %v2571_v45 = vpop.f32.mrf.mxu1 }
 0x475   :  { %v4581_v48 = vadd.f32 %v2571_v45, %v2474_v61  ;;  %v2476_v45 = vadd.f32 %v2458_v5, %v2358_v24 }
 0x477   :  { %v2645_v22 = vmul.f32 %v4581_v48, %v4581_v48  ;;  %v2620_v31 = vsel %vm1341_vm3, %v4581_v48, 0.0 }
 0x478   :  { %v2621_v33 = vadd.f32 %v2620_v31, %v2619_v0 }
 0x479   :  { %v2673_v60 = vsel %vm1341_vm3, %v2645_v22, 0.0 }
 0x47a   :  { %v2674_v55 = vadd.f32 %v2673_v60, %v2672_v6 }
 0x47c   :  { %v2574_v2 = vpop.f32.mrf.mxu1 }
 0x47d   :  { %v4588_v4 = vadd.f32 %v2574_v2, %v2475_v40 }
 0x47f   :  { %v2646_v53 = vmul.f32 %v4588_v4, %v4588_v4  ;;  %v2622_v29 = vsel %vm1341_vm3, %v4588_v4, 0.0 }
 0x480   :  { %v2623_v17 = vadd.f32 %v2622_v29, %v2621_v33 }
 0x481   :  { %v2675_v14 = vsel %vm1341_vm3, %v2646_v53, 0.0 }
 0x482   :  { %v2676_v32 = vadd.f32 %v2675_v14, %v2674_v55 }
 0x484   :  { %v2576_v19 = vpop.f32.mrf.mxu1 }
 0x485   :  { %v2594_v38 = vadd.f32 %v2576_v19, %v2476_v45 }
 0x487   :  { %v2624_v54 = vsel %vm1341_vm3, %v2594_v38, 0.0  ;;  %v2647_v15 = vmul.f32 %v2594_v38, %v2594_v38 }
 0x488   :  { %v2625_v39 = vadd.f32 %v2624_v54, %v2623_v17 }
 0x489   :  { %v2677_v37 = vsel %vm1341_vm3, %v2647_v15, 0.0 }
 0x48a   :  { %v2626_v50 = vrot.slane %v2625_v39, 4  ;;  %v2678_v35 = vadd.f32 %v2677_v37, %v2676_v32 }
 0x48c   :  { %v2627_v61 = vadd.f32 %v2626_v50, %v2625_v39  ;;  %v2679_v30 = vrot.slane %v2678_v35, 4 }
 0x48e   :  { %v2628_v21 = vrot.slane %v2627_v61, 2  ;;  %v2680_v7 = vadd.f32 %v2679_v30, %v2678_v35 }
 0x490   :  { %v2629_v56 = vadd.f32 %v2628_v21, %v2627_v61  ;;  %v2681_v59 = vrot.slane %v2680_v7, 2 }
 0x492   :  { %v2630_v51 = vrot.slane %v2629_v56, 1  ;;  %v2682_v40 = vadd.f32 %v2681_v59, %v2680_v7 }
 0x494   :  { %v2631_v52 = vadd.f32 %v2630_v51, %v2629_v56  ;;  %v2683_v63 = vrot.slane %v2682_v40, 1 }
 0x496   :  { %v2684_v11 = vadd.f32 %v2683_v63, %v2682_v40  ;;  %v2685_v34 = vmul.f32 0.0078125, %v2631_v52 }
 0x498   :  { %v2686_v58 = vmul.f32 0.0078125, %v2684_v11  ;;  %v2687_v2 = vmul.f32 %v2685_v34, %v2685_v34 }
 0x49a   :  { %v2688_v16 = vsub.f32 %v2686_v58, %v2687_v2 }
 0x49c   :  { %v2690_v42 = vadd.f32 1e-05, %v2688_v16 }
 0x49e   :  { %3087 = vrsqrt.f32 %v2690_v42  ;;  %vm2697_vm10 = vweird.f32 %v2690_v42 }
 0x4a4   :  { %v3088_v13 = vpop.eup %3087 }
 0x4a5   :  { %v2692_v27 = vmul.f32 %v3088_v13, %v2690_v42  ;;  %vm2698_vm9 = vweird.f32 %v3088_v13 }
 0x4a6   :  { %vm2699_vm11 = vmor %vm2697_vm10, %vm2698_vm9 }
 0x4a7   :  { %v2693_v49 = vmul.f32 %v3088_v13, %v2692_v27 }
 0x4a9   :  { %v2694_v3 = vmul.f32 0.5, %v2693_v49 }
 0x4ab   :  { %v2695_v24 = vsub.f32 1.5, %v2694_v3 }
 0x4ad   :  { %v2696_v62 = vmul.f32 %v3088_v13, %v2695_v24 }
 0x4af   :  { %v2700_v22 = vsel %vm2699_vm11, %v3088_v13, %v2696_v62 }
 0x4b0   :  { %v2701_v12 = vmul.f32 %v2700_v22, %v2689_v18 }
 0x4b2   :  { %v2703_v25 = vmul.f32 %v2701_v12, %v2685_v34  ;;  %v2706_v31 = vperm.slane %v2701_v12, 0 }
 0x4b4   :  { %v2704_v53 = vsub.f32 %v2702_v10, %v2703_v25  ;;  %v2723_v5 = vmul.f32 %v2706_v31, %v2594_v38  ;;  %v2708_v9 = vmul.f32 %v2706_v31, %v4471_v8  ;;  %v2709_v60 = vmul.f32 %v2706_v31, %v4473_v28 }
 0x4b5   :  { %v2710_v29 = vmul.f32 %v2706_v31, %v4475_v20  ;;  %v2711_v45 = vmul.f32 %v2706_v31, %v4477_v43  ;;  %v2712_v6 = vmul.f32 %v2706_v31, %v4479_v26  ;;  %v2713_v33 = vmul.f32 %v2706_v31, %v4513_v57 }
 0x4b6   :  { %v2725_v0 = vperm.slane %v2704_v53, 0  ;;  %v2714_v19 = vmul.f32 %v2706_v31, %v4522_v36  ;;  %v2715_v14 = vmul.f32 %v2706_v31, %v4530_v23  ;;  %v2716_v20 = vmul.f32 %v2706_v31, %v4539_v41 }
 0x4b7   :  { %v2717_v26 = vmul.f32 %v2706_v31, %v4548_v46  ;;  %v2718_v57 = vmul.f32 %v2706_v31, %v4557_v47  ;;  %v2719_v36 = vmul.f32 %v2706_v31, %v4566_v1  ;;  %v2720_v23 = vmul.f32 %v2706_v31, %v4573_v44 }
 0x4b8   :  { %v2727_v55 = vadd.f32 %v2725_v0, %v2708_v9  ;;  %v2728_v17 = vadd.f32 %v2725_v0, %v2709_v60  ;;  %v2729_v38 = vadd.f32 %v2725_v0, %v2710_v29  ;;  %v2730_v54 = vadd.f32 %v2725_v0, %v2711_v45 }
 0x4b9   :  { %v2731_v8 = vadd.f32 %v2725_v0, %v2712_v6  ;;  %v2732_v15 = vadd.f32 %v2725_v0, %v2713_v33  ;;  %v2733_v32 = vadd.f32 %v2725_v0, %v2714_v19  ;;  %v2734_v28 = vadd.f32 %v2725_v0, %v2715_v14 }
 0x4ba   :  { %v2743_v39 = vmax.f32 %v2727_v55, 0.0  ;;  %v2735_v37 = vadd.f32 %v2725_v0, %v2716_v20  ;;  %v2736_v50 = vadd.f32 %v2725_v0, %v2717_v26  ;;  %v2737_v35 = vadd.f32 %v2725_v0, %v2718_v57 }
 0x4bb   :  { %v2738_v61 = vadd.f32 %v2725_v0, %v2719_v36  ;;  %v2739_v30 = vadd.f32 %v2725_v0, %v2720_v23  ;;  %v2721_v21 = vmul.f32 %v2706_v31, %v4581_v48  ;;  %v2722_v41 = vmul.f32 %v2706_v31, %v4588_v4 }
 0x4bc   :  { %v2759_v43 = vsel %vm1341_vm3, %v2743_v39, 0.0  ;;  %v2742_v7 = vadd.f32 %v2725_v0, %v2723_v5  ;;  %v2744_v56 = vmax.f32 %v2728_v17, 0.0  ;;  %v2745_v1 = vmax.f32 %v2729_v38, 0.0 }
 0x4bd   :  { %2775 = vxpose.xlu1.b32.start [1/16] (narrow) %v2759_v43, 8  ;;  %v2740_v59 = vadd.f32 %v2725_v0, %v2721_v21  ;;  %v2741_v46 = vadd.f32 %v2725_v0, %v2722_v41  ;;  %v2746_v44 = vmax.f32 %v2730_v54, 0.0  ;;  %v2747_v52 = vmax.f32 %v2731_v8, 0.0 }
 0x4be   :  { %v2760_v47 = vsel %vm1341_vm3, %v2744_v56, 0.0  ;;  %v2761_v51 = vsel %vm1341_vm3, %v2745_v1, 0.0  ;;  %v2748_v4 = vmax.f32 %v2732_v15, 0.0  ;;  %v2749_v11 = vmax.f32 %v2733_v32, 0.0 }
 0x4bf   :  { %v2762_v40 = vsel %vm1341_vm3, %v2746_v44, 0.0  ;;  %v2763_v48 = vsel %vm1341_vm3, %v2747_v52, 0.0  ;;  %v2750_v58 = vmax.f32 %v2734_v28, 0.0  ;;  %v2751_v16 = vmax.f32 %v2735_v37, 0.0 }
 0x4c0   :  { %v2764_v63 = vsel %vm1341_vm3, %v2748_v4, 0.0  ;;  %v2765_v34 = vsel %vm1341_vm3, %v2749_v11, 0.0  ;;  %v2752_v13 = vmax.f32 %v2736_v50, 0.0  ;;  %v2753_v49 = vmax.f32 %v2737_v35, 0.0 }
 0x4c1   :  { %v2766_v2 = vsel %vm1341_vm3, %v2750_v58, 0.0  ;;  %v2767_v42 = vsel %vm1341_vm3, %v2751_v16, 0.0  ;;  %v2754_v24 = vmax.f32 %v2738_v61, 0.0  ;;  %v2755_v62 = vmax.f32 %v2739_v30, 0.0 }
 0x4c2   :  { %v2768_v27 = vsel %vm1341_vm3, %v2752_v13, 0.0  ;;  %v2769_v3 = vsel %vm1341_vm3, %v2753_v49, 0.0  ;;  %v2756_v12 = vmax.f32 %v2740_v59, 0.0  ;;  %v2757_v25 = vmax.f32 %v2741_v46, 0.0 }
 0x4c3   :  { %v2770_v18 = vsel %vm1341_vm3, %v2754_v24, 0.0  ;;  %v2771_v22 = vsel %vm1341_vm3, %v2755_v62, 0.0  ;;  %v2758_v53 = vmax.f32 %v2742_v7, 0.0 }
 0x4c4   :  { %v2772_v10 = vsel %vm1341_vm3, %v2756_v12, 0.0  ;;  %v2773_v31 = vsel %vm1341_vm3, %v2757_v25, 0.0 }
 0x4c5   :  { %2776 = vxpose.xlu1.b32.cont [2/16] (narrow) %v2760_v47, 8  ;;  %v2774_v5 = vsel %vm1341_vm3, %v2758_v53, 0.0 }
 0x4cd   :  { %2777 = vxpose.xlu1.b32.cont [3/16] (narrow) %v2761_v51, 8 }
 0x4d5   :  { %2778 = vxpose.xlu1.b32.cont [4/16] (narrow) %v2762_v40, 8 }
 0x4dd   :  { %2779 = vxpose.xlu1.b32.cont [5/16] (narrow) %v2763_v48, 8 }
 0x4e5   :  { %2780 = vxpose.xlu1.b32.cont [6/16] (narrow) %v2764_v63, 8 }
 0x4ed   :  { %2781 = vxpose.xlu1.b32.cont [7/16] (narrow) %v2765_v34, 8 }
 0x4f5   :  { %2782 = vxpose.xlu1.b32.cont [8/16] (narrow) %v2766_v2, 8 }
 0x4fd   :  { %2783 = vxpose.xlu1.b32.cont [9/16] (narrow) %v2767_v42, 8 }
 0x505   :  { %2784 = vxpose.xlu1.b32.cont [10/16] (narrow) %v2768_v27, 8 }
 0x50d   :  { %2785 = vxpose.xlu1.b32.cont [11/16] (narrow) %v2769_v3, 8 }
 0x515   :  { %2786 = vxpose.xlu1.b32.cont [12/16] (narrow) %v2770_v18, 8 }
 0x51d   :  { %2787 = vxpose.xlu1.b32.cont [13/16] (narrow) %v2771_v22, 8 }
 0x525   :  { %2788 = vxpose.xlu1.b32.cont [14/16] (narrow) %v2772_v10, 8 }
 0x52d   :  { %2789 = vxpose.xlu1.b32.cont [15/16] (narrow) %v2773_v31, 8 }
 0x535   :  { %2790 = vxpose.xlu1.b32.end [16/16] (narrow) %v2774_v5, 8 }
 0x561   :  { %v2791_v9 = vpop.trf.xlu1 }
 0x562   :  { %2807 = vst [vmem:[%s4653_s7] sm:$0xff] %v2791_v9 }

</bundles_post_ra>
